<compile_context>
chip_gen: v7x
topology: tpu7x:2x2x1
jax: 0.10.0
libtpu: 0.0.40
codegen_flags: <defaults>
</compile_context>

<pallas_src>
import math

import jax
import jax.numpy as jnp
from jax.experimental import pallas as pl
from jax.experimental.pallas import tpu as pltpu

TEXT_DIM = 512
IMAGE_DIM = 768


# ---------------------------------------------------------------------------
# Kernel
# ---------------------------------------------------------------------------
def _masked_mean_pool(x_ref, mask_ref):
    """Masked mean pool over the token axis.

    x: (BN, L, D) bf16 tokens, mask: (BN, L) f32.  The 1/count normalisation is
    folded into the (BN, L) mask weights before broadcasting against the D
    lanes, so the large (BN, L, D) tensor is touched exactly once (VPU fused
    mul-add, f32 accumulation).
    """
    m = mask_ref[...].astype(jnp.float32)               # (BN, L)
    cnt = jnp.sum(m, axis=1, keepdims=True)             # (BN, 1)
    w = m * (1.0 / (cnt + 1e-9))                         # normalised weights
    x = x_ref[...].astype(jnp.float32)                   # (BN, L, D) f32 accum
    return jnp.sum(x * w[:, :, None], axis=1)            # (BN, D)


def _matcher(m_ref, mm_ref, e_ref, em_ref, wm_ref, bm_ref, we_ref, be_ref):
    """Matcher2-equivalent: pool, project (MXU, H padded to 128), match, lane-reduce."""
    m_pool = _masked_mean_pool(m_ref, mm_ref)
    e_pool = _masked_mean_pool(e_ref, em_ref)
    pm = jnp.dot(m_pool, wm_ref[...], preferred_element_type=jnp.float32) + bm_ref[...]
    pe = jnp.dot(e_pool, we_ref[...], preferred_element_type=jnp.float32) + be_ref[...]
    return jnp.sum(pm * pe, axis=-1, keepdims=True)      # (BN, 1)


def ameli_kernel(
    # text modality (tokens bf16, masks f32)
    mt_ref, mtm_ref, et_ref, etm_ref,
    # image modality
    mi_ref, mim_ref, ei_ref, eim_ref,
    # attribute modality
    ma_ref, mam_ref, ea_ref, eam_ref,
    # matcher params (mention proj, entity proj) per modality, H padded to 128
    wtm_ref, btm_ref, wte_ref, bte_ref,
    wim_ref, bim_ref, wie_ref, bie_ref,
    wam_ref, bam_ref, wae_ref, bae_ref,
    # modality weight (3,) f32 in SMEM
    modw_ref,
    # output: (BN, 4) = [text, image, attr, weighted sum]
    scores_ref,
):
    text_score = _matcher(mt_ref, mtm_ref, et_ref, etm_ref,
                          wtm_ref, btm_ref, wte_ref, bte_ref)
    image_score = _matcher(mi_ref, mim_ref, ei_ref, eim_ref,
                           wim_ref, bim_ref, wie_ref, bie_ref)
    attr_score = _matcher(ma_ref, mam_ref, ea_ref, eam_ref,
                          wam_ref, bam_ref, wae_ref, bae_ref)

    # modality weights come from SMEM scalars (no VMEM lane extraction).
    w_text = modw_ref[0]
    w_image = modw_ref[1]
    w_attr = modw_ref[2]
    ems = text_score * w_text + image_score * w_image + attr_score * w_attr

    # Direct column writes; avoids jnp.concatenate vreg relayout.  Output
    # bytes (16 B/row) are negligible vs. the ~40 KB/row token stream.
    scores_ref[:, 0:1] = text_score
    scores_ref[:, 1:2] = image_score
    scores_ref[:, 2:3] = attr_score
    scores_ref[:, 3:4] = ems


# ---------------------------------------------------------------------------
# Wrapper
# ---------------------------------------------------------------------------
def masked_softmax(logits, mask):
    # TODO(synk): masked_softmax source not provided; additive -inf style with
    # re-masked numerator (fully masked rows -> all-zero probabilities).
    mask = mask.astype(jnp.float32)
    masked_logits = jnp.where(mask > 0, logits, jnp.full_like(logits, -1e30))
    mx = jnp.max(masked_logits, axis=-1, keepdims=True)
    ex = jnp.exp(masked_logits - mx) * mask
    return ex / (jnp.sum(ex, axis=-1, keepdims=True) + 1e-13)


def _pick_block_n(n, per_row_bytes, budget_bytes=12 << 20):
    """Largest multiple-of-8 divisor of n whose double-buffered streamed block
    fits the budget; falls back to n (single block) for tiny / odd n.

    Bigger tiles amortise the ~0.35 us per-grid-step overhead against the
    HBM-roofline step time; budget keeps total VMEM well under 64 MiB (v7x)."""
    if n <= 8:
        return n
    best = None
    b = 8
    while b <= min(n, 1024):
        if n % b == 0 and 2 * b * per_row_bytes <= budget_bytes:
            best = b
        b += 8
    return best if best is not None else n


def ameli_match_pooling2(inputs, params, label, batch_size, num_candidates):
    (mt, mtm, et, etm, mi, mim, ei, eim, ma, mam, ea, eam, entity_mask) = inputs
    (wtm, btm, wte, bte, wim, bim, wie, bie, wam, bam, wae, bae, modw) = params

    N = mt.shape[0]
    H = wtm.shape[1]
    h_pad = ((H + 127) // 128) * 128

    # Stream token embeddings as bf16 (the kernel is HBM-bandwidth bound);
    # pooling/matmul accumulate in f32 inside the kernel.
    # TODO(synk): in production the frozen CLIP encoder should emit bf16 directly.
    mt, et, mi, ei, ma, ea = (t.astype(jnp.bfloat16) for t in (mt, et, mi, ei, ma, ea))
    mtm, etm, mim, eim, mam, eam = (m.astype(jnp.float32)
                                    for m in (mtm, etm, mim, eim, mam, eam))

    def pad_wb(w, b):
        d, h = w.shape
        w_p = jnp.zeros((d, h_pad), jnp.float32).at[:, :h].set(w.astype(jnp.float32))
        b_p = jnp.zeros((1, h_pad), jnp.float32).at[:, :h].set(
            b.reshape(1, -1).astype(jnp.float32))
        return w_p, b_p

    wtm, btm = pad_wb(wtm, btm)
    wte, bte = pad_wb(wte, bte)
    wim, bim = pad_wb(wim, bim)
    wie, bie = pad_wb(wie, bie)
    wam, bam = pad_wb(wam, bam)
    wae, bae = pad_wb(wae, bae)
    modw = modw.reshape(-1).astype(jnp.float32)          # (3,) -> SMEM

    toks = (mt, et, mi, ei, ma, ea)
    msks = (mtm, etm, mim, eim, mam, eam)
    per_row_bytes = sum(t.shape[1] * t.shape[2] * 2 for t in toks)   # bf16 tokens
    per_row_bytes += sum(m.shape[1] * 4 for m in msks) + 4 * 4       # masks + scores
    bn = _pick_block_n(N, per_row_bytes)
    grid = (N // bn,)

    def tok_spec(t):
        l, d = t.shape[1], t.shape[2]
        return pl.BlockSpec((bn, l, d), lambda i: (i, 0, 0))

    def mask_spec(m):
        l = m.shape[1]
        return pl.BlockSpec((bn, l), lambda i: (i, 0))

    def w_spec(w):
        return pl.BlockSpec(w.shape, lambda i: (0, 0))   # resident; fetched once

    smem_spec = pl.BlockSpec(memory_space=pltpu.MemorySpace.SMEM)

    in_specs = [
        tok_spec(mt), mask_spec(mtm), tok_spec(et), mask_spec(etm),
        tok_spec(mi), mask_spec(mim), tok_spec(ei), mask_spec(eim),
        tok_spec(ma), mask_spec(mam), tok_spec(ea), mask_spec(eam),
        w_spec(wtm), w_spec(btm), w_spec(wte), w_spec(bte),
        w_spec(wim), w_spec(bim), w_spec(wie), w_spec(bie),
        w_spec(wam), w_spec(bam), w_spec(wae), w_spec(bae),
        smem_spec,
    ]
    out_spec = pl.BlockSpec((bn, 4), lambda i: (i, 0))

    # VMEM budget: double-buffered streamed blocks + (double-buffered) weights
    # + worst-case f32 temporaries from the bf16->f32 casts inside one modality.
    weight_bytes = sum(int(w.size) * 4 for w in
                       (wtm, btm, wte, bte, wim, bim, wie, bie, wam, bam, wae, bae))
    block_bytes = bn * per_row_bytes
    tmp_bytes = max(bn * (m_t.shape[1] + e_t.shape[1]) * m_t.shape[2] * 4
                    for m_t, e_t in ((mt, et), (mi, ei), (ma, ea)))
    vmem_limit = int(min(max(2 * block_bytes + 2 * weight_bytes + tmp_bytes + (4 << 20),
                             16 << 20), 64 << 20))

    flops = 0
    bytes_accessed = 0
    for m_t, e_t in ((mt, et), (mi, ei), (ma, ea)):
        d = m_t.shape[2]
        lm, le = m_t.shape[1], e_t.shape[1]
        flops += 2 * N * (lm + le) * d           # masked pooling (mul + add)
        flops += 2 * 2 * N * d * h_pad           # mention + entity projections
        flops += 3 * N * h_pad                   # elementwise match + lane reduce
        bytes_accessed += N * (lm + le) * d * 2 + N * (lm + le) * 4
        bytes_accessed += 2 * (d + 1) * h_pad * 4
    bytes_accessed += N * 4 * 4 + 3 * 4

    scores = pl.pallas_call(
        ameli_kernel,
        out_shape=jax.ShapeDtypeStruct((N, 4), jnp.float32),
        grid=grid,
        in_specs=in_specs,
        out_specs=out_spec,
        compiler_params=pltpu.CompilerParams(
            dimension_semantics=("parallel",),
            vmem_limit_bytes=vmem_limit,
        ),
        cost_estimate=pl.CostEstimate(
            flops=flops, transcendentals=0, bytes_accessed=bytes_accessed),
    )(mt, mtm, et, etm, mi, mim, ei, eim, ma, mam, ea, eam,
      wtm, btm, wte, bte, wim, bim, wie, bie, wam, bam, wae, bae, modw)

    entity_text_match_score = scores[:, 0]
    entity_image_match_score = scores[:, 1]
    entity_attribute_match_score = scores[:, 2]
    entity_match_score = scores[:, 3]

    # O(B*C) candidate softmax in plain JAX (hoisting it out of the kernel is
    # what unblocks tiling over N).
    logits = entity_match_score.reshape(batch_size, num_candidates)
    logics = masked_softmax(logits, entity_mask)

    return (logics, label, entity_match_score, entity_text_match_score,
            entity_image_match_score, entity_attribute_match_score)


# ---------------------------------------------------------------------------
# Self-contained test
# ---------------------------------------------------------------------------
def _linear_params(key, din, dout):
    k1, k2 = jax.random.split(key)
    bound = 1.0 / math.sqrt(din)
    w = jax.random.uniform(k1, (din, dout), jnp.float32, -bound, bound)
    b = jax.random.uniform(k2, (dout,), jnp.float32, -bound, bound)
    return w, b


def _length_mask(key, n, l):
    lens = jax.random.randint(key, (n, 1), 1, l + 1)
    return (jax.lax.broadcasted_iota(jnp.int32, (n, l), 1) < lens).astype(jnp.float32)


if __name__ == "__main__":
    B, C = 2, 4               # batch, candidate entities per mention
    N = B * C
    H = 32                    # args.model_embed_dim
    LT_M, LT_E = 8, 8         # text token counts (mention / entity)
    LI_M, LI_E = 2, 3         # max_mention_image_num / max_entity_image_num
    LA_M, LA_E = 8, 8         # attribute token counts

    key = jax.random.PRNGKey(0)
    ks = jax.random.split(key, 24)

    # synthetic encoder outputs (stand-in for CLIP Encoder outputs)
    mt = jax.random.normal(ks[0], (N, LT_M, TEXT_DIM), jnp.float32)
    et = jax.random.normal(ks[1], (N, LT_E, TEXT_DIM), jnp.float32)
    mi = jax.random.normal(ks[2], (N, LI_M, IMAGE_DIM), jnp.float32)
    ei = jax.random.normal(ks[3], (N, LI_E, IMAGE_DIM), jnp.float32)
    ma = jax.random.normal(ks[4], (N, LA_M, TEXT_DIM), jnp.float32)
    ea = jax.random.normal(ks[5], (N, LA_E, TEXT_DIM), jnp.float32)

    mtm = _length_mask(ks[6], N, LT_M)
    etm = _length_mask(ks[7], N, LT_E)
    # the PyTorch forward calls image_matcher with attention_mask=None ->
    # plain mean over images, i.e. all-ones masks here.
    mim = jnp.ones((N, LI_M), jnp.float32)
    eim = jnp.ones((N, LI_E), jnp.float32)
    mam = _length_mask(ks[10], N, LA_M)
    eam = _length_mask(ks[11], N, LA_E)

    # candidate entity mask (B, C): mask out the last candidate of batch row 1
    entity_mask = jnp.ones((B, C), jnp.float32).at[1, C - 1].set(0.0)
    label = jnp.array([0, 2], jnp.int32)

    # matcher + modality parameters (deterministic init)
    wtm, btm = _linear_params(ks[12], TEXT_DIM, H)
    wte, bte = _linear_params(ks[13], TEXT_DIM, H)
    wim, bim = _linear_params(ks[14], IMAGE_DIM, H)
    wie, bie = _linear_params(ks[15], IMAGE_DIM, H)
    wam, bam = _linear_params(ks[16], TEXT_DIM, H)
    wae, bae = _linear_params(ks[17], TEXT_DIM, H)
    modality_weight = jax.random.uniform(ks[18], (3,), jnp.float32, -1.0, 1.0)

    inputs = (mt, mtm, et, etm, mi, mim, ei, eim, ma, mam, ea, eam, entity_mask)
    params = (wtm, btm, wte, bte, wim, bim, wie, bie, wam, bam, wae, bae,
              modality_weight)

    outs = ameli_match_pooling2(inputs, params, label, B, C)
    outs = jax.block_until_ready(outs)
    logics = outs[0]
    assert logics.shape == (B, C)
    assert bool(jnp.all(jnp.isfinite(outs[2])))
    # rows of the masked softmax must sum to ~1
    assert bool(jnp.all(jnp.abs(jnp.sum(logics, axis=-1) - 1.0) < 1e-4))
    print("KERNEL_OK")
</pallas_src>

<mosaic_0001>
module attributes {stable_mosaic.version = 11 : i64} {
  func.func @ameli_kernel(%arg0: i32, %arg1: memref<8x8x512xbf16, #tpu.memory_space<vmem>>, %arg2: memref<8x8xf32, #tpu.memory_space<vmem>>, %arg3: memref<8x8x512xbf16, #tpu.memory_space<vmem>>, %arg4: memref<8x8xf32, #tpu.memory_space<vmem>>, %arg5: memref<8x2x768xbf16, #tpu.memory_space<vmem>>, %arg6: memref<8x2xf32, #tpu.memory_space<vmem>>, %arg7: memref<8x3x768xbf16, #tpu.memory_space<vmem>>, %arg8: memref<8x3xf32, #tpu.memory_space<vmem>>, %arg9: memref<8x8x512xbf16, #tpu.memory_space<vmem>>, %arg10: memref<8x8xf32, #tpu.memory_space<vmem>>, %arg11: memref<8x8x512xbf16, #tpu.memory_space<vmem>>, %arg12: memref<8x8xf32, #tpu.memory_space<vmem>>, %arg13: memref<512x128xf32, #tpu.memory_space<vmem>>, %arg14: memref<1x128xf32, #tpu.memory_space<vmem>>, %arg15: memref<512x128xf32, #tpu.memory_space<vmem>>, %arg16: memref<1x128xf32, #tpu.memory_space<vmem>>, %arg17: memref<768x128xf32, #tpu.memory_space<vmem>>, %arg18: memref<1x128xf32, #tpu.memory_space<vmem>>, %arg19: memref<768x128xf32, #tpu.memory_space<vmem>>, %arg20: memref<1x128xf32, #tpu.memory_space<vmem>>, %arg21: memref<512x128xf32, #tpu.memory_space<vmem>>, %arg22: memref<1x128xf32, #tpu.memory_space<vmem>>, %arg23: memref<512x128xf32, #tpu.memory_space<vmem>>, %arg24: memref<1x128xf32, #tpu.memory_space<vmem>>, %arg25: memref<3xf32, #tpu.memory_space<smem>>, %arg26: memref<8x4xf32, #tpu.memory_space<vmem>>) attributes {dimension_semantics = [#tpu.dimension_semantics<parallel>], iteration_bounds = array<i64: 1>, scalar_prefetch = 0 : i64, scratch_operands = 0 : i64, tpu.core_type = #tpu.core_type<tc>, window_params = [{transform_indices = @transform_0, window_bounds = array<i64: 8, 8, 512>}, {transform_indices = @transform_1, window_bounds = array<i64: 8, 8>}, {transform_indices = @transform_2, window_bounds = array<i64: 8, 8, 512>}, {transform_indices = @transform_3, window_bounds = array<i64: 8, 8>}, {transform_indices = @transform_4, window_bounds = array<i64: 8, 2, 768>}, {transform_indices = @transform_5, window_bounds = array<i64: 8, 2>}, {transform_indices = @transform_6, window_bounds = array<i64: 8, 3, 768>}, {transform_indices = @transform_7, window_bounds = array<i64: 8, 3>}, {transform_indices = @transform_8, window_bounds = array<i64: 8, 8, 512>}, {transform_indices = @transform_9, window_bounds = array<i64: 8, 8>}, {transform_indices = @transform_10, window_bounds = array<i64: 8, 8, 512>}, {transform_indices = @transform_11, window_bounds = array<i64: 8, 8>}, {pipeline_mode = #tpu.pipeline_mode<synchronous>, transform_indices = @transform_12, window_bounds = array<i64: 512, 128>}, {pipeline_mode = #tpu.pipeline_mode<synchronous>, transform_indices = @transform_13, window_bounds = array<i64: 1, 128>}, {pipeline_mode = #tpu.pipeline_mode<synchronous>, transform_indices = @transform_14, window_bounds = array<i64: 512, 128>}, {pipeline_mode = #tpu.pipeline_mode<synchronous>, transform_indices = @transform_15, window_bounds = array<i64: 1, 128>}, {pipeline_mode = #tpu.pipeline_mode<synchronous>, transform_indices = @transform_16, window_bounds = array<i64: 768, 128>}, {pipeline_mode = #tpu.pipeline_mode<synchronous>, transform_indices = @transform_17, window_bounds = array<i64: 1, 128>}, {pipeline_mode = #tpu.pipeline_mode<synchronous>, transform_indices = @transform_18, window_bounds = array<i64: 768, 128>}, {pipeline_mode = #tpu.pipeline_mode<synchronous>, transform_indices = @transform_19, window_bounds = array<i64: 1, 128>}, {pipeline_mode = #tpu.pipeline_mode<synchronous>, transform_indices = @transform_20, window_bounds = array<i64: 512, 128>}, {pipeline_mode = #tpu.pipeline_mode<synchronous>, transform_indices = @transform_21, window_bounds = array<i64: 1, 128>}, {pipeline_mode = #tpu.pipeline_mode<synchronous>, transform_indices = @transform_22, window_bounds = array<i64: 512, 128>}, {pipeline_mode = #tpu.pipeline_mode<synchronous>, transform_indices = @transform_23, window_bounds = array<i64: 1, 128>}, {transform_indices = @transform_24, window_bounds = array<i64: 3>}, {transform_indices = @transform_25, window_bounds = array<i64: 8, 4>}]} {
    %c0 = arith.constant 0 : index
    %c0_0 = arith.constant 0 : index
    %0 = vector.load %arg2[%c0, %c0_0] : memref<8x8xf32, #tpu.memory_space<vmem>>, vector<8x8xf32>
    %cst = arith.constant dense<0.000000e+00> : vector<8xf32>
    %1 = vector.multi_reduction <add>, %0, %cst [1] : vector<8x8xf32> to vector<8xf32>
    %2 = vector.shape_cast %1 : vector<8xf32> to vector<8x1xf32>
    %cst_1 = arith.constant 9.99999971E-10 : f32
    %3 = vector.broadcast %cst_1 : f32 to vector<8x1xf32>
    %4 = arith.addf %2, %3 : vector<8x1xf32>
    %cst_2 = arith.constant 1.000000e+00 : f32
    %5 = vector.broadcast %cst_2 : f32 to vector<8x1xf32>
    %6 = arith.divf %5, %4 : vector<8x1xf32>
    %7 = vector.broadcast %6 : vector<8x1xf32> to vector<8x8xf32>
    %8 = arith.mulf %0, %7 : vector<8x8xf32>
    %c0_3 = arith.constant 0 : index
    %c0_4 = arith.constant 0 : index
    %c0_5 = arith.constant 0 : index
    %9 = vector.load %arg1[%c0_3, %c0_4, %c0_5] : memref<8x8x512xbf16, #tpu.memory_space<vmem>>, vector<8x8x512xbf16>
    %10 = arith.extf %9 : vector<8x8x512xbf16> to vector<8x8x512xf32>
    %11 = vector.shape_cast %8 : vector<8x8xf32> to vector<8x8x1xf32>
    %12 = vector.broadcast %11 : vector<8x8x1xf32> to vector<8x8x512xf32>
    %13 = arith.mulf %10, %12 : vector<8x8x512xf32>
    %cst_6 = arith.constant dense<0.000000e+00> : vector<8x512xf32>
    %14 = vector.multi_reduction <add>, %13, %cst_6 [1] : vector<8x8x512xf32> to vector<8x512xf32>
    %c0_7 = arith.constant 0 : index
    %c0_8 = arith.constant 0 : index
    %15 = vector.load %arg4[%c0_7, %c0_8] : memref<8x8xf32, #tpu.memory_space<vmem>>, vector<8x8xf32>
    %cst_9 = arith.constant dense<0.000000e+00> : vector<8xf32>
    %16 = vector.multi_reduction <add>, %15, %cst_9 [1] : vector<8x8xf32> to vector<8xf32>
    %17 = vector.shape_cast %16 : vector<8xf32> to vector<8x1xf32>
    %cst_10 = arith.constant 9.99999971E-10 : f32
    %18 = vector.broadcast %cst_10 : f32 to vector<8x1xf32>
    %19 = arith.addf %17, %18 : vector<8x1xf32>
    %cst_11 = arith.constant 1.000000e+00 : f32
    %20 = vector.broadcast %cst_11 : f32 to vector<8x1xf32>
    %21 = arith.divf %20, %19 : vector<8x1xf32>
    %22 = vector.broadcast %21 : vector<8x1xf32> to vector<8x8xf32>
    %23 = arith.mulf %15, %22 : vector<8x8xf32>
    %c0_12 = arith.constant 0 : index
    %c0_13 = arith.constant 0 : index
    %c0_14 = arith.constant 0 : index
    %24 = vector.load %arg3[%c0_12, %c0_13, %c0_14] : memref<8x8x512xbf16, #tpu.memory_space<vmem>>, vector<8x8x512xbf16>
    %25 = arith.extf %24 : vector<8x8x512xbf16> to vector<8x8x512xf32>
    %26 = vector.shape_cast %23 : vector<8x8xf32> to vector<8x8x1xf32>
    %27 = vector.broadcast %26 : vector<8x8x1xf32> to vector<8x8x512xf32>
    %28 = arith.mulf %25, %27 : vector<8x8x512xf32>
    %cst_15 = arith.constant dense<0.000000e+00> : vector<8x512xf32>
    %29 = vector.multi_reduction <add>, %28, %cst_15 [1] : vector<8x8x512xf32> to vector<8x512xf32>
    %c0_16 = arith.constant 0 : index
    %c0_17 = arith.constant 0 : index
    %30 = vector.load %arg13[%c0_16, %c0_17] : memref<512x128xf32, #tpu.memory_space<vmem>>, vector<512x128xf32>
    %cst_18 = arith.constant dense<0.000000e+00> : vector<8x128xf32>
    %31 = tpu.matmul %14, %30, %cst_18 {dimension_numbers = #tpu.dot_dimension_numbers<[1], [0], [0], [1], [0, 0, 1, 1], [], []>} : vector<8x512xf32>, vector<512x128xf32>, vector<8x128xf32> -> vector<8x128xf32>
    %c0_19 = arith.constant 0 : index
    %c0_20 = arith.constant 0 : index
    %32 = vector.load %arg14[%c0_19, %c0_20] : memref<1x128xf32, #tpu.memory_space<vmem>>, vector<1x128xf32>
    %33 = vector.broadcast %32 : vector<1x128xf32> to vector<8x128xf32>
    %34 = arith.addf %31, %33 : vector<8x128xf32>
    %c0_21 = arith.constant 0 : index
    %c0_22 = arith.constant 0 : index
    %35 = vector.load %arg15[%c0_21, %c0_22] : memref<512x128xf32, #tpu.memory_space<vmem>>, vector<512x128xf32>
    %cst_23 = arith.constant dense<0.000000e+00> : vector<8x128xf32>
    %36 = tpu.matmul %29, %35, %cst_23 {dimension_numbers = #tpu.dot_dimension_numbers<[1], [0], [0], [1], [0, 0, 1, 1], [], []>} : vector<8x512xf32>, vector<512x128xf32>, vector<8x128xf32> -> vector<8x128xf32>
    %c0_24 = arith.constant 0 : index
    %c0_25 = arith.constant 0 : index
    %37 = vector.load %arg16[%c0_24, %c0_25] : memref<1x128xf32, #tpu.memory_space<vmem>>, vector<1x128xf32>
    %38 = vector.broadcast %37 : vector<1x128xf32> to vector<8x128xf32>
    %39 = arith.addf %36, %38 : vector<8x128xf32>
    %40 = arith.mulf %34, %39 : vector<8x128xf32>
    %cst_26 = arith.constant dense<0.000000e+00> : vector<8xf32>
    %41 = vector.multi_reduction <add>, %40, %cst_26 [1] : vector<8x128xf32> to vector<8xf32>
    %42 = vector.shape_cast %41 : vector<8xf32> to vector<8x1xf32>
    %c0_27 = arith.constant 0 : index
    %c0_28 = arith.constant 0 : index
    %43 = vector.load %arg6[%c0_27, %c0_28] : memref<8x2xf32, #tpu.memory_space<vmem>>, vector<8x2xf32>
    %cst_29 = arith.constant dense<0.000000e+00> : vector<8xf32>
    %44 = vector.multi_reduction <add>, %43, %cst_29 [1] : vector<8x2xf32> to vector<8xf32>
    %45 = vector.shape_cast %44 : vector<8xf32> to vector<8x1xf32>
    %cst_30 = arith.constant 9.99999971E-10 : f32
    %46 = vector.broadcast %cst_30 : f32 to vector<8x1xf32>
    %47 = arith.addf %45, %46 : vector<8x1xf32>
    %cst_31 = arith.constant 1.000000e+00 : f32
    %48 = vector.broadcast %cst_31 : f32 to vector<8x1xf32>
    %49 = arith.divf %48, %47 : vector<8x1xf32>
    %50 = vector.broadcast %49 : vector<8x1xf32> to vector<8x2xf32>
    %51 = arith.mulf %43, %50 : vector<8x2xf32>
    %c0_32 = arith.constant 0 : index
    %c0_33 = arith.constant 0 : index
    %c0_34 = arith.constant 0 : index
    %52 = vector.load %arg5[%c0_32, %c0_33, %c0_34] : memref<8x2x768xbf16, #tpu.memory_space<vmem>>, vector<8x2x768xbf16>
    %53 = arith.extf %52 : vector<8x2x768xbf16> to vector<8x2x768xf32>
    %54 = vector.shape_cast %51 : vector<8x2xf32> to vector<8x2x1xf32>
    %55 = vector.broadcast %54 : vector<8x2x1xf32> to vector<8x2x768xf32>
    %56 = arith.mulf %53, %55 : vector<8x2x768xf32>
    %cst_35 = arith.constant dense<0.000000e+00> : vector<8x768xf32>
    %57 = vector.multi_reduction <add>, %56, %cst_35 [1] : vector<8x2x768xf32> to vector<8x768xf32>
    %c0_36 = arith.constant 0 : index
    %c0_37 = arith.constant 0 : index
    %58 = vector.load %arg8[%c0_36, %c0_37] : memref<8x3xf32, #tpu.memory_space<vmem>>, vector<8x3xf32>
    %cst_38 = arith.constant dense<0.000000e+00> : vector<8xf32>
    %59 = vector.multi_reduction <add>, %58, %cst_38 [1] : vector<8x3xf32> to vector<8xf32>
    %60 = vector.shape_cast %59 : vector<8xf32> to vector<8x1xf32>
    %cst_39 = arith.constant 9.99999971E-10 : f32
    %61 = vector.broadcast %cst_39 : f32 to vector<8x1xf32>
    %62 = arith.addf %60, %61 : vector<8x1xf32>
    %cst_40 = arith.constant 1.000000e+00 : f32
    %63 = vector.broadcast %cst_40 : f32 to vector<8x1xf32>
    %64 = arith.divf %63, %62 : vector<8x1xf32>
    %65 = vector.broadcast %64 : vector<8x1xf32> to vector<8x3xf32>
    %66 = arith.mulf %58, %65 : vector<8x3xf32>
    %c0_41 = arith.constant 0 : index
    %c0_42 = arith.constant 0 : index
    %c0_43 = arith.constant 0 : index
    %67 = vector.load %arg7[%c0_41, %c0_42, %c0_43] : memref<8x3x768xbf16, #tpu.memory_space<vmem>>, vector<8x3x768xbf16>
    %68 = arith.extf %67 : vector<8x3x768xbf16> to vector<8x3x768xf32>
    %69 = vector.shape_cast %66 : vector<8x3xf32> to vector<8x3x1xf32>
    %70 = vector.broadcast %69 : vector<8x3x1xf32> to vector<8x3x768xf32>
    %71 = arith.mulf %68, %70 : vector<8x3x768xf32>
    %cst_44 = arith.constant dense<0.000000e+00> : vector<8x768xf32>
    %72 = vector.multi_reduction <add>, %71, %cst_44 [1] : vector<8x3x768xf32> to vector<8x768xf32>
    %c0_45 = arith.constant 0 : index
    %c0_46 = arith.constant 0 : index
    %73 = vector.load %arg17[%c0_45, %c0_46] : memref<768x128xf32, #tpu.memory_space<vmem>>, vector<768x128xf32>
    %cst_47 = arith.constant dense<0.000000e+00> : vector<8x128xf32>
    %74 = tpu.matmul %57, %73, %cst_47 {dimension_numbers = #tpu.dot_dimension_numbers<[1], [0], [0], [1], [0, 0, 1, 1], [], []>} : vector<8x768xf32>, vector<768x128xf32>, vector<8x128xf32> -> vector<8x128xf32>
    %c0_48 = arith.constant 0 : index
    %c0_49 = arith.constant 0 : index
    %75 = vector.load %arg18[%c0_48, %c0_49] : memref<1x128xf32, #tpu.memory_space<vmem>>, vector<1x128xf32>
    %76 = vector.broadcast %75 : vector<1x128xf32> to vector<8x128xf32>
    %77 = arith.addf %74, %76 : vector<8x128xf32>
    %c0_50 = arith.constant 0 : index
    %c0_51 = arith.constant 0 : index
    %78 = vector.load %arg19[%c0_50, %c0_51] : memref<768x128xf32, #tpu.memory_space<vmem>>, vector<768x128xf32>
    %cst_52 = arith.constant dense<0.000000e+00> : vector<8x128xf32>
    %79 = tpu.matmul %72, %78, %cst_52 {dimension_numbers = #tpu.dot_dimension_numbers<[1], [0], [0], [1], [0, 0, 1, 1], [], []>} : vector<8x768xf32>, vector<768x128xf32>, vector<8x128xf32> -> vector<8x128xf32>
    %c0_53 = arith.constant 0 : index
    %c0_54 = arith.constant 0 : index
    %80 = vector.load %arg20[%c0_53, %c0_54] : memref<1x128xf32, #tpu.memory_space<vmem>>, vector<1x128xf32>
    %81 = vector.broadcast %80 : vector<1x128xf32> to vector<8x128xf32>
    %82 = arith.addf %79, %81 : vector<8x128xf32>
    %83 = arith.mulf %77, %82 : vector<8x128xf32>
    %cst_55 = arith.constant dense<0.000000e+00> : vector<8xf32>
    %84 = vector.multi_reduction <add>, %83, %cst_55 [1] : vector<8x128xf32> to vector<8xf32>
    %85 = vector.shape_cast %84 : vector<8xf32> to vector<8x1xf32>
    %c0_56 = arith.constant 0 : index
    %c0_57 = arith.constant 0 : index
    %86 = vector.load %arg10[%c0_56, %c0_57] : memref<8x8xf32, #tpu.memory_space<vmem>>, vector<8x8xf32>
    %cst_58 = arith.constant dense<0.000000e+00> : vector<8xf32>
    %87 = vector.multi_reduction <add>, %86, %cst_58 [1] : vector<8x8xf32> to vector<8xf32>
    %88 = vector.shape_cast %87 : vector<8xf32> to vector<8x1xf32>
    %cst_59 = arith.constant 9.99999971E-10 : f32
    %89 = vector.broadcast %cst_59 : f32 to vector<8x1xf32>
    %90 = arith.addf %88, %89 : vector<8x1xf32>
    %cst_60 = arith.constant 1.000000e+00 : f32
    %91 = vector.broadcast %cst_60 : f32 to vector<8x1xf32>
    %92 = arith.divf %91, %90 : vector<8x1xf32>
    %93 = vector.broadcast %92 : vector<8x1xf32> to vector<8x8xf32>
    %94 = arith.mulf %86, %93 : vector<8x8xf32>
    %c0_61 = arith.constant 0 : index
    %c0_62 = arith.constant 0 : index
    %c0_63 = arith.constant 0 : index
    %95 = vector.load %arg9[%c0_61, %c0_62, %c0_63] : memref<8x8x512xbf16, #tpu.memory_space<vmem>>, vector<8x8x512xbf16>
    %96 = arith.extf %95 : vector<8x8x512xbf16> to vector<8x8x512xf32>
    %97 = vector.shape_cast %94 : vector<8x8xf32> to vector<8x8x1xf32>
    %98 = vector.broadcast %97 : vector<8x8x1xf32> to vector<8x8x512xf32>
    %99 = arith.mulf %96, %98 : vector<8x8x512xf32>
    %cst_64 = arith.constant dense<0.000000e+00> : vector<8x512xf32>
    %100 = vector.multi_reduction <add>, %99, %cst_64 [1] : vector<8x8x512xf32> to vector<8x512xf32>
    %c0_65 = arith.constant 0 : index
    %c0_66 = arith.constant 0 : index
    %101 = vector.load %arg12[%c0_65, %c0_66] : memref<8x8xf32, #tpu.memory_space<vmem>>, vector<8x8xf32>
    %cst_67 = arith.constant dense<0.000000e+00> : vector<8xf32>
    %102 = vector.multi_reduction <add>, %101, %cst_67 [1] : vector<8x8xf32> to vector<8xf32>
    %103 = vector.shape_cast %102 : vector<8xf32> to vector<8x1xf32>
    %cst_68 = arith.constant 9.99999971E-10 : f32
    %104 = vector.broadcast %cst_68 : f32 to vector<8x1xf32>
    %105 = arith.addf %103, %104 : vector<8x1xf32>
    %cst_69 = arith.constant 1.000000e+00 : f32
    %106 = vector.broadcast %cst_69 : f32 to vector<8x1xf32>
    %107 = arith.divf %106, %105 : vector<8x1xf32>
    %108 = vector.broadcast %107 : vector<8x1xf32> to vector<8x8xf32>
    %109 = arith.mulf %101, %108 : vector<8x8xf32>
    %c0_70 = arith.constant 0 : index
    %c0_71 = arith.constant 0 : index
    %c0_72 = arith.constant 0 : index
    %110 = vector.load %arg11[%c0_70, %c0_71, %c0_72] : memref<8x8x512xbf16, #tpu.memory_space<vmem>>, vector<8x8x512xbf16>
    %111 = arith.extf %110 : vector<8x8x512xbf16> to vector<8x8x512xf32>
    %112 = vector.shape_cast %109 : vector<8x8xf32> to vector<8x8x1xf32>
    %113 = vector.broadcast %112 : vector<8x8x1xf32> to vector<8x8x512xf32>
    %114 = arith.mulf %111, %113 : vector<8x8x512xf32>
    %cst_73 = arith.constant dense<0.000000e+00> : vector<8x512xf32>
    %115 = vector.multi_reduction <add>, %114, %cst_73 [1] : vector<8x8x512xf32> to vector<8x512xf32>
    %c0_74 = arith.constant 0 : index
    %c0_75 = arith.constant 0 : index
    %116 = vector.load %arg21[%c0_74, %c0_75] : memref<512x128xf32, #tpu.memory_space<vmem>>, vector<512x128xf32>
    %cst_76 = arith.constant dense<0.000000e+00> : vector<8x128xf32>
    %117 = tpu.matmul %100, %116, %cst_76 {dimension_numbers = #tpu.dot_dimension_numbers<[1], [0], [0], [1], [0, 0, 1, 1], [], []>} : vector<8x512xf32>, vector<512x128xf32>, vector<8x128xf32> -> vector<8x128xf32>
    %c0_77 = arith.constant 0 : index
    %c0_78 = arith.constant 0 : index
    %118 = vector.load %arg22[%c0_77, %c0_78] : memref<1x128xf32, #tpu.memory_space<vmem>>, vector<1x128xf32>
    %119 = vector.broadcast %118 : vector<1x128xf32> to vector<8x128xf32>
    %120 = arith.addf %117, %119 : vector<8x128xf32>
    %c0_79 = arith.constant 0 : index
    %c0_80 = arith.constant 0 : index
    %121 = vector.load %arg23[%c0_79, %c0_80] : memref<512x128xf32, #tpu.memory_space<vmem>>, vector<512x128xf32>
    %cst_81 = arith.constant dense<0.000000e+00> : vector<8x128xf32>
    %122 = tpu.matmul %115, %121, %cst_81 {dimension_numbers = #tpu.dot_dimension_numbers<[1], [0], [0], [1], [0, 0, 1, 1], [], []>} : vector<8x512xf32>, vector<512x128xf32>, vector<8x128xf32> -> vector<8x128xf32>
    %c0_82 = arith.constant 0 : index
    %c0_83 = arith.constant 0 : index
    %123 = vector.load %arg24[%c0_82, %c0_83] : memref<1x128xf32, #tpu.memory_space<vmem>>, vector<1x128xf32>
    %124 = vector.broadcast %123 : vector<1x128xf32> to vector<8x128xf32>
    %125 = arith.addf %122, %124 : vector<8x128xf32>
    %126 = arith.mulf %120, %125 : vector<8x128xf32>
    %cst_84 = arith.constant dense<0.000000e+00> : vector<8xf32>
    %127 = vector.multi_reduction <add>, %126, %cst_84 [1] : vector<8x128xf32> to vector<8xf32>
    %128 = vector.shape_cast %127 : vector<8xf32> to vector<8x1xf32>
    %c0_85 = arith.constant 0 : index
    %129 = memref.load %arg25[%c0_85] : memref<3xf32, #tpu.memory_space<smem>>
    %c1 = arith.constant 1 : index
    %130 = memref.load %arg25[%c1] : memref<3xf32, #tpu.memory_space<smem>>
    %c2 = arith.constant 2 : index
    %131 = memref.load %arg25[%c2] : memref<3xf32, #tpu.memory_space<smem>>
    %132 = vector.broadcast %129 : f32 to vector<8x1xf32>
    %133 = arith.mulf %42, %132 : vector<8x1xf32>
    %134 = vector.broadcast %130 : f32 to vector<8x1xf32>
    %135 = arith.mulf %85, %134 : vector<8x1xf32>
    %136 = arith.addf %133, %135 : vector<8x1xf32>
    %137 = vector.broadcast %131 : f32 to vector<8x1xf32>
    %138 = arith.mulf %128, %137 : vector<8x1xf32>
    %139 = arith.addf %136, %138 : vector<8x1xf32>
    %c0_86 = arith.constant 0 : index
    %c0_87 = arith.constant 0 : index
    %140 = vector.load %arg26[%c0_86, %c0_87] : memref<8x4xf32, #tpu.memory_space<vmem>>, vector<8x1xf32>
    tpu.vector_store %arg26[%c0_86, %c0_87], %42 {strides = array<i32>} : memref<8x4xf32, #tpu.memory_space<vmem>>, vector<8x1xf32>,
    %c0_88 = arith.constant 0 : index
    %c1_89 = arith.constant 1 : index
    %141 = vector.load %arg26[%c0_88, %c1_89] : memref<8x4xf32, #tpu.memory_space<vmem>>, vector<8x1xf32>
    tpu.vector_store %arg26[%c0_88, %c1_89], %85 {strides = array<i32>} : memref<8x4xf32, #tpu.memory_space<vmem>>, vector<8x1xf32>,
    %c0_90 = arith.constant 0 : index
    %c2_91 = arith.constant 2 : index
    %142 = vector.load %arg26[%c0_90, %c2_91] : memref<8x4xf32, #tpu.memory_space<vmem>>, vector<8x1xf32>
    tpu.vector_store %arg26[%c0_90, %c2_91], %128 {strides = array<i32>} : memref<8x4xf32, #tpu.memory_space<vmem>>, vector<8x1xf32>,
    %c0_92 = arith.constant 0 : index
    %c3 = arith.constant 3 : index
    %143 = vector.load %arg26[%c0_92, %c3] : memref<8x4xf32, #tpu.memory_space<vmem>>, vector<8x1xf32>
    tpu.vector_store %arg26[%c0_92, %c3], %139 {strides = array<i32>} : memref<8x4xf32, #tpu.memory_space<vmem>>, vector<8x1xf32>,
    return
  }
  func.func @transform_0(%arg0: i32) -> (i32, i32, i32) {
    %c0_i32 = arith.constant 0 : i32
    %c0_i32_0 = arith.constant 0 : i32
    %c0_i32_1 = arith.constant 0 : i32
    return %arg0, %c0_i32, %c0_i32_0 : i32, i32, i32
  }
  func.func @transform_1(%arg0: i32) -> (i32, i32) {
    %c0_i32 = arith.constant 0 : i32
    %c0_i32_0 = arith.constant 0 : i32
    return %arg0, %c0_i32 : i32, i32
  }
  func.func @transform_2(%arg0: i32) -> (i32, i32, i32) {
    %c0_i32 = arith.constant 0 : i32
    %c0_i32_0 = arith.constant 0 : i32
    %c0_i32_1 = arith.constant 0 : i32
    return %arg0, %c0_i32, %c0_i32_0 : i32, i32, i32
  }
  func.func @transform_3(%arg0: i32) -> (i32, i32) {
    %c0_i32 = arith.constant 0 : i32
    %c0_i32_0 = arith.constant 0 : i32
    return %arg0, %c0_i32 : i32, i32
  }
  func.func @transform_4(%arg0: i32) -> (i32, i32, i32) {
    %c0_i32 = arith.constant 0 : i32
    %c0_i32_0 = arith.constant 0 : i32
    %c0_i32_1 = arith.constant 0 : i32
    return %arg0, %c0_i32, %c0_i32_0 : i32, i32, i32
  }
  func.func @transform_5(%arg0: i32) -> (i32, i32) {
    %c0_i32 = arith.constant 0 : i32
    %c0_i32_0 = arith.constant 0 : i32
    return %arg0, %c0_i32 : i32, i32
  }
  func.func @transform_6(%arg0: i32) -> (i32, i32, i32) {
    %c0_i32 = arith.constant 0 : i32
    %c0_i32_0 = arith.constant 0 : i32
    %c0_i32_1 = arith.constant 0 : i32
    return %arg0, %c0_i32, %c0_i32_0 : i32, i32, i32
  }
  func.func @transform_7(%arg0: i32) -> (i32, i32) {
    %c0_i32 = arith.constant 0 : i32
    %c0_i32_0 = arith.constant 0 : i32
    return %arg0, %c0_i32 : i32, i32
  }
  func.func @transform_8(%arg0: i32) -> (i32, i32, i32) {
    %c0_i32 = arith.constant 0 : i32
    %c0_i32_0 = arith.constant 0 : i32
    %c0_i32_1 = arith.constant 0 : i32
    return %arg0, %c0_i32, %c0_i32_0 : i32, i32, i32
  }
  func.func @transform_9(%arg0: i32) -> (i32, i32) {
    %c0_i32 = arith.constant 0 : i32
    %c0_i32_0 = arith.constant 0 : i32
    return %arg0, %c0_i32 : i32, i32
  }
  func.func @transform_10(%arg0: i32) -> (i32, i32, i32) {
    %c0_i32 = arith.constant 0 : i32
    %c0_i32_0 = arith.constant 0 : i32
    %c0_i32_1 = arith.constant 0 : i32
    return %arg0, %c0_i32, %c0_i32_0 : i32, i32, i32
  }
  func.func @transform_11(%arg0: i32) -> (i32, i32) {
    %c0_i32 = arith.constant 0 : i32
    %c0_i32_0 = arith.constant 0 : i32
    return %arg0, %c0_i32 : i32, i32
  }
  func.func @transform_12(%arg0: i32) -> (i32, i32) {
    %c0_i32 = arith.constant 0 : i32
    %c0_i32_0 = arith.constant 0 : i32
    %c0_i32_1 = arith.constant 0 : i32
    return %c0_i32, %c0_i32_0 : i32, i32
  }
  func.func @transform_13(%arg0: i32) -> (i32, i32) {
    %c0_i32 = arith.constant 0 : i32
    %c0_i32_0 = arith.constant 0 : i32
    %c0_i32_1 = arith.constant 0 : i32
    return %c0_i32, %c0_i32_0 : i32, i32
  }
  func.func @transform_14(%arg0: i32) -> (i32, i32) {
    %c0_i32 = arith.constant 0 : i32
    %c0_i32_0 = arith.constant 0 : i32
    %c0_i32_1 = arith.constant 0 : i32
    return %c0_i32, %c0_i32_0 : i32, i32
  }
  func.func @transform_15(%arg0: i32) -> (i32, i32) {
    %c0_i32 = arith.constant 0 : i32
    %c0_i32_0 = arith.constant 0 : i32
    %c0_i32_1 = arith.constant 0 : i32
    return %c0_i32, %c0_i32_0 : i32, i32
  }
  func.func @transform_16(%arg0: i32) -> (i32, i32) {
    %c0_i32 = arith.constant 0 : i32
    %c0_i32_0 = arith.constant 0 : i32
    %c0_i32_1 = arith.constant 0 : i32
    return %c0_i32, %c0_i32_0 : i32, i32
  }
  func.func @transform_17(%arg0: i32) -> (i32, i32) {
    %c0_i32 = arith.constant 0 : i32
    %c0_i32_0 = arith.constant 0 : i32
    %c0_i32_1 = arith.constant 0 : i32
    return %c0_i32, %c0_i32_0 : i32, i32
  }
  func.func @transform_18(%arg0: i32) -> (i32, i32) {
    %c0_i32 = arith.constant 0 : i32
    %c0_i32_0 = arith.constant 0 : i32
    %c0_i32_1 = arith.constant 0 : i32
    return %c0_i32, %c0_i32_0 : i32, i32
  }
  func.func @transform_19(%arg0: i32) -> (i32, i32) {
    %c0_i32 = arith.constant 0 : i32
    %c0_i32_0 = arith.constant 0 : i32
    %c0_i32_1 = arith.constant 0 : i32
    return %c0_i32, %c0_i32_0 : i32, i32
  }
  func.func @transform_20(%arg0: i32) -> (i32, i32) {
    %c0_i32 = arith.constant 0 : i32
    %c0_i32_0 = arith.constant 0 : i32
    %c0_i32_1 = arith.constant 0 : i32
    return %c0_i32, %c0_i32_0 : i32, i32
  }
  func.func @transform_21(%arg0: i32) -> (i32, i32) {
    %c0_i32 = arith.constant 0 : i32
    %c0_i32_0 = arith.constant 0 : i32
    %c0_i32_1 = arith.constant 0 : i32
    return %c0_i32, %c0_i32_0 : i32, i32
  }
  func.func @transform_22(%arg0: i32) -> (i32, i32) {
    %c0_i32 = arith.constant 0 : i32
    %c0_i32_0 = arith.constant 0 : i32
    %c0_i32_1 = arith.constant 0 : i32
    return %c0_i32, %c0_i32_0 : i32, i32
  }
  func.func @transform_23(%arg0: i32) -> (i32, i32) {
    %c0_i32 = arith.constant 0 : i32
    %c0_i32_0 = arith.constant 0 : i32
    %c0_i32_1 = arith.constant 0 : i32
    return %c0_i32, %c0_i32_0 : i32, i32
  }
  func.func @transform_24(%arg0: i32) -> i32 {
    %c0_i32 = arith.constant 0 : i32
    %c0_i32_0 = arith.constant 0 : i32
    return %c0_i32 : i32
  }
  func.func @transform_25(%arg0: i32) -> (i32, i32) {
    %c0_i32 = arith.constant 0 : i32
    %c0_i32_0 = arith.constant 0 : i32
    return %arg0, %c0_i32 : i32, i32
  }
}

</mosaic_0001>

<bundles_post_ra>
// kernel: tpu_custom_call.1
= control target key start
LH: loop header
LB: loop body
LE: loop exit
PB: predicated region body
PF: predicated region fallthrough
CT: control target
= control target key end

     0   :  { %s8694_s0 = inlined_call_operand.vmem [shape: bf16[8,8,512], index: 0, kind: input, shape index: {}]   ;;  %s8695_s1 = inlined_call_operand.vmem [shape: f32[8,8], index: 1, kind: input, shape index: {}]   ;;  %s8696_s2 = inlined_call_operand.hbm [shape: bf16[8,8,512], index: 2, kind: input, shape index: {}]   ;;  %s8697_s3 = inlined_call_operand.vmem [shape: f32[8,8], index: 3, kind: input, shape index: {}]   ;;  %s8698_s4 = inlined_call_operand.vmem [shape: bf16[8,2,768], index: 4, kind: input, shape index: {}]   ;;  %s8699_s5 = inlined_call_operand.vmem [shape: f32[8,2], index: 5, kind: input, shape index: {}]   ;;  %s8700_s6 = inlined_call_operand.vmem [shape: bf16[8,3,768], index: 6, kind: input, shape index: {}]   ;;  %s8701_s7 = inlined_call_operand.vmem [shape: f32[8,3], index: 7, kind: input, shape index: {}]   ;;  %s8702_s8 = inlined_call_operand.hbm [shape: bf16[8,8,512], index: 8, kind: input, shape index: {}]   ;;  %s8703_s9 = inlined_call_operand.vmem [shape: f32[8,8], index: 9, kind: input, shape index: {}]   ;;  %s8704_s10 = inlined_call_operand.hbm [shape: bf16[8,8,512], index: 10, kind: input, shape index: {}]   ;;  %s8705_s11 = inlined_call_operand.vmem [shape: f32[8,8], index: 11, kind: input, shape index: {}]   ;;  %s8706_s12 = inlined_call_operand.hbm [shape: f32[512,128], index: 12, kind: input, shape index: {}]   ;;  %s8707_s13 = inlined_call_operand.vmem [shape: f32[1,128], index: 13, kind: input, shape index: {}]   ;;  %s8708_s14 = inlined_call_operand.hbm [shape: f32[512,128], index: 14, kind: input, shape index: {}]   ;;  %s8709_s15 = inlined_call_operand.vmem [shape: f32[1,128], index: 15, kind: input, shape index: {}]   ;;  %s8710_s16 = inlined_call_operand.hbm [shape: f32[768,128], index: 16, kind: input, shape index: {}]   ;;  %s8711_s17 = inlined_call_operand.vmem [shape: f32[1,128], index: 17, kind: input, shape index: {}]   ;;  %s8712_s18 = inlined_call_operand.hbm [shape: f32[768,128], index: 18, kind: input, shape index: {}]   ;;  %s8713_s19 = inlined_call_operand.vmem [shape: f32[1,128], index: 19, kind: input, shape index: {}]   ;;  %s8714_s20 = inlined_call_operand.hbm [shape: f32[512,128], index: 20, kind: input, shape index: {}]   ;;  %s8715_s21 = inlined_call_operand.vmem [shape: f32[1,128], index: 21, kind: input, shape index: {}]   ;;  %s8716_s22 = inlined_call_operand.hbm [shape: f32[512,128], index: 22, kind: input, shape index: {}]   ;;  %s8717_s23 = inlined_call_operand.vmem [shape: f32[1,128], index: 23, kind: input, shape index: {}]   ;;  %s8718_s24 = inlined_call_operand.vmem [shape: f32[3], index: 24, kind: input, shape index: {}]   ;;  %s8719_s25 = inlined_call_operand.vmem [shape: f32[8,4], index: 25, kind: output, shape index: {}]  }
   0x1   :  { %8819 = sst [smem:[#allocation75_spill]] %s8694_s0 }
   0x2   :  { %8820 = sst [smem:[#allocation76_spill]] %s8695_s1 }
   0x3   :  { %8821 = sst [smem:[#allocation77_spill]] %s8696_s2 }
   0x4   :  { %8822 = sst [smem:[#allocation78_spill]] %s8697_s3 }
   0x5   :  { %8823 = sst [smem:[#allocation79_spill]] %s8698_s4 }
   0x6   :  { %8824 = sst [smem:[#allocation80_spill]] %s8699_s5 }
   0x7   :  { %8825 = sst [smem:[#allocation81_spill]] %s8700_s6 }
   0x8   :  { %8826 = sst [smem:[#allocation82_spill]] %s8701_s7 }
   0x9   :  { %8827 = sst [smem:[#allocation83_spill]] %s8702_s8 }
   0xa   :  { %8828 = sst [smem:[#allocation84_spill]] %s8703_s9 }
   0xb   :  { %8829 = sst [smem:[#allocation85_spill]] %s8717_s23 }
   0xc   :  { %30 = vsyncpa [#allocation3], 0 }
   0xd   :  { %31 = vsyncpa [#allocation6], 0 }
   0xe   :  { %32 = vsyncpa [#allocation9], 0 }
   0xf   :  { %33 = vsyncpa [#allocation12], 0 }
  0x10   :  { %34 = vsyncpa [#allocation15], 0 }
  0x11   :  { %35 = vsyncpa [#allocation4], 0  ;;  %s6111_s29 = smov [#allocation5]   ;;  %s6112_s6 = smov [#allocation8]  }
  0x12   :  { %s67_s2 = sshll.u32 %s6111_s29, 4  ;;  %s95_s30 = sshll.u32 %s6112_s6, 4  ;;  %s68_s2 = int_to_ptr.vmem [resolvable:$true] %s67_s2  ;;  %s6258_s30 = int_to_ptr.vmem [resolvable:$true] %s95_s30 }
  0x13   :  { %s8830_s26 = sld [smem:[#allocation83_spill]] }
  0x19   :  { %s5889_s1 = scalar_lea.hbm %s8830_s26, 2048 }
  0x1a   :  { %p5890_p0 = scmp.ne.s32.totalorder %s8830_s26, %s5889_s1  ;;  %p5893_p1 = scmp.lt.u32.totalorder %s5889_s1, %s8830_s26 }
  0x1c   :  { %p5895_p2 = pnand %p5893_p1, %p5890_p0 }
  0x1e   :  { %5898 = shalt.err (!%p5895_p2)
}
  0x1f   :  { %s5899_s9 = scalar_lea.vmem %s68_s2, 2048  ;;  %p5904_p4 = scmp.lt.s32.totalorder %s68_s2, %s68_s2 }
  0x20   :  { %p5900_p3 = scmp.ne.s32.totalorder %s68_s2, %s5899_s9  ;;  %p5905_p5 = scmp.lt.s32.totalorder %s5899_s9, %s5899_s9 }
  0x22   :  { %p5906_p6 = por %p5905_p5, %p5904_p4 }
  0x24   :  { %p5907_p7 = pnand %p5906_p6, %p5900_p3 }
  0x26   :  { %5910 = shalt.err (!%p5907_p7)
}
  0x27   :  { %s8727_s5 = smov 256   ;;  %s8729_s0 = smov 16  }
  0x28   :  { %73 = dma.hbm_to_vmem [thread:$0]  %s8830_s26, 2048, %s68_s2, [#allocation6], %s8727_s5, %s8727_s5, %s8729_s0  }
  0x29   :  { %s5911_s1 = scalar_lea.hbm %s8706_s12, 8192 }
  0x2a   :  { %p5912_p8 = scmp.ne.s32.totalorder %s8706_s12, %s5911_s1  ;;  %p5915_p9 = scmp.lt.u32.totalorder %s5911_s1, %s8706_s12 }
  0x2c   :  { %p5917_p10 = pnand %p5915_p9, %p5912_p8 }
  0x2e   :  { %5920 = shalt.err (!%p5917_p10)
}
  0x2f   :  { %s5921_s9 = scalar_lea.vmem %s6258_s30, 8192  ;;  %p5926_p12 = scmp.lt.s32.totalorder %s6258_s30, %s6258_s30 }
  0x30   :  { %p5922_p11 = scmp.ne.s32.totalorder %s6258_s30, %s5921_s9  ;;  %p5927_p13 = scmp.lt.s32.totalorder %s5921_s9, %s5921_s9 }
  0x32   :  { %p5928_p0 = por %p5927_p13, %p5926_p12 }
  0x34   :  { %p5929_p1 = pnand %p5928_p0, %p5922_p11 }
  0x36   :  { %5932 = shalt.err (!%p5929_p1)
}
  0x37   :  { %s6115_s2 = smov 128   ;;  %s6116_s26 = smov 8  }
  0x38   :  { %101 = dma.hbm_to_vmem [thread:$0]  %s8706_s12, 8192, %s6258_s30, [#allocation9], %s6115_s2, %s6115_s2, %s6116_s26  }
  0x39   :  { %s6117_s7 = smov [#allocation11]   ;;  %s6118_s1 = smov [#allocation14]  }
  0x3a   :  { %s123_s3 = sshll.u32 %s6117_s7, 4  ;;  %s151_s8 = sshll.u32 %s6118_s1, 4  ;;  %s124_s3 = int_to_ptr.vmem [resolvable:$true] %s123_s3  ;;  %s6295_s8 = int_to_ptr.vmem [resolvable:$true] %s151_s8 }
  0x3b   :  { %s5933_s28 = scalar_lea.hbm %s8710_s16, 12288 }
  0x3c   :  { %p5934_p2 = scmp.ne.s32.totalorder %s8710_s16, %s5933_s28  ;;  %p5937_p3 = scmp.lt.u32.totalorder %s5933_s28, %s8710_s16 }
  0x3e   :  { %p5939_p4 = pnand %p5937_p3, %p5934_p2 }
  0x40   :  { %5942 = shalt.err (!%p5939_p4)
}
  0x41   :  { %s5943_s12 = scalar_lea.vmem %s124_s3, 12288  ;;  %p5948_p6 = scmp.lt.s32.totalorder %s124_s3, %s124_s3 }
  0x42   :  { %p5944_p5 = scmp.ne.s32.totalorder %s124_s3, %s5943_s12  ;;  %p5949_p7 = scmp.lt.s32.totalorder %s5943_s12, %s5943_s12 }
  0x44   :  { %p5950_p8 = por %p5949_p7, %p5948_p6 }
  0x46   :  { %p5951_p9 = pnand %p5950_p8, %p5944_p5 }
  0x48   :  { %5954 = shalt.err (!%p5951_p9)
}
  0x49   :  { %129 = dma.hbm_to_vmem [thread:$0]  %s8710_s16, 12288, %s124_s3, [#allocation12], %s6115_s2, %s6115_s2, %s6116_s26  }
  0x4a   :  { %s5955_s23 = scalar_lea.hbm %s8714_s20, 8192 }
  0x4b   :  { %p5956_p10 = scmp.ne.s32.totalorder %s8714_s20, %s5955_s23  ;;  %p5959_p11 = scmp.lt.u32.totalorder %s5955_s23, %s8714_s20 }
  0x4d   :  { %p5961_p12 = pnand %p5959_p11, %p5956_p10 }
  0x4f   :  { %5964 = shalt.err (!%p5961_p12)
}
  0x50   :  { %s5965_s4 = scalar_lea.vmem %s6295_s8, 8192  ;;  %p5970_p0 = scmp.lt.s32.totalorder %s6295_s8, %s6295_s8 }
  0x51   :  { %p5966_p13 = scmp.ne.s32.totalorder %s6295_s8, %s5965_s4  ;;  %p5971_p1 = scmp.lt.s32.totalorder %s5965_s4, %s5965_s4 }
  0x53   :  { %p5972_p2 = por %p5971_p1, %p5970_p0 }
  0x55   :  { %p5973_p3 = pnand %p5972_p2, %p5966_p13 }
  0x57   :  { %5976 = shalt.err (!%p5973_p3)
}
  0x58   :  { %157 = dma.hbm_to_vmem [thread:$0]  %s8714_s20, 8192, %s6295_s8, [#allocation15], %s6115_s2, %s6115_s2, %s6116_s26  }
  0x59   :  { %s6119_s28 = smov [#allocation2]   ;;  %s6120_s12 = smov [#allocation7]  }
  0x5a   :  { %s45_s9 = sshll.u32 %s6119_s28, 4  ;;  %s81_s30 = sshll.u32 %s6120_s12, 4  ;;  %s46_s9 = int_to_ptr.vmem [resolvable:$true] %s45_s9  ;;  %s6332_s30 = int_to_ptr.vmem [resolvable:$true] %s81_s30 }
  0x5b   :  { %s8831_s6 = sld [smem:[#allocation77_spill]] }
  0x61   :  { %s5977_s23 = scalar_lea.hbm %s8831_s6, 2048 }
  0x62   :  { %p5978_p4 = scmp.ne.s32.totalorder %s8831_s6, %s5977_s23  ;;  %p5981_p5 = scmp.lt.u32.totalorder %s5977_s23, %s8831_s6 }
  0x64   :  { %p5983_p6 = pnand %p5981_p5, %p5978_p4 }
  0x66   :  { %5986 = shalt.err (!%p5983_p6)
}
  0x67   :  { %s5987_s20 = scalar_lea.vmem %s46_s9, 2048  ;;  %p5992_p8 = scmp.lt.s32.totalorder %s46_s9, %s46_s9 }
  0x68   :  { %p5988_p7 = scmp.ne.s32.totalorder %s46_s9, %s5987_s20  ;;  %p5993_p9 = scmp.lt.s32.totalorder %s5987_s20, %s5987_s20 }
  0x6a   :  { %p5994_p10 = por %p5993_p9, %p5992_p8 }
  0x6c   :  { %p5995_p11 = pnand %p5994_p10, %p5988_p7 }
  0x6e   :  { %5998 = shalt.err (!%p5995_p11)
}
  0x6f   :  { %s8832_s8 = smov 16   ;;  %s8833_s4 = smov 256  }
  0x70   :  { %51 = dma.hbm_to_vmem [thread:$0]  %s8831_s6, 2048, %s46_s9, [#allocation3], %s8833_s4, %s8833_s4, %s8832_s8  }
  0x71   :  { %s5999_s29 = scalar_lea.hbm %s8704_s10, 2048 }
  0x72   :  { %p6000_p12 = scmp.ne.s32.totalorder %s8704_s10, %s5999_s29  ;;  %p6003_p13 = scmp.lt.u32.totalorder %s5999_s29, %s8704_s10 }
  0x74   :  { %p6005_p0 = pnand %p6003_p13, %p6000_p12 }
  0x76   :  { %6008 = shalt.err (!%p6005_p0)
}
  0x77   :  { %s6009_s1 = scalar_lea.vmem %s6332_s30, 2048  ;;  %p6014_p2 = scmp.lt.s32.totalorder %s6332_s30, %s6332_s30 }
  0x78   :  { %p6010_p1 = scmp.ne.s32.totalorder %s6332_s30, %s6009_s1  ;;  %p6015_p3 = scmp.lt.s32.totalorder %s6009_s1, %s6009_s1 }
  0x7a   :  { %p6016_p4 = por %p6015_p3, %p6014_p2 }
  0x7c   :  { %p6017_p5 = pnand %p6016_p4, %p6010_p1 }
  0x7e   :  { %6020 = shalt.err (!%p6017_p5)
}
  0x7f   :  { %87 = dma.hbm_to_vmem [thread:$0]  %s8704_s10, 2048, %s6332_s30, [#allocation6], %s8833_s4, %s8833_s4, %s8832_s8  }
  0x80   :  { %s6121_s27 = smov [#allocation10]   ;;  %s6122_s16 = smov [#allocation13]  }
  0x81   :  { %s109_s20 = sshll.u32 %s6121_s27, 4  ;;  %s137_s3 = sshll.u32 %s6122_s16, 4  ;;  %s110_s20 = int_to_ptr.vmem [resolvable:$true] %s109_s20  ;;  %s6369_s3 = int_to_ptr.vmem [resolvable:$true] %s137_s3 }
  0x82   :  { %s6021_s29 = scalar_lea.hbm %s8708_s14, 8192 }
  0x83   :  { %p6022_p6 = scmp.ne.s32.totalorder %s8708_s14, %s6021_s29  ;;  %p6025_p7 = scmp.lt.u32.totalorder %s6021_s29, %s8708_s14 }
  0x85   :  { %p6027_p8 = pnand %p6025_p7, %p6022_p6 }
  0x87   :  { %6030 = shalt.err (!%p6027_p8)
}
  0x88   :  { %s6031_s10 = scalar_lea.vmem %s110_s20, 8192  ;;  %p6036_p10 = scmp.lt.s32.totalorder %s110_s20, %s110_s20 }
  0x89   :  { %p6032_p9 = scmp.ne.s32.totalorder %s110_s20, %s6031_s10  ;;  %p6037_p11 = scmp.lt.s32.totalorder %s6031_s10, %s6031_s10 }
  0x8b   :  { %p6038_p12 = por %p6037_p11, %p6036_p10 }
  0x8d   :  { %p6039_p13 = pnand %p6038_p12, %p6032_p9 }
  0x8f   :  { %6042 = shalt.err (!%p6039_p13)
}
  0x90   :  { %115 = dma.hbm_to_vmem [thread:$0]  %s8708_s14, 8192, %s110_s20, [#allocation9], %s6115_s2, %s6115_s2, %s6116_s26  }
  0x91   :  { %s6043_s9 = scalar_lea.hbm %s8712_s18, 12288 }
  0x92   :  { %p6044_p0 = scmp.ne.s32.totalorder %s8712_s18, %s6043_s9  ;;  %p6047_p1 = scmp.lt.u32.totalorder %s6043_s9, %s8712_s18 }
  0x94   :  { %p6049_p2 = pnand %p6047_p1, %p6044_p0 }
  0x96   :  { %6052 = shalt.err (!%p6049_p2)
}
  0x97   :  { %s6053_s12 = scalar_lea.vmem %s6369_s3, 12288  ;;  %p6058_p4 = scmp.lt.s32.totalorder %s6369_s3, %s6369_s3 }
  0x98   :  { %p6054_p3 = scmp.ne.s32.totalorder %s6369_s3, %s6053_s12  ;;  %p6059_p5 = scmp.lt.s32.totalorder %s6053_s12, %s6053_s12 }
  0x9a   :  { %p6060_p6 = por %p6059_p5, %p6058_p4 }
  0x9c   :  { %p6061_p7 = pnand %p6060_p6, %p6054_p3 }
  0x9e   :  { %6064 = shalt.err (!%p6061_p7)
}
  0x9f   :  { %143 = dma.hbm_to_vmem [thread:$0]  %s8712_s18, 12288, %s6369_s3, [#allocation12], %s6115_s2, %s6115_s2, %s6116_s26  }
  0xa0   :  { %s180_s23 = sshll.u32 %s8718_s24, 4  ;;  %s6123_s0 = smov [#allocation16]   ;;  %s181_s23 = int_to_ptr.vmem [resolvable:$true] %s180_s23 }
  0xa1   :  { %s165_s7 = sshll.u32 %s6123_s0, 4  ;;  %s6065_s8 = scalar_lea.hbm %s8716_s22, 8192  ;;  %s166_s7 = int_to_ptr.vmem [resolvable:$true] %s165_s7 }
  0xa2   :  { %p6066_p8 = scmp.ne.s32.totalorder %s8716_s22, %s6065_s8  ;;  %p6069_p9 = scmp.lt.u32.totalorder %s6065_s8, %s8716_s22 }
  0xa4   :  { %p6071_p10 = pnand %p6069_p9, %p6066_p8 }
  0xa6   :  { %6074 = shalt.err (!%p6071_p10)
}
  0xa7   :  { %s6075_s18 = scalar_lea.vmem %s166_s7, 8192  ;;  %p6080_p12 = scmp.lt.s32.totalorder %s166_s7, %s166_s7 }
  0xa8   :  { %p6076_p11 = scmp.ne.s32.totalorder %s166_s7, %s6075_s18  ;;  %p6081_p13 = scmp.lt.s32.totalorder %s6075_s18, %s6075_s18 }
  0xaa   :  { %p6082_p0 = por %p6081_p13, %p6080_p12 }
  0xac   :  { %p6083_p1 = pnand %p6082_p0, %p6076_p11 }
  0xae   :  { %6086 = shalt.err (!%p6083_p1)
}
  0xaf   :  { %171 = dma.hbm_to_vmem [thread:$0]  %s8716_s22, 8192, %s166_s7, [#allocation15], %s6115_s2, %s6115_s2, %s6116_s26  }
  0xb0   :  { %s6087_s27 = scalar_lea.vmem %s181_s23, 16  ;;  %p6092_p3 = scmp.lt.s32.totalorder %s181_s23, %s181_s23 }
  0xb1   :  { %p6088_p2 = scmp.ne.s32.totalorder %s181_s23, %s6087_s27  ;;  %p6093_p4 = scmp.lt.s32.totalorder %s6087_s27, %s6087_s27 }
  0xb3   :  { %p6094_p5 = por %p6093_p4, %p6092_p3 }
  0xb5   :  { %p6095_p6 = pnand %p6094_p5, %p6088_p2 }
  0xb7   :  { %6098 = shalt.err (!%p6095_p6)
}
  0xb8   :  { %s6124_s16 = smov [#allocation17]  }
  0xb9   :  { %183 = dma.vmem_to_smem %s181_s23, 16, %s6124_s16, [#allocation4]  }
  0xba   :  { %6099 = dma.done.wait [#allocation3], 2048  }
  0xbb   :  { %6100 = vsyncadd [#allocation3], 4294965248 }
  0xbc   :  { %6101 = dma.done.wait [#allocation6], 4096  }
  0xbd   :  { %6102 = vsyncadd [#allocation6], 4294963200 }
  0xbe   :  { %6103 = dma.done.wait [#allocation9], 16384  }
  0xbf   :  { %6104 = vsyncadd [#allocation9], 4294950912 }
  0xc0   :  { %6105 = dma.done.wait [#allocation12], 24576  }
  0xc1   :  { %6106 = vsyncadd [#allocation12], 4294942720 }
  0xc2   :  { %6107 = dma.done.wait [#allocation15], 16384  }
  0xc3   :  { %6108 = vsyncadd [#allocation15], 4294950912 }
  0xc4   :  { %6109 = dma.done.wait [#allocation4], 16  }
  0xc5   :  { %6110 = vsyncadd [#allocation4], 4294967280 }
  0xc6   :  { %214 = sfence }
  0xc7   :  { %s8834_s26 = sld [smem:[#allocation76_spill]]  ;;  %vm216_vm0 = vcmask 64512   ;;  %s8835_s14 = sld [smem:[#allocation78_spill]]  ;;  %vm1449_vm1 = vcmask 15360   ;;  %v904_v6 = vld [vmem:[#allocation8 + $0x80] sm:$0xff]  ;;  %v905_v7 = vld [vmem:[#allocation8 + $0x88] sm:$0xff]  ;;  %v272_v15 = vlaneseq }
  0xc8   :  { %s8836_s5 = sld [smem:[#allocation80_spill]]  ;;  %v936_v8 = vld [vmem:[#allocation8 + $0x180] sm:$0xff]  ;;  %v5409_v9 = vpack.c.bf16 %v905_v7, %v904_v6  ;;  %v937_v10 = vld [vmem:[#allocation8 + $0x188] sm:$0xff]  ;;  %v906_v22 = vld [vmem:[#allocation8 + $0x90] sm:$0xff]  ;;  %s8846_s7 = sld [smem:[#allocation82_spill]]  ;;  %vm2227_vm2 = vcmask 23552  }
  0xc9   :  { %v5441_v11 = vpack.c.bf16 %v937_v10, %v936_v8  ;;  %v888_v14 = vld [vmem:[#allocation8] sm:$0xff]  ;;  %v889_v16 = vld [vmem:[#allocation8 + $0x8] sm:$0xff]  ;;  %v907_v23 = vld [vmem:[#allocation8 + $0x98] sm:$0xff]  ;;  %v6441_v27 = vshrl.u32 %v272_v15, 7  ;;  %s8847_s8 = sld [smem:[#allocation84_spill]]  ;;  %s8848_s18 = sld [smem:[#allocation75_spill]] }
  0xca   :  { %5410 = vmatprep.subr.bf16.mxu0 %v5409_v9  ;;  %v920_v17 = vld [vmem:[#allocation8 + $0x100] sm:$0xff]  ;;  %v921_v18 = vld [vmem:[#allocation8 + $0x108] sm:$0xff]  ;;  %v5411_v19 = vpack.c.bf16 %v889_v16, %v888_v14  ;;  %v938_v24 = vld [vmem:[#allocation8 + $0x190] sm:$0xff]  ;;  %v5413_v25 = vpack.c.bf16 %v907_v23, %v906_v22  ;;  %s8856_s20 = sld [smem:[#allocation79_spill]]  ;;  %vm991_vm3 = vcmask 1041409   ;;  %vm993_vm4 = vcmask 1042434  }
  0xcb   :  { %5442 = vmatprep.subr.bf16.mxu1 %v5441_v11  ;;  %v5443_v20 = vpack.c.bf16 %v921_v18, %v920_v17  ;;  %v939_v26 = vld [vmem:[#allocation8 + $0x198] sm:$0xff]  ;;  %8837 = vst [vmem:[#allocation24_spill] sm:$0xff] %v6441_v27  ;;  %v6444_v30 = vsub.s32 1, %v6441_v27  ;;  %v6447_v31 = vsub.s32 0, %v6441_v27  ;;  %v6452_v36 = vsub.s32 5, %v6441_v27  ;;  %v890_v38 = vld [vmem:[#allocation8 + $0x10] sm:$0xff] }
  0xcc   :  { %5412 = vmatpush3.bf16.msra.mxu0 %v5411_v19  ;;  %v5445_v28 = vpack.c.bf16 %v939_v26, %v938_v24  ;;  %v6455_v37 = vsub.s32 2, %v6441_v27  ;;  %v891_v39 = vld [vmem:[#allocation8 + $0x18] sm:$0xff]  ;;  %v922_v40 = vld [vmem:[#allocation8 + $0x110] sm:$0xff]  ;;  %v6460_v43 = vsub.s32 6, %v6441_v27  ;;  %v6463_v44 = vsub.s32 3, %v6441_v27  ;;  %v908_v46 = vld [vmem:[#allocation8 + $0xa0] sm:$0xff] }
  0xcd   :  { %v215_v0 = vld [vmem:[%s8834_s26] sm:$0xff]  ;;  %5444 = vmatpush3.bf16.msra.mxu1 %v5443_v20  ;;  %5414 = vmatprep.subr.bf16.mxu0 %v5413_v25  ;;  %8838 = vst [vmem:[#allocation25_spill] sm:$0xff] %v6444_v30  ;;  %8839 = vst [vmem:[#allocation26_spill] sm:$0xff] %v6447_v31  ;;  %v923_v45 = vld [vmem:[#allocation8 + $0x118] sm:$0xff]  ;;  %v6466_v51 = vsub.s32 7, %v6441_v27  ;;  %v5415_v52 = vpack.c.bf16 %v891_v39, %v890_v38  ;;  %v6471_v57 = vsub.s32 4, %v6441_v27 }
  0xce   :  { %v6430_v1 = vld [vmem:[%s8835_s14] sm:$0xff]  ;;  %v217_v3 = vsel %vm216_vm0, %v215_v0, 0.0  ;;  %5446 = vmatprep.subr.bf16.mxu1 %v5445_v28  ;;  %8840 = vst [vmem:[#allocation27_spill] sm:$0xff] %v6452_v36  ;;  %8841 = vst [vmem:[#allocation28_spill] sm:$0xff] %v6455_v37  ;;  %v909_v47 = vld [vmem:[#allocation8 + $0xa8] sm:$0xff]  ;;  %v5447_v53 = vpack.c.bf16 %v923_v45, %v922_v40  ;;  %vm995_vm5 = vcmask 1043459  }
  0xcf   :  { %v6435_v2 = vld [vmem:[%s8836_s5] sm:$0xff]  ;;  %218 = vadd.xlane.f32.xlu0 %v217_v3  ;;  %v553_v5 = vsel %vm216_vm0, %v6430_v1, 0.0  ;;  %8842 = vst [vmem:[#allocation29_spill] sm:$0xff] %v6460_v43  ;;  %8843 = vst [vmem:[#allocation30_spill] sm:$0xff] %v6463_v44  ;;  %v941_v49 = vld [vmem:[#allocation8 + $0x1a8] sm:$0xff]  ;;  %v5417_v54 = vpack.c.bf16 %v909_v47, %v908_v46  ;;  %vm997_vm6 = vcmask 1044484  }
  0xd0   :  { %v1450_v4 = vsel %vm1449_vm1, %v6435_v2, 0.0  ;;  %v940_v48 = vld [vmem:[#allocation8 + $0x1a0] sm:$0xff]  ;;  %8844 = vst [vmem:[#allocation31_spill] sm:$0xff] %v6466_v51  ;;  %8845 = vst [vmem:[#allocation32_spill] sm:$0xff] %v6471_v57  ;;  %5416 = vmatpush3.bf16.msra.mxu0 %v5415_v52  ;;  %v910_v6 = vld [vmem:[#allocation8 + $0xb0] sm:$0xff]  ;;  %vm999_vm7 = vcmask 1045509  }
  0xd1   :  { %1451 = vadd.xlane.f32.xlu1 %v1450_v4  ;;  %v5449_v58 = vpack.c.bf16 %v941_v49, %v940_v48  ;;  %5448 = vmatpush3.bf16.msra.mxu1 %v5447_v53  ;;  %v892_v63 = vld [vmem:[#allocation8 + $0x20] sm:$0xff]  ;;  %v911_v7 = vld [vmem:[#allocation8 + $0xb8] sm:$0xff]  ;;  %v942_v8 = vld [vmem:[#allocation8 + $0x1b0] sm:$0xff]  ;;  %vm1001_vm8 = vcmask 1046534   ;;  %vm1003_vm9 = vcmask 1047559   ;;  %vm1889_vm10 = vcmask 1041408  }
  0xd2   :  { %5418 = vmatprep.subr.bf16.mxu0 %v5417_v54  ;;  %v924_v3 = vld [vmem:[#allocation8 + $0x120] sm:$0xff]  ;;  %v5421_v11 = vpack.c.bf16 %v911_v7, %v910_v6  ;;  %v894_v17 = vld [vmem:[#allocation8 + $0x30] sm:$0xff]  ;;  %v895_v18 = vld [vmem:[#allocation8 + $0x38] sm:$0xff]  ;;  %s9053_s14 = sld [smem:[#allocation81_spill]]  ;;  %vm2499_vm11 = vcmask 1042432   ;;  %vm4893_vm12 = vcmask 7168  }
  0xd3   :  { %554 = vadd.xlane.f32.xlu0 %v553_v5  ;;  %5450 = vmatprep.subr.bf16.mxu1 %v5449_v58  ;;  %v925_v5 = vld [vmem:[#allocation8 + $0x128] sm:$0xff]  ;;  %v926_v19 = vld [vmem:[#allocation8 + $0x130] sm:$0xff]  ;;  %v5423_v20 = vpack.c.bf16 %v895_v18, %v894_v17  ;;  %v912_v24 = vld [vmem:[#allocation8 + $0xc0] sm:$0xff]  ;;  %s9206_s10 = sld [smem:[#allocation85_spill]]  ;;  %vm4895_vm13 = vcmask 15368   ;;  %s4917_s4 = sld [smem:[#allocation17 + $0x1]] }
  0xd4   :  { %v913_v25 = vld [vmem:[#allocation8 + $0xc8] sm:$0xff]  ;;  %v944_v26 = vld [vmem:[#allocation8 + $0x1c0] sm:$0xff]  ;;  %v915_v45 = vld [vmem:[#allocation8 + $0xd8] sm:$0xff]  ;;  %s4882_s1 = sld [smem:[#allocation17]]  ;;  %s4918_s9 = sld [smem:[#allocation17 + $0x2]]  ;;  %vm4897_vm14 = vcmask 23568  }
  0xd5   :  { %v5425_v28 = vpack.c.bf16 %v913_v25, %v912_v24  ;;  %v928_v38 = vld [vmem:[#allocation8 + $0x140] sm:$0xff]  ;;  %v929_v39 = vld [vmem:[#allocation8 + $0x148] sm:$0xff]  ;;  %v946_v46 = vld [vmem:[#allocation8 + $0x1d0] sm:$0xff]  ;;  %vm4899_vm15 = vcmask 31768  }
  0xd6   :  { %v5459_v40 = vpack.c.bf16 %v929_v39, %v928_v38  ;;  %v947_v49 = vld [vmem:[#allocation8 + $0x1d8] sm:$0xff]  ;;  %v932_v6 = vld [vmem:[#allocation8 + $0x160] sm:$0xff] }
  0xd7   :  { %v899_v52 = vld [vmem:[#allocation8 + $0x58] sm:$0xff]  ;;  %v5461_v53 = vpack.c.bf16 %v947_v49, %v946_v46  ;;  %v3657_v38 = vld [vmem:[%s8847_s8] sm:$0xff] }
  0xd8   :  { %v3658_v39 = vsel %vm216_vm0, %v3657_v38, 0.0  ;;  %v224_v46 = vld [vmem:[%s8848_s18] sm:$0xff]  ;;  %v6526_v49 = vld [vmem:[%s8848_s18 + $0x18] sm:$0xff] }
 0x15c   :  { %v219_v12 = vpop.xlane.xlu0 %218 }
 0x15d   :  { %v220_v13 = vadd.f32 1e-09, %v219_v12  ;;  %v943_v12 = vld [vmem:[#allocation8 + $0x1b8] sm:$0xff] }
 0x15e   :  { %v1452_v10 = vpop.xlane.xlu1 %1451 }
 0x15f   :  { %5874 = vrcp.f32 %v220_v13  ;;  %v5453_v13 = vpack.c.bf16 %v943_v12, %v942_v8  ;;  %v1453_v14 = vadd.f32 1e-09, %v1452_v10  ;;  %v919_v12 = vld [vmem:[#allocation8 + $0xf8] sm:$0xff] }
 0x160   :  { %v555_v21 = vpop.xlane.xlu0 %554 }
 0x161   :  { %v556_v29 = vadd.f32 1e-09, %v555_v21  ;;  %v927_v21 = vld [vmem:[#allocation8 + $0x138] sm:$0xff] }
 0x162   :  { %v5455_v22 = vpack.c.bf16 %v927_v21, %v926_v19  ;;  %v903_v21 = vld [vmem:[#allocation8 + $0x78] sm:$0xff] }
 0x163   :  { %5876 = vrcp.f32 %v556_v29  ;;  %v945_v29 = vld [vmem:[#allocation8 + $0x1c8] sm:$0xff] }
 0x164   :  { %5878 = vrcp.f32 %v1453_v14 }
 0x169   :  { %v5875_v32 = vpop.eup %5874 }
 0x16a   :  { %v223_v33 = vmul.f32 %v5875_v32, %v215_v0  ;;  %v893_v0 = vld [vmem:[#allocation8 + $0x28] sm:$0xff]  ;;  %v896_v32 = vld [vmem:[#allocation8 + $0x40] sm:$0xff] }
 0x16b   :  { %v5419_v4 = vpack.c.bf16 %v893_v0, %v892_v63  ;;  %v917_v63 = vld [vmem:[#allocation8 + $0xe8] sm:$0xff]  ;;  %v948_v0 = vld [vmem:[#allocation8 + $0x1e0] sm:$0xff] }
 0x16c   :  { %v282_v34 = vrot.slane %v223_v33, %v6444_v30  ;;  %v275_v35 = vrot.slane %v223_v33, %v6447_v31  ;;  %v310_v41 = vrot.slane %v223_v33, %v6452_v36  ;;  %v289_v42 = vrot.slane %v223_v33, %v6455_v37 }
 0x16d   :  { %v5877_v50 = vpop.eup %5876  ;;  %v317_v55 = vrot.slane %v223_v33, %v6460_v43  ;;  %v296_v56 = vrot.slane %v223_v33, %v6463_v44  ;;  %v324_v60 = vrot.slane %v223_v33, %v6466_v51  ;;  %v303_v61 = vrot.slane %v223_v33, %v6471_v57  ;;  %5420 = vmatpush3.bf16.msra.mxu0 %v5419_v4  ;;  %v897_v33 = vld [vmem:[#allocation8 + $0x48] sm:$0xff] }
 0x16e   :  { %284 = vbcast.lane.b32.xlu0 %v282_v34, 256  ;;  %277 = vbcast.lane.b32.xlu1 %v275_v35, 256  ;;  %v6474_v59 = vmul.f32 %v5877_v50, %v6430_v1  ;;  %v5451_v1 = vpack.c.bf16 %v925_v5, %v924_v3  ;;  %v5457_v34 = vpack.c.bf16 %v945_v29, %v944_v26  ;;  %v5879_v47 = vpop.eup %5878  ;;  %v898_v50 = vld [vmem:[#allocation8 + $0x50] sm:$0xff]  ;;  %v949_v4 = vld [vmem:[#allocation8 + $0x1e8] sm:$0xff]  ;;  %v900_v5 = vld [vmem:[#allocation8 + $0x60] sm:$0xff] }
 0x16f   :  { %5422 = vmatprep.subr.bf16.mxu0 %v5421_v11  ;;  %v5427_v35 = vpack.c.bf16 %v897_v33, %v896_v32  ;;  %v5431_v54 = vpack.c.bf16 %v899_v52, %v898_v50  ;;  %v5465_v7 = vpack.c.bf16 %v949_v4, %v948_v0  ;;  %v918_v11 = vld [vmem:[#allocation8 + $0xf0] sm:$0xff]  ;;  %v6531_v50 = vld [vmem:[%s8848_s18 + $0x20] sm:$0xff]  ;;  %v247_v4 = vunpack.c.h.bf16 %v6526_v49 }
 0x170   :  { %v611_v62 = vrot.slane %v6474_v59, %v6447_v31  ;;  %v618_v9 = vrot.slane %v6474_v59, %v6444_v30  ;;  %5452 = vmatpush3.bf16.msra.mxu1 %v5451_v1  ;;  %v625_v15 = vrot.slane %v6474_v59, %v6455_v37  ;;  %v632_v16 = vrot.slane %v6474_v59, %v6463_v44  ;;  %v901_v1 = vld [vmem:[#allocation8 + $0x68] sm:$0xff] }
 0x171   :  { %5454 = vmatprep.subr.bf16.mxu1 %v5453_v13  ;;  %v639_v23 = vrot.slane %v6474_v59, %v6471_v57  ;;  %5424 = vmatpush3.bf16.msra.mxu0 %v5423_v20  ;;  %v5435_v8 = vpack.c.bf16 %v901_v1, %v900_v5  ;;  %v950_v13 = vld [vmem:[#allocation8 + $0x1f0] sm:$0xff]  ;;  %v5437_v14 = vpack.c.bf16 %v919_v12, %v918_v11  ;;  %v6562_v1 = vld [vmem:[%s8848_s18 + $0x38] sm:$0xff]  ;;  %v6581_v11 = vld [vmem:[%s8848_s18 + $0x40] sm:$0xff] }
 0x172   :  { %312 = vbcast.lane.b32.xlu0 %v310_v41, 256  ;;  %291 = vbcast.lane.b32.xlu1 %v289_v42, 256  ;;  %v646_v41 = vrot.slane %v6474_v59, %v6452_v36  ;;  %v914_v42 = vld [vmem:[#allocation8 + $0xd0] sm:$0xff]  ;;  %v660_v33 = vrot.slane %v6474_v59, %v6466_v51 }
 0x173   :  { %5426 = vmatprep.subr.bf16.mxu0 %v5425_v28  ;;  %v5429_v48 = vpack.c.bf16 %v915_v45, %v914_v42  ;;  %v902_v20 = vld [vmem:[#allocation8 + $0x70] sm:$0xff] }
 0x174   :  { %5456 = vmatpush3.bf16.msra.mxu1 %v5455_v22  ;;  %v934_v22 = vld [vmem:[#allocation8 + $0x170] sm:$0xff]  ;;  %v5439_v25 = vpack.c.bf16 %v903_v21, %v902_v20 }
 0x175   :  { %5458 = vmatprep.subr.bf16.mxu1 %v5457_v34  ;;  %5428 = vmatpush3.bf16.msra.mxu0 %v5427_v35  ;;  %v6653_v12 = vld [vmem:[#allocation2 + $0x50] sm:$0xff] }
 0x176   :  { %319 = vbcast.lane.b32.xlu0 %v317_v55, 256  ;;  %298 = vbcast.lane.b32.xlu1 %v296_v56, 256  ;;  %v930_v55 = vld [vmem:[#allocation8 + $0x150] sm:$0xff]  ;;  %v931_v56 = vld [vmem:[#allocation8 + $0x158] sm:$0xff]  ;;  %8852 = vst [vmem:[#allocation36_spill] sm:$0xff] %v6653_v12 }
 0x177   :  { %5430 = vmatprep.subr.bf16.mxu0 %v5429_v48  ;;  %v5463_v58 = vpack.c.bf16 %v931_v56, %v930_v55  ;;  %v226_v48 = vld [vmem:[%s8848_s18 + $0x10] sm:$0xff]  ;;  %v241_v56 = vunpack.c.h.bf16 %v224_v46 }
 0x178   :  { %5460 = vmatpush3.bf16.msra.mxu1 %v5459_v40  ;;  %v3993_v40 = vld [vmem:[%s8705_s11] sm:$0xff]  ;;  %v6544_v55 = vld [vmem:[%s8848_s18 + $0x50] sm:$0xff]  ;;  %v245_v0 = vunpack.c.h.bf16 %v226_v48 }
 0x179   :  { %5462 = vmatprep.subr.bf16.mxu1 %v5461_v53  ;;  %5432 = vmatpush3.bf16.msra.mxu0 %v5431_v54  ;;  %v240_v53 = vunpack.c.l.bf16 %v224_v46  ;;  %v6539_v54 = vld [vmem:[%s8848_s18 + $0x28] sm:$0xff] }
 0x17a   :  { %326 = vbcast.lane.b32.xlu0 %v324_v60, 256  ;;  %305 = vbcast.lane.b32.xlu1 %v303_v61, 256  ;;  %v1456_v60 = vmul.f32 %v5879_v47, %v6435_v2  ;;  %v653_v61 = vrot.slane %v6474_v59, %v6460_v43  ;;  %v3994_v59 = vsel %vm216_vm0, %v3993_v40, 0.0  ;;  %v225_v47 = vld [vmem:[%s8848_s18 + $0x8] sm:$0xff] }
 0x17c   :  { %5464 = vmatpush3.bf16.msra.mxu1 %v5463_v58  ;;  %v1484_v2 = vrot.slane %v1456_v60, %v6447_v31  ;;  %v1491_v18 = vrot.slane %v1456_v60, %v6444_v30  ;;  %v1498_v24 = vrot.slane %v1456_v60, %v6455_v37  ;;  %v1505_v28 = vrot.slane %v1456_v60, %v6463_v44 }
 0x17d   :  { %5466 = vmatprep.subr.bf16.mxu1 %v5465_v7  ;;  %v1512_v29 = vrot.slane %v1456_v60, %v6471_v57  ;;  %v1526_v32 = vrot.slane %v1456_v60, %v6460_v43  ;;  %v1519_v34 = vrot.slane %v1456_v60, %v6452_v36  ;;  %v1533_v35 = vrot.slane %v1456_v60, %v6466_v51 }
 0x17e   :  { %613 = vbcast.lane.b32.xlu0 %v611_v62, 256  ;;  %v916_v62 = vld [vmem:[#allocation8 + $0xe0] sm:$0xff]  ;;  %v242_v58 = vunpack.c.l.bf16 %v225_v47  ;;  %v243_v60 = vunpack.c.h.bf16 %v225_v47  ;;  %v8858_v36 = vunpack.c.l.bf16 %v6531_v50  ;;  %v8859_v37 = vunpack.c.h.bf16 %v6531_v50 }
 0x17f   :  { %v5433_v3 = vpack.c.bf16 %v917_v63, %v916_v62  ;;  %v6549_v62 = vld [vmem:[%s8848_s18 + $0x58] sm:$0xff]  ;;  %v6554_v63 = vld [vmem:[%s8848_s18 + $0x30] sm:$0xff] }
 0x181   :  { %5434 = vmatprep.subr.bf16.mxu0 %v5433_v3  ;;  %v246_v3 = vunpack.c.l.bf16 %v6526_v49 }
 0x182   :  { %620 = vbcast.lane.b32.xlu0 %v618_v9, 256  ;;  %v933_v9 = vld [vmem:[#allocation8 + $0x168] sm:$0xff]  ;;  %5436 = vmatpush3.bf16.msra.mxu0 %v5435_v8  ;;  %v8861_v8 = vunpack.c.h.bf16 %v6539_v54 }
 0x183   :  { %v5467_v10 = vpack.c.bf16 %v933_v9, %v932_v6  ;;  %5438 = vmatprep.subr.bf16.mxu0 %v5437_v14  ;;  %v6567_v6 = vld [vmem:[%s8848_s18 + $0x60] sm:$0xff] }
 0x184   :  { %v6661_v9 = vld [vmem:[#allocation2 + $0x60] sm:$0xff] }
 0x185   :  { %5468 = vmatpush3.bf16.msra.mxu1 %v5467_v10  ;;  %v6576_v10 = vld [vmem:[%s8848_s18 + $0x68] sm:$0xff]  ;;  %8854 = vst [vmem:[#allocation38_spill] sm:$0xff] %v6661_v9  ;;  %v8868_v9 = vunpack.c.l.bf16 %v6554_v63 }
 0x186   :  { %627 = vbcast.lane.b32.xlu0 %v625_v15, 256  ;;  %v951_v15 = vld [vmem:[#allocation8 + $0x1f8] sm:$0xff]  ;;  %5440 = vmatpush3.bf16.msra.mxu0 %v5439_v25 }
 0x187   :  { %v5469_v17 = vpack.c.bf16 %v951_v15, %v950_v13  ;;  %v6651_v15 = vld [vmem:[#allocation2 + $0x48] sm:$0xff] }
 0x188   :  { %8851 = vst [vmem:[#allocation35_spill] sm:$0xff] %v6651_v15 }
 0x189   :  { %5470 = vmatprep.subr.bf16.mxu1 %v5469_v17  ;;  %v6595_v17 = vld [vmem:[%s8848_s18 + $0x70] sm:$0xff] }
 0x18a   :  { %634 = vbcast.lane.b32.xlu0 %v632_v16, 256  ;;  %v2226_v16 = vld [vmem:[%s8846_s7] sm:$0xff] }
 0x18b   :  { %v2228_v19 = vsel %vm2227_vm2, %v2226_v16, 0.0  ;;  %v6590_v16 = vld [vmem:[%s8848_s18 + $0x48] sm:$0xff] }
 0x18e   :  { %641 = vbcast.lane.b32.xlu0 %v639_v23, 256  ;;  %v935_v23 = vld [vmem:[#allocation8 + $0x178] sm:$0xff] }
 0x18f   :  { %v5471_v26 = vpack.c.bf16 %v935_v23, %v934_v22  ;;  %v6604_v23 = vld [vmem:[%s8848_s18 + $0x78] sm:$0xff]  ;;  %v6646_v22 = vld [vmem:[#allocation2 + $0x40] sm:$0xff] }
 0x190   :  { %8850 = vst [vmem:[#allocation34_spill] sm:$0xff] %v6646_v22  ;;  %v8894_v22 = vunpack.c.h.bf16 %v6595_v17 }
 0x191   :  { %5472 = vmatpush3.bf16.msra.mxu1 %v5471_v26 }
 0x192   :  { %648 = vbcast.lane.b32.xlu0 %v646_v41, 256  ;;  %v6125_v41 = vmov 1983009808  }
 0x193   :  { %v1643_v42 = vunpack.c.l.s4 %v6125_v41 }
 0x195   :  { %v1644_v45 = vunpack.c.0.s8 %v1643_v42 }
 0x196   :  { %655 = vbcast.lane.b32.xlu0 %v653_v61, 256  ;;  %v244_v61 = vunpack.c.l.bf16 %v226_v48 }
 0x197   :  { %v6534_v52 = vsub.s32 %v1644_v45, %v6441_v27  ;;  %v6621_v45 = vld [vmem:[#allocation2 + $0x10] sm:$0xff] }
 0x199   :  { %8849 = vst [vmem:[#allocation33_spill] sm:$0xff] %v6534_v52 }
 0x19a   :  { %1486 = vbcast.lane.b32.xlu0 %v1484_v2, 256  ;;  %v8860_v2 = vunpack.c.l.bf16 %v6539_v54 }
 0x19e   :  { %2229 = vadd.xlane.f32.xlu1 %v2228_v19  ;;  %1493 = vbcast.lane.b32.xlu0 %v1491_v18, 256 }
 0x1a2   :  { %1500 = vbcast.lane.b32.xlu0 %v1498_v24, 256 }
 0x1a6   :  { %1507 = vbcast.lane.b32.xlu0 %v1505_v28, 256 }
 0x1aa   :  { %1514 = vbcast.lane.b32.xlu0 %v1512_v29, 256  ;;  %v6610_v29 = vld [vmem:[#allocation2] sm:$0xff] }
 0x1ae   :  { %1528 = vbcast.lane.b32.xlu0 %v1526_v32, 256 }
 0x1af   :  { %662 = vbcast.lane.b32.xlu1 %v660_v33, 256  ;;  %v6637_v33 = vld [vmem:[#allocation2 + $0x30] sm:$0xff] }
 0x1b3   :  { %1521 = vbcast.lane.b32.xlu1 %v1519_v34, 256  ;;  %v6624_v34 = vld [vmem:[#allocation2 + $0x18] sm:$0xff] }
 0x1b7   :  { %1535 = vbcast.lane.b32.xlu1 %v1533_v35, 256 }
 0x1cd   :  { %3659 = vadd.xlane.f32.xlu0 %v3658_v39  ;;  %v6616_v39 = vld [vmem:[#allocation2 + $0x8] sm:$0xff] }
 0x1d1   :  { %3995 = vadd.xlane.f32.xlu0 %v3994_v59  ;;  %v6628_v59 = vld [vmem:[#allocation2 + $0x20] sm:$0xff] }
 0x1e0   :  { %v278_v18 = vpop.permute.xlu1 %277  ;;  %v285_v32 = vpop.permute.xlu0 %284 }
 0x1e1   :  { %v328_v40 = vmul.f32 %v278_v18, %v240_v53  ;;  %v329_v46 = vmul.f32 %v278_v18, %v241_v56  ;;  %v330_v47 = vmul.f32 %v278_v18, %v242_v58  ;;  %v331_v48 = vmul.f32 %v278_v18, %v243_v60  ;;  %v6632_v58 = vld [vmem:[#allocation2 + $0x28] sm:$0xff] }
 0x1e2   :  { %v332_v35 = vmul.f32 %v285_v32, %v244_v61  ;;  %v333_v38 = vmul.f32 %v285_v32, %v245_v0  ;;  %v334_v41 = vmul.f32 %v285_v32, %v246_v3  ;;  %v335_v28 = vmul.f32 %v285_v32, %v247_v4  ;;  %v6640_v4 = vld [vmem:[#allocation2 + $0x38] sm:$0xff] }
 0x1e3   :  { %v360_v60 = vrot.slane %v328_v40, 4  ;;  %v366_v53 = vrot.slane %v329_v46, 4  ;;  %v372_v49 = vrot.slane %v330_v47, 4  ;;  %v378_v26 = vrot.slane %v331_v48, 4 }
 0x1e4   :  { %v384_v32 = vrot.slane %v332_v35, 4  ;;  %v390_v56 = vrot.slane %v333_v38, 4  ;;  %v396_v18 = vrot.slane %v334_v41, 4  ;;  %v402_v24 = vrot.slane %v335_v28, 4  ;;  %v313_v57 = vpop.permute.xlu0 %312 }
 0x1e5   :  { %v361_v21 = vadd.f32 %v360_v60, %v328_v40  ;;  %v367_v42 = vadd.f32 %v366_v53, %v329_v46  ;;  %v373_v14 = vadd.f32 %v372_v49, %v330_v47  ;;  %v379_v25 = vadd.f32 %v378_v26, %v331_v48  ;;  %v6657_v40 = vld [vmem:[#allocation2 + $0x58] sm:$0xff] }
 0x1e6   :  { %v385_v13 = vadd.f32 %v384_v32, %v332_v35  ;;  %v391_v61 = vadd.f32 %v390_v56, %v333_v38  ;;  %8853 = vst [vmem:[#allocation37_spill] sm:$0xff] %v6657_v40  ;;  %v397_v60 = vadd.f32 %v396_v18, %v334_v41  ;;  %v403_v20 = vadd.f32 %v402_v24, %v335_v28  ;;  %v6665_v38 = vld [vmem:[#allocation2 + $0x68] sm:$0xff]  ;;  %v6671_v28 = vld [vmem:[%s8856_s20] sm:$0x3f]  ;;  %v292_v32 = vpop.permute.xlu1 %291 }
 0x1e7   :  { %v362_v46 = vrot.slane %v361_v21, 2  ;;  %8855 = vst [vmem:[#allocation39_spill] sm:$0xff] %v6665_v38  ;;  %v6126_v47 = vmov 269488144   ;;  %v368_v49 = vrot.slane %v367_v42, 2  ;;  %v374_v53 = vrot.slane %v373_v14, 2 }
 0x1e8   :  { %v1546_v48 = vunpack.c.l.s4 %v6126_v47  ;;  %v380_v56 = vrot.slane %v379_v25, 2  ;;  %8857 = vst [vmem:[#allocation40_spill] sm:$0xff] %v6671_v28  ;;  %v386_v41 = vrot.slane %v385_v13, 2  ;;  %v392_v18 = vrot.slane %v391_v61, 2 }
 0x1e9   :  { %v398_v19 = vrot.slane %v397_v60, 2  ;;  %v404_v3 = vrot.slane %v403_v20, 2  ;;  %v363_v0 = vadd.f32 %v362_v46, %v361_v21  ;;  %v369_v5 = vadd.f32 %v368_v49, %v367_v42 }
 0x1ea   :  { %v1547_v7 = vunpack.c.0.s8 %v1546_v48  ;;  %v375_v51 = vadd.f32 %v374_v53, %v373_v14  ;;  %v381_v43 = vadd.f32 %v380_v56, %v379_v25  ;;  %v336_v26 = vmul.f32 %v292_v32, %v8858_v36 }
 0x1eb   :  { %v387_v35 = vadd.f32 %v386_v41, %v385_v13  ;;  %v393_v44 = vadd.f32 %v392_v18, %v391_v61  ;;  %v337_v47 = vmul.f32 %v292_v32, %v8859_v37  ;;  %v338_v21 = vmul.f32 %v292_v32, %v8860_v2 }
 0x1ec   :  { %v399_v46 = vadd.f32 %v398_v19, %v397_v60  ;;  %v405_v24 = vadd.f32 %v404_v3, %v403_v20  ;;  %v339_v48 = vmul.f32 %v292_v32, %v8861_v8  ;;  %v364_v25 = vrot.slane %v363_v0, 1  ;;  %v299_v60 = vpop.permute.xlu1 %298 }
 0x1ed   :  { %v8862_v42 = vunpack.c.l.bf16 %v6544_v55  ;;  %v8863_v13 = vunpack.c.l.bf16 %v6549_v62  ;;  %v6693_v50 = vsub.s32 %v1547_v7, %v6441_v27  ;;  %v370_v37 = vrot.slane %v369_v5, 1 }
 0x1ee   :  { %v376_v49 = vrot.slane %v375_v51, 1  ;;  %v382_v2 = vrot.slane %v381_v43, 1  ;;  %v408_v19 = vrot.slane %v336_v26, 4  ;;  %v388_v20 = vrot.slane %v387_v35, 1 }
 0x1ef   :  { %v348_v36 = vmul.f32 %v313_v57, %v8862_v42  ;;  %v350_v61 = vmul.f32 %v313_v57, %v8863_v13  ;;  %8864 = vst [vmem:[#allocation41_spill] sm:$0xff] %v6693_v50  ;;  %v394_v3 = vrot.slane %v393_v44, 1  ;;  %v414_v54 = vrot.slane %v337_v47, 4 }
 0x1f0   :  { %v420_v8 = vrot.slane %v338_v21, 4  ;;  %v400_v53 = vrot.slane %v399_v46, 1  ;;  %v406_v56 = vrot.slane %v405_v24, 1  ;;  %v426_v41 = vrot.slane %v339_v48, 4 }
 0x1f1   :  { %v8865_v18 = vunpack.c.h.bf16 %v6544_v55  ;;  %v6697_v42 = vadd.f32 %v364_v25, %v363_v0  ;;  %v8866_v7 = vunpack.c.h.bf16 %v6549_v62  ;;  %v480_v14 = vrot.slane %v348_v36, 4 }
 0x1f2   :  { %v492_v27 = vrot.slane %v350_v61, 4  ;;  %v6701_v30 = vadd.f32 %v370_v37, %v369_v5  ;;  %v6703_v31 = vadd.f32 %v376_v49, %v375_v51  ;;  %v409_v38 = vadd.f32 %v408_v19, %v336_v26 }
 0x1f3   :  { %v349_v32 = vmul.f32 %v313_v57, %v8865_v18  ;;  %v351_v13 = vmul.f32 %v313_v57, %v8866_v7  ;;  %v340_v52 = vmul.f32 %v299_v60, %v8868_v9  ;;  %v6707_v28 = vadd.f32 %v382_v2, %v381_v43  ;;  %v320_v2 = vpop.permute.xlu0 %319 }
 0x1f4   :  { %8867 = vst [vmem:[#allocation42_spill] sm:$0xff] %v6703_v31  ;;  %v415_v50 = vadd.f32 %v414_v54, %v337_v47  ;;  %v421_v55 = vadd.f32 %v420_v8, %v338_v21  ;;  %v8869_v0 = vunpack.c.h.bf16 %v6554_v63  ;;  %v427_v18 = vadd.f32 %v426_v41, %v339_v48 }
 0x1f5   :  { %v486_v62 = vrot.slane %v349_v32, 4  ;;  %v8870_v57 = vunpack.c.l.bf16 %v6562_v1  ;;  %v8871_v5 = vunpack.c.h.bf16 %v6562_v1  ;;  %v6715_v37 = vadd.f32 %v388_v20, %v387_v35 }
 0x1f6   :  { %v341_v25 = vmul.f32 %v299_v60, %v8869_v0  ;;  %v481_v26 = vadd.f32 %v480_v14, %v348_v36  ;;  %v493_v49 = vadd.f32 %v492_v27, %v350_v61  ;;  %v498_v9 = vrot.slane %v351_v13, 4 }
 0x1f7   :  { %v342_v7 = vmul.f32 %v299_v60, %v8870_v57  ;;  %v343_v51 = vmul.f32 %v299_v60, %v8871_v5  ;;  %8872 = vst [vmem:[#allocation43_spill] sm:$0xff] %v6715_v37  ;;  %v6717_v43 = vadd.f32 %v394_v3, %v393_v44  ;;  %v6719_v47 = vadd.f32 %v400_v53, %v399_v46 }
 0x1f8   :  { %v410_v21 = vrot.slane %v409_v38, 2  ;;  %v432_v63 = vrot.slane %v340_v52, 4  ;;  %v6721_v48 = vadd.f32 %v406_v56, %v405_v24  ;;  %v416_v19 = vrot.slane %v415_v50, 2 }
 0x1f9   :  { %8873 = vst [vmem:[#allocation44_spill] sm:$0xff] %v6719_v47  ;;  %v422_v54 = vrot.slane %v421_v55, 2  ;;  %v438_v8 = vrot.slane %v341_v25, 4  ;;  %v428_v41 = vrot.slane %v427_v18, 2  ;;  %v487_v1 = vadd.f32 %v486_v62, %v349_v32 }
 0x1fa   :  { %v444_v60 = vrot.slane %v342_v7, 4  ;;  %v450_v35 = vrot.slane %v343_v51, 4  ;;  %v482_v20 = vrot.slane %v481_v26, 2  ;;  %v494_v14 = vrot.slane %v493_v49, 2 }
 0x1fb   :  { %v499_v27 = vadd.f32 %v498_v9, %v351_v13  ;;  %v8874_v44 = vunpack.c.l.bf16 %v6567_v6  ;;  %v411_v46 = vadd.f32 %v410_v21, %v409_v38  ;;  %v433_v61 = vadd.f32 %v432_v63, %v340_v52 }
 0x1fc   :  { %v8875_v3 = vunpack.c.h.bf16 %v6567_v6  ;;  %v8876_v24 = vunpack.c.l.bf16 %v6576_v10  ;;  %v417_v0 = vadd.f32 %v416_v19, %v415_v50  ;;  %v423_v57 = vadd.f32 %v422_v54, %v421_v55  ;;  %v6735_v50 = vpop.permute.xlu0 %326 }
 0x1fd   :  { %v352_v36 = vmul.f32 %v320_v2, %v8874_v44  ;;  %v439_v5 = vadd.f32 %v438_v8, %v341_v25  ;;  %v8877_v32 = vunpack.c.h.bf16 %v6576_v10  ;;  %v429_v40 = vadd.f32 %v428_v41, %v427_v18  ;;  %v306_v41 = vpop.permute.xlu1 %305 }
 0x1fe   :  { %v353_v53 = vmul.f32 %v320_v2, %v8875_v3  ;;  %v354_v56 = vmul.f32 %v320_v2, %v8876_v24  ;;  %v488_v12 = vrot.slane %v487_v1, 2  ;;  %v445_v13 = vadd.f32 %v444_v60, %v342_v7 }
 0x1ff   :  { %v355_v62 = vmul.f32 %v320_v2, %v8877_v32  ;;  %v451_v9 = vadd.f32 %v450_v35, %v343_v51  ;;  %v6731_v15 = vadd.f32 %v482_v20, %v481_v26  ;;  %v6733_v38 = vadd.f32 %v494_v14, %v493_v49 }
 0x200   :  { %v500_v52 = vrot.slane %v499_v27, 2  ;;  %v504_v6 = vrot.slane %v352_v36, 4  ;;  %v412_v21 = vrot.slane %v411_v46, 1  ;;  %v434_v63 = vrot.slane %v433_v61, 2 }
 0x201   :  { %8878 = vst [vmem:[#allocation45_spill] sm:$0xff] %v6733_v38  ;;  %v510_v44 = vrot.slane %v353_v53, 4  ;;  %v516_v3 = vrot.slane %v354_v56, 4  ;;  %v418_v55 = vrot.slane %v417_v0, 1  ;;  %v424_v25 = vrot.slane %v423_v57, 1 }
 0x202   :  { %v440_v10 = vrot.slane %v439_v5, 2  ;;  %v522_v2 = vrot.slane %v355_v62, 4  ;;  %v430_v18 = vrot.slane %v429_v40, 1  ;;  %v6737_v19 = vadd.f32 %v488_v12, %v487_v1 }
 0x203   :  { %v446_v7 = vrot.slane %v445_v13, 2  ;;  %v452_v51 = vrot.slane %v451_v9, 2  ;;  %v6741_v54 = vadd.f32 %v500_v52, %v499_v27  ;;  %v505_v8 = vadd.f32 %v504_v6, %v352_v36 }
 0x204   :  { %v6743_v60 = vadd.f32 %v412_v21, %v411_v46  ;;  %v435_v35 = vadd.f32 %v434_v63, %v433_v61  ;;  %v6745_v20 = vadd.f32 %v510_v44, %v353_v53  ;;  %v517_v14 = vadd.f32 %v516_v3, %v354_v56  ;;  %v614_v46 = vpop.permute.xlu0 %613 }
 0x205   :  { %v6747_v24 = vadd.f32 %v418_v55, %v417_v0  ;;  %v6749_v12 = vadd.f32 %v424_v25, %v423_v57  ;;  %v441_v1 = vadd.f32 %v440_v10, %v439_v5  ;;  %v6751_v32 = vadd.f32 %v522_v2, %v355_v62 }
 0x206   :  { %8879 = vst [vmem:[#allocation46_spill] sm:$0xff] %v6743_v60  ;;  %v6753_v26 = vadd.f32 %v430_v18, %v429_v40  ;;  %v447_v49 = vadd.f32 %v446_v7, %v445_v13  ;;  %v453_v27 = vadd.f32 %v452_v51, %v451_v9  ;;  %v8881_v36 = vunpack.c.l.bf16 %v6581_v11 }
 0x207   :  { %8880 = vst [vmem:[#allocation47_spill] sm:$0xff] %v6749_v12  ;;  %v506_v6 = vrot.slane %v505_v8, 2  ;;  %v8882_v61 = vunpack.c.h.bf16 %v6581_v11  ;;  %v8883_v56 = vunpack.c.l.bf16 %v6590_v16  ;;  %v8884_v57 = vunpack.c.l.bf16 %v6610_v29 }
 0x208   :  { %v344_v52 = vmul.f32 %v306_v41, %v8881_v36  ;;  %v436_v62 = vrot.slane %v435_v35, 1  ;;  %v518_v21 = vrot.slane %v517_v14, 2  ;;  %v8885_v13 = vunpack.c.h.bf16 %v6610_v29 }
 0x209   :  { %v345_v53 = vmul.f32 %v306_v41, %v8882_v61  ;;  %v346_v0 = vmul.f32 %v306_v41, %v8883_v56  ;;  %v664_v5 = vmul.f32 %v614_v46, %v8884_v57  ;;  %v442_v63 = vrot.slane %v441_v1, 1 }
 0x20a   :  { %v665_v9 = vmul.f32 %v614_v46, %v8885_v13  ;;  %v8886_v3 = vunpack.c.l.bf16 %v6616_v39  ;;  %v8887_v55 = vunpack.c.h.bf16 %v6616_v39  ;;  %v448_v10 = vrot.slane %v447_v49, 1 }
 0x20b   :  { %v454_v2 = vrot.slane %v453_v27, 1  ;;  %v8888_v18 = vunpack.c.h.bf16 %v6590_v16  ;;  %v456_v51 = vrot.slane %v344_v52, 4  ;;  %v6773_v36 = vadd.f32 %v506_v6, %v505_v8 }
 0x20c   :  { %v666_v11 = vmul.f32 %v614_v46, %v8886_v3  ;;  %v667_v25 = vmul.f32 %v614_v46, %v8887_v55  ;;  %v462_v61 = vrot.slane %v345_v53, 4  ;;  %v468_v29 = vrot.slane %v346_v0, 4  ;;  %v621_v55 = vpop.permute.xlu0 %620 }
 0x20d   :  { %v347_v7 = vmul.f32 %v306_v41, %v8888_v18  ;;  %v696_v56 = vrot.slane %v664_v5, 4  ;;  %v6775_v57 = vadd.f32 %v436_v62, %v435_v35  ;;  %v6777_v13 = vadd.f32 %v518_v21, %v517_v14 }
 0x20e   :  { %v8891_v3 = vunpack.c.l.bf16 %v6595_v17  ;;  %v702_v46 = vrot.slane %v665_v9, 4  ;;  %v6782_v44 = vadd.f32 %v442_v63, %v441_v1  ;;  %v708_v16 = vrot.slane %v666_v11, 4 }
 0x20f   :  { %8889 = vst [vmem:[#allocation48_spill] sm:$0xff] %v6775_v57  ;;  %8890 = vst [vmem:[#allocation49_spill] sm:$0xff] %v6777_v13  ;;  %v714_v41 = vrot.slane %v667_v25, 4  ;;  %v8892_v8 = vunpack.c.l.bf16 %v6621_v45  ;;  %v6786_v18 = vadd.f32 %v448_v10, %v447_v49  ;;  %v6788_v40 = vadd.f32 %v454_v2, %v453_v27 }
 0x210   :  { %v356_v39 = vmul.f32 %v6735_v50, %v8891_v3  ;;  %v457_v35 = vadd.f32 %v456_v51, %v344_v52  ;;  %v474_v14 = vrot.slane %v347_v7, 4  ;;  %v463_v62 = vadd.f32 %v462_v61, %v345_v53 }
 0x211   :  { %v668_v6 = vmul.f32 %v621_v55, %v8892_v8  ;;  %8893 = vst [vmem:[#allocation50_spill] sm:$0xff] %v6786_v18  ;;  %v469_v21 = vadd.f32 %v468_v29, %v346_v0  ;;  %v357_v3 = vmul.f32 %v6735_v50, %v8894_v22  ;;  %v697_v12 = vadd.f32 %v696_v56, %v664_v5 }
 0x212   :  { %v528_v1 = vrot.slane %v356_v39, 4  ;;  %v703_v63 = vadd.f32 %v702_v46, %v665_v9  ;;  %v8895_v38 = vunpack.c.h.bf16 %v6621_v45  ;;  %v8896_v8 = vunpack.c.l.bf16 %v6624_v34 }
 0x213   :  { %v709_v10 = vadd.f32 %v708_v16, %v666_v11  ;;  %v715_v27 = vadd.f32 %v714_v41, %v667_v25  ;;  %v8897_v52 = vunpack.c.h.bf16 %v6624_v34  ;;  %v720_v53 = vrot.slane %v668_v6, 4 }
 0x214   :  { %v669_v47 = vmul.f32 %v621_v55, %v8895_v38  ;;  %v670_v49 = vmul.f32 %v621_v55, %v8896_v8  ;;  %v458_v0 = vrot.slane %v457_v35, 2  ;;  %v475_v51 = vadd.f32 %v474_v14, %v347_v7 }
 0x215   :  { %v671_v2 = vmul.f32 %v621_v55, %v8897_v52  ;;  %v8898_v17 = vunpack.c.l.bf16 %v6604_v23  ;;  %v8899_v5 = vunpack.c.h.bf16 %v6604_v23  ;;  %v464_v38 = vrot.slane %v463_v62, 2 }
 0x216   :  { %v470_v9 = vrot.slane %v469_v21, 2  ;;  %v534_v61 = vrot.slane %v357_v3, 4  ;;  %v698_v29 = vrot.slane %v697_v12, 2  ;;  %v6805_v11 = vadd.f32 %v528_v1, %v356_v39 }
 0x217   :  { %v358_v22 = vmul.f32 %v6735_v50, %v8898_v17  ;;  %v359_v45 = vmul.f32 %v6735_v50, %v8899_v5  ;;  %v704_v25 = vrot.slane %v703_v63, 2  ;;  %v726_v34 = vrot.slane %v669_v47, 4 }
 0x218   :  { %v732_v56 = vrot.slane %v670_v49, 4  ;;  %v710_v46 = vrot.slane %v709_v10, 2  ;;  %v716_v55 = vrot.slane %v715_v27, 2  ;;  %v721_v7 = vadd.f32 %v720_v53, %v668_v6 }
 0x219   :  { %v738_v16 = vrot.slane %v671_v2, 4  ;;  %v459_v41 = vadd.f32 %v458_v0, %v457_v35  ;;  %v476_v14 = vrot.slane %v475_v51, 2  ;;  %v540_v8 = vrot.slane %v358_v22, 4 }
 0x21a   :  { %v546_v52 = vrot.slane %v359_v45, 4  ;;  %v465_v23 = vadd.f32 %v464_v38, %v463_v62  ;;  %v471_v17 = vadd.f32 %v470_v9, %v469_v21  ;;  %v535_v50 = vadd.f32 %v534_v61, %v357_v3  ;;  %v628_v62 = vpop.permute.xlu0 %627 }
 0x21b   :  { %v699_v5 = vadd.f32 %v698_v29, %v697_v12  ;;  %v530_v18 = vrot.slane %v6805_v11, 2  ;;  %v705_v31 = vadd.f32 %v704_v25, %v703_v63  ;;  %v727_v39 = vadd.f32 %v726_v34, %v669_v47 }
 0x21c   :  { %v733_v1 = vadd.f32 %v732_v56, %v670_v49  ;;  %v711_v57 = vadd.f32 %v710_v46, %v709_v10  ;;  %v717_v60 = vadd.f32 %v716_v55, %v715_v27  ;;  %v722_v13 = vrot.slane %v721_v7, 2 }
 0x21d   :  { %v739_v37 = vadd.f32 %v738_v16, %v671_v2  ;;  %v460_v6 = vrot.slane %v459_v41, 1  ;;  %v477_v53 = vadd.f32 %v476_v14, %v475_v51  ;;  %v6808_v35 = vadd.f32 %v540_v8, %v358_v22 }
 0x21e   :  { %v6810_v0 = vadd.f32 %v546_v52, %v359_v45  ;;  %v466_v21 = vrot.slane %v465_v23, 1  ;;  %v472_v12 = vrot.slane %v471_v17, 1  ;;  %v700_v3 = vrot.slane %v699_v5, 1 }
 0x21f   :  { %v8900_v63 = vunpack.c.l.bf16 %v6628_v59  ;;  %v706_v49 = vrot.slane %v705_v31, 1  ;;  %v728_v10 = vrot.slane %v727_v39, 2  ;;  %v734_v27 = vrot.slane %v733_v1, 2 }
 0x220   :  { %v8901_v2 = vunpack.c.h.bf16 %v6628_v59  ;;  %v712_v51 = vrot.slane %v711_v57, 1  ;;  %v718_v22 = vrot.slane %v717_v60, 1  ;;  %v6816_v45 = vadd.f32 %v722_v13, %v721_v7 }
 0x221   :  { %v672_v47 = vmul.f32 %v628_v62, %v8900_v63  ;;  %v740_v9 = vrot.slane %v739_v37, 2  ;;  %v6818_v61 = vadd.f32 %v460_v6, %v459_v41  ;;  %v478_v29 = vrot.slane %v477_v53, 1 }
 0x222   :  { %v673_v38 = vmul.f32 %v628_v62, %v8901_v2  ;;  %v542_v25 = vrot.slane %v6808_v35, 2  ;;  %v8902_v34 = vunpack.c.l.bf16 %v6632_v58  ;;  %v6825_v46 = vadd.f32 %v472_v12, %v471_v17 }
 0x223   :  { %v6827_v59 = vadd.f32 %v700_v3, %v699_v5  ;;  %v8903_v55 = vunpack.c.h.bf16 %v6632_v58  ;;  %v744_v7 = vrot.slane %v672_v47, 4  ;;  %v6833_v16 = vadd.f32 %v706_v49, %v705_v31 }
 0x224   :  { %v6823_v56 = vmul.f32 %v628_v62, %v8902_v34  ;;  %v6835_v41 = vadd.f32 %v728_v10, %v727_v39  ;;  %v6837_v14 = vadd.f32 %v734_v27, %v733_v1  ;;  %v750_v8 = vrot.slane %v673_v38, 4 }
 0x225   :  { %v6831_v13 = vmul.f32 %v628_v62, %v8903_v55  ;;  %v6839_v52 = vadd.f32 %v712_v51, %v711_v57  ;;  %v6841_v6 = vadd.f32 %v718_v22, %v717_v60  ;;  %v724_v17 = vrot.slane %v6816_v45, 1  ;;  %v635_v62 = vpop.permute.xlu0 %634 }
 0x226   :  { %v6844_v5 = vadd.f32 %v740_v9, %v739_v37  ;;  %v756_v58 = vrot.slane %v6823_v56, 4  ;;  %v490_v12 = vrot.slane %v6737_v19, 1  ;;  %v8904_v31 = vrot.slane %v6745_v20, 2 }
 0x227   :  { %v536_v1 = vrot.slane %v535_v50, 2  ;;  %v6851_v3 = vadd.f32 %v744_v7, %v672_v47  ;;  %v762_v57 = vrot.slane %v6831_v13, 4  ;;  %v8905_v60 = vunpack.c.l.bf16 %v6637_v33 }
 0x228   :  { %v513_v39 = vadd.f32 %v8904_v31, %v6745_v20  ;;  %v467_v37 = vadd.f32 %v466_v21, %v465_v23  ;;  %v6858_v49 = vadd.f32 %v750_v8, %v673_v38  ;;  %v1005_v2 = vsel %vm991_vm3, %v6717_v43, %v6701_v30 }
 0x229   :  { %v6856_v63 = vmul.f32 %v635_v62, %v8905_v60  ;;  %v537_v27 = vadd.f32 %v536_v1, %v535_v50  ;;  %v8906_v20 = vunpack.c.h.bf16 %v6637_v33  ;;  %v491_v47 = vadd.f32 %v490_v12, %v6737_v19 }
 0x22a   :  { %v514_v10 = vrot.slane %v513_v39, 1  ;;  %v1006_v22 = vsel %vm993_vm4, %v6747_v24, %v1005_v2  ;;  %v479_v9 = vadd.f32 %v478_v29, %v477_v53  ;;  %v502_v50 = vrot.slane %v6741_v54, 1 }
 0x22b   :  { %v6865_v51 = vmul.f32 %v635_v62, %v8906_v20  ;;  %v538_v23 = vrot.slane %v537_v27, 1  ;;  %v1007_v21 = vsel %vm995_vm5, %v6782_v44, %v1006_v22  ;;  %v8907_v30 = vrot.slane %v6751_v32, 2  ;;  %v8912_v20 = vld [vmem:[#allocation49_spill] sm:$0xff] }
 0x22c   :  { %v515_v34 = vadd.f32 %v514_v10, %v513_v39  ;;  %v1008_v38 = vsel %vm997_vm6, %v467_v37, %v1007_v21  ;;  %v548_v43 = vrot.slane %v6810_v0, 2  ;;  %v1019_v19 = vsel %vm991_vm3, %v6721_v48, %v6707_v28 }
 0x22d   :  { %v525_v33 = vadd.f32 %v8907_v30, %v6751_v32  ;;  %v539_v24 = vadd.f32 %v538_v23, %v537_v27  ;;  %v1009_v53 = vsel %vm999_vm7, %v491_v47, %v1008_v38  ;;  %v503_v29 = vadd.f32 %v502_v50, %v6741_v54  ;;  %v8911_v27 = vld [vmem:[#allocation43_spill] sm:$0xff]  ;;  %v8913_v23 = vld [vmem:[#allocation46_spill] sm:$0xff]  ;;  %v8916_v50 = vld [vmem:[#allocation44_spill] sm:$0xff] }
 0x22e   :  { %v1020_v44 = vsel %vm993_vm4, %v6753_v26, %v1019_v19  ;;  %v1010_v55 = vsel %vm1001_vm8, %v515_v34, %v1009_v53  ;;  %v549_v8 = vadd.f32 %v548_v43, %v6810_v0  ;;  %v8908_v12 = vunpack.c.l.bf16 %v6640_v4  ;;  %v8917_v43 = vld [vmem:[#allocation45_spill] sm:$0xff] }
 0x22f   :  { %v526_v7 = vrot.slane %v525_v33, 1  ;;  %v1021_v32 = vsel %vm995_vm5, %v6788_v40, %v1020_v44  ;;  %v1011_v28 = vsel %vm1003_vm9, %v539_v24, %v1010_v55  ;;  %v508_v54 = vrot.slane %v6773_v36, 1  ;;  %v8919_v24 = vld [vmem:[#allocation47_spill] sm:$0xff]  ;;  %v8920_v44 = vld [vmem:[#allocation50_spill] sm:$0xff] }
 0x230   :  { %v678_v31 = vmul.f32 %v635_v62, %v8908_v12  ;;  %v1022_v48 = vsel %vm997_vm6, %v479_v9, %v1021_v32  ;;  %1094 = vmatprep.mubr.f32.mxu0 %v1011_v28  ;;  %v550_v26 = vrot.slane %v549_v8, 1  ;;  %v531_v0 = vadd.f32 %v530_v18, %v6805_v11  ;;  %v642_v11 = vpop.permute.xlu0 %641 }
 0x231   :  { %v527_v39 = vadd.f32 %v526_v7, %v525_v33  ;;  %v1023_v1 = vsel %vm999_vm7, %v503_v29, %v1022_v48  ;;  %v8909_v40 = vunpack.c.h.bf16 %v6640_v4  ;;  %v8910_v37 = vrot.slane %v6731_v15, 1 }
 0x232   :  { %v992_v2 = vsel %vm991_vm3, %v8911_v27, %v6697_v42  ;;  %v520_v47 = vrot.slane %v8912_v20, 1  ;;  %v551_v22 = vadd.f32 %v550_v26, %v549_v8  ;;  %v532_v34 = vrot.slane %v531_v0, 1  ;;  %v8915_v42 = vld [vmem:[#allocation42_spill] sm:$0xff] }
 0x233   :  { %v679_v60 = vmul.f32 %v635_v62, %v8909_v40  ;;  %v485_v10 = vadd.f32 %v8910_v37, %v6731_v15  ;;  %v1024_v9 = vsel %vm1001_vm8, %v527_v39, %v1023_v1  ;;  %v994_v18 = vsel %vm993_vm4, %v8913_v23, %v992_v2  ;;  %v8914_v62 = vld [vmem:[#allocation48_spill] sm:$0xff] }
 0x234   :  { %v509_v4 = vadd.f32 %v508_v54, %v6773_v36  ;;  %v996_v21 = vsel %vm995_vm5, %v8914_v62, %v994_v18  ;;  %v543_v15 = vadd.f32 %v542_v25, %v6808_v35  ;;  %v1012_v38 = vsel %vm991_vm3, %v8916_v50, %v8915_v42  ;;  %v649_v40 = vpop.permute.xlu0 %648 }
 0x235   :  { %v1025_v30 = vsel %vm1003_vm9, %v551_v22, %v1024_v9  ;;  %v998_v33 = vsel %vm997_vm6, %v6818_v61, %v996_v21  ;;  %v8918_v19 = vrot.slane %v8917_v43, 1  ;;  %v1013_v53 = vsel %vm993_vm4, %v8919_v24, %v1012_v38 }
 0x236   :  { %1164 = vmatprep.mubr.f32.mxu1 %v1025_v30  ;;  %v533_v29 = vadd.f32 %v532_v34, %v531_v0  ;;  %v1000_v35 = vsel %vm999_vm7, %v485_v10, %v998_v33  ;;  %v544_v25 = vrot.slane %v543_v15, 1  ;;  %v1014_v55 = vsel %vm995_vm5, %v8920_v44, %v1013_v53  ;;  %v8928_v53 = vld [vmem:[#allocation36_spill] sm:$0xff] }
 0x237   :  { %v497_v36 = vadd.f32 %v8918_v19, %v8917_v43  ;;  %v768_v7 = vrot.slane %v6856_v63, 4  ;;  %v1002_v8 = vsel %vm1001_vm8, %v509_v4, %v1000_v35  ;;  %v521_v61 = vadd.f32 %v520_v47, %v8912_v20  ;;  %v8921_v47 = vld [vmem:[#allocation34_spill] sm:$0xff] }
 0x238   :  { %v1015_v32 = vsel %vm997_vm6, %v6825_v46, %v1014_v55  ;;  %v774_v12 = vrot.slane %v6865_v51, 4  ;;  %v1004_v28 = vsel %vm1003_vm9, %v533_v29, %v1002_v8  ;;  %v545_v48 = vadd.f32 %v544_v25, %v543_v15  ;;  %v6975_v33 = vpop.permute.xlu0 %655  ;;  %v8932_v8 = vld [vmem:[#allocation37_spill] sm:$0xff] }
 0x239   :  { %v1016_v54 = vsel %vm999_vm7, %v497_v36, %v1015_v32  ;;  %v730_v39 = vrot.slane %v6835_v41, 1  ;;  %v736_v26 = vrot.slane %v6837_v14, 1  ;;  %v780_v1 = vrot.slane %v678_v31, 4  ;;  %1095 = vmatmul.mubr.f32.vlgmr.msra.gmra.mrb[0].mxu0 %v1004_v28 }
 0x23a   :  { %v1017_v0 = vsel %vm1001_vm8, %v521_v61, %v1016_v54  ;;  %v742_v37 = vrot.slane %v6844_v5, 1  ;;  %v757_v46 = vadd.f32 %v756_v58, %v6823_v56  ;;  %v786_v10 = vrot.slane %v679_v60, 4 }
 0x23b   :  { %v1018_v27 = vsel %vm1003_vm9, %v545_v48, %v1017_v0  ;;  %v725_v2 = vadd.f32 %v724_v17, %v6816_v45  ;;  %v763_v20 = vadd.f32 %v762_v57, %v6831_v13  ;;  %v8922_v22 = vunpack.c.l.bf16 %v8921_v47  ;;  %v8924_v13 = vld [vmem:[#allocation35_spill] sm:$0xff] }
 0x23c   :  { %1165 = vmatmul.mubr.f32.vlgmr.msra.gmra.mrb[0].mxu1 %v1018_v27  ;;  %v8923_v34 = vunpack.c.h.bf16 %v8921_v47  ;;  %v746_v56 = vrot.slane %v6851_v3, 2  ;;  %v752_v58 = vrot.slane %v6858_v49, 2  ;;  %v769_v18 = vadd.f32 %v768_v7, %v6856_v63  ;;  %v1487_v0 = vpop.permute.xlu0 %1486 }
 0x23d   :  { %v680_v9 = vmul.f32 %v642_v11, %v8922_v22  ;;  %v775_v4 = vadd.f32 %v774_v12, %v6865_v51  ;;  %v6961_v45 = vadd.f32 %v730_v39, %v6835_v41  ;;  %v781_v17 = vadd.f32 %v780_v1, %v678_v31 }
 0x23e   :  { %v681_v23 = vmul.f32 %v642_v11, %v8923_v34  ;;  %v8925_v57 = vunpack.c.l.bf16 %v8924_v13  ;;  %v8926_v21 = vunpack.c.h.bf16 %v8924_v13  ;;  %v737_v42 = vadd.f32 %v736_v26, %v6837_v14 }
 0x23f   :  { %v6969_v50 = vadd.f32 %v742_v37, %v6844_v5  ;;  %v758_v38 = vrot.slane %v757_v46, 2  ;;  %v787_v30 = vadd.f32 %v786_v10, %v679_v60  ;;  %v6973_v63 = vsel %vm991_vm3, %v725_v2, %v6827_v59  ;;  %v8935_v2 = vld [vmem:[#allocation41_spill] sm:$0xff] }
 0x240   :  { %v682_v62 = vmul.f32 %v642_v11, %v8925_v57  ;;  %v683_v15 = vmul.f32 %v642_v11, %v8926_v21  ;;  %8927 = vst [vmem:[#allocation43_spill] sm:$0xff] %v6973_v63  ;;  %v764_v41 = vrot.slane %v763_v20, 2  ;;  %v792_v51 = vrot.slane %v680_v9, 4 }
 0x241   :  { %v798_v31 = vrot.slane %v681_v23, 4  ;;  %v747_v43 = vadd.f32 %v746_v56, %v6851_v3  ;;  %v753_v11 = vadd.f32 %v752_v58, %v6858_v49  ;;  %v770_v19 = vrot.slane %v769_v18, 2 }
 0x242   :  { %v776_v14 = vrot.slane %v775_v4, 2  ;;  %v782_v36 = vrot.slane %v781_v17, 2  ;;  %v804_v5 = vrot.slane %v682_v62, 4  ;;  %v810_v24 = vrot.slane %v683_v15, 4 }
 0x243   :  { %v8929_v60 = vunpack.c.l.bf16 %v8928_v53  ;;  %v6983_v59 = vsel %vm991_vm3, %v737_v42, %v6839_v52  ;;  %v759_v35 = vadd.f32 %v758_v38, %v757_v46  ;;  %v788_v25 = vrot.slane %v787_v30, 2 }
 0x244   :  { %8930 = vst [vmem:[#allocation49_spill] sm:$0xff] %v6983_v59  ;;  %v8931_v44 = vunpack.c.h.bf16 %v8928_v53  ;;  %v765_v3 = vadd.f32 %v764_v41, %v763_v20  ;;  %v793_v7 = vadd.f32 %v792_v51, %v680_v9  ;;  %v799_v49 = vadd.f32 %v798_v31, %v681_v23 }
 0x245   :  { %v684_v29 = vmul.f32 %v649_v40, %v8929_v60  ;;  %v8933_v61 = vunpack.c.l.bf16 %v8932_v8  ;;  %v748_v12 = vrot.slane %v747_v43, 1  ;;  %v754_v28 = vrot.slane %v753_v11, 1 }
 0x246   :  { %v685_v55 = vmul.f32 %v649_v40, %v8931_v44  ;;  %v771_v48 = vadd.f32 %v770_v19, %v769_v18  ;;  %v777_v54 = vadd.f32 %v776_v14, %v775_v4  ;;  %v783_v39 = vadd.f32 %v782_v36, %v781_v17  ;;  %v8943_v44 = vld [vmem:[#allocation33_spill] sm:$0xff] }
 0x247   :  { %v686_v32 = vmul.f32 %v649_v40, %v8933_v61  ;;  %v805_v26 = vadd.f32 %v804_v5, %v682_v62  ;;  %v811_v1 = vadd.f32 %v810_v24, %v683_v15  ;;  %v816_v52 = vrot.slane %v684_v29, 4  ;;  %v8937_v15 = vld [vmem:[#allocation40_spill] sm:$0xff]  ;;  %v1494_v61 = vpop.permute.xlu0 %1493 }
 0x248   :  { %v789_v37 = vadd.f32 %v788_v25, %v787_v30  ;;  %v8934_v46 = vunpack.c.h.bf16 %v8932_v8  ;;  %v822_v27 = vrot.slane %v685_v55, 4  ;;  %v1551_v20 = vrot.slane %v1487_v0, %v8935_v2 }
 0x249   :  { %v760_v47 = vrot.slane %v759_v35, 1  ;;  %v794_v22 = vrot.slane %v793_v7, 2  ;;  %v800_v9 = vrot.slane %v799_v49, 2  ;;  %v828_v34 = vrot.slane %v686_v32, 4 }
 0x24a   :  { %v687_v10 = vmul.f32 %v649_v40, %v8934_v46  ;;  %v6992_v23 = vadd.f32 %v748_v12, %v747_v43  ;;  %v766_v56 = vrot.slane %v765_v3, 1  ;;  %v772_v58 = vrot.slane %v771_v48, 1 }
 0x24b   :  { %v778_v18 = vrot.slane %v777_v54, 1  ;;  %v784_v4 = vrot.slane %v783_v39, 1  ;;  %v806_v17 = vrot.slane %v805_v26, 2  ;;  %v812_v13 = vrot.slane %v811_v1, 2 }
 0x24c   :  { %8936 = vst [vmem:[#allocation46_spill] sm:$0xff] %v6992_v23  ;;  %v817_v57 = vadd.f32 %v816_v52, %v684_v29  ;;  %v790_v62 = vrot.slane %v789_v37, 1  ;;  %v823_v21 = vadd.f32 %v822_v27, %v685_v55  ;;  %v834_v40 = vrot.slane %v687_v10, 4 }
 0x24d   :  { %v8938_v42 = vunpack.c.l.bf16 %v8937_v15  ;;  %v6996_v30 = vadd.f32 %v754_v28, %v753_v11  ;;  %v795_v41 = vadd.f32 %v794_v22, %v793_v7  ;;  %v801_v51 = vadd.f32 %v800_v9, %v799_v49  ;;  %v1458_v11 = vld [vmem:[%s8856_s20 + $0x6] sm:$0x3f] }
 0x24e   :  { %v829_v31 = vadd.f32 %v828_v34, %v686_v32  ;;  %v6998_v43 = vadd.f32 %v760_v47, %v759_v35  ;;  %v7000_v19 = vadd.f32 %v766_v56, %v765_v3  ;;  %v7002_v14 = vadd.f32 %v772_v58, %v771_v48  ;;  %v8944_v32 = vld [vmem:[#allocation38_spill] sm:$0xff] }
 0x24f   :  { %v1609_v38 = vmul.f32 %v1551_v20, %v8938_v42  ;;  %v7004_v36 = vadd.f32 %v778_v18, %v777_v54  ;;  %v7006_v5 = vadd.f32 %v784_v4, %v783_v39  ;;  %v807_v24 = vadd.f32 %v806_v17, %v805_v26 }
 0x250   :  { %8939 = vst [vmem:[#allocation48_spill] sm:$0xff] %v6998_v43  ;;  %8940 = vst [vmem:[#allocation42_spill] sm:$0xff] %v7002_v14  ;;  %v813_v53 = vadd.f32 %v812_v13, %v811_v1  ;;  %v818_v60 = vrot.slane %v817_v57, 2  ;;  %v7011_v29 = vadd.f32 %v790_v62, %v789_v37  ;;  %v824_v25 = vrot.slane %v823_v21, 2  ;;  %v8947_v37 = vld [vmem:[#allocation39_spill] sm:$0xff] }
 0x251   :  { %8941 = vst [vmem:[#allocation44_spill] sm:$0xff] %v7006_v5  ;;  %v835_v35 = vadd.f32 %v834_v40, %v687_v10  ;;  %v1648_v55 = vrot.slane %v1609_v38, %v8943_v44  ;;  %v796_v3 = vrot.slane %v795_v41, 1  ;;  %v802_v7 = vrot.slane %v801_v51, 1 }
 0x252   :  { %8942 = vst [vmem:[#allocation45_spill] sm:$0xff] %v7011_v29  ;;  %v830_v49 = vrot.slane %v829_v31, 2  ;;  %v1641_v8 = vcombine.high %v1609_v38, %v1609_v38  ;;  %v8945_v12 = vunpack.c.l.bf16 %v8944_v32  ;;  %v8946_v48 = vunpack.c.h.bf16 %v8944_v32 }
 0x253   :  { %v1467_v39 = vunpack.c.l.bf16 %v1458_v11  ;;  %v1558_v26 = vrot.slane %v1494_v61, %v8935_v2  ;;  %v808_v1 = vrot.slane %v807_v24, 1  ;;  %v814_v52 = vrot.slane %v813_v53, 1 }
 0x254   :  { %v688_v28 = vmul.f32 %v6975_v33, %v8945_v12  ;;  %v689_v54 = vmul.f32 %v6975_v33, %v8946_v48  ;;  %v819_v0 = vadd.f32 %v818_v60, %v817_v57  ;;  %v8948_v46 = vunpack.c.l.bf16 %v8947_v37 }
 0x255   :  { %v7024_v27 = vadd.f32 %v824_v25, %v823_v21  ;;  %v836_v47 = vrot.slane %v835_v35, 2  ;;  %v8949_v22 = vunpack.c.h.bf16 %v8937_v15  ;;  %v1656_v34 = vcombine.high %v1648_v55, %v1648_v55 }
 0x256   :  { %v690_v10 = vmul.f32 %v6975_v33, %v8948_v46  ;;  %v7028_v56 = vadd.f32 %v796_v3, %v795_v41  ;;  %v831_v58 = vadd.f32 %v830_v49, %v829_v31  ;;  %v8951_v18 = vunpack.c.h.bf16 %v8947_v37 }
 0x257   :  { %v1610_v9 = vmul.f32 %v1551_v20, %v8949_v22  ;;  %v1655_v17 = vrot.slane %v1641_v8, %v8943_v44  ;;  %v840_v13 = vrot.slane %v688_v28, 4  ;;  %v846_v57 = vrot.slane %v689_v54, 4 }
 0x258   :  { %8950 = vst [vmem:[#allocation47_spill] sm:$0xff] %v7028_v56  ;;  %v691_v4 = vmul.f32 %v6975_v33, %v8951_v18  ;;  %v1890_v62 = vsel %vm1889_vm10, %v1648_v55, 0.0  ;;  %v1611_v21 = vmul.f32 %v1558_v26, %v1467_v39  ;;  %v7035_v40 = vadd.f32 %v802_v7, %v801_v51 }
 0x259   :  { %v7037_v42 = vadd.f32 %v808_v1, %v807_v24  ;;  %v7039_v20 = vadd.f32 %v814_v52, %v813_v53  ;;  %v852_v15 = vrot.slane %v690_v10, 4  ;;  %v820_v38 = vrot.slane %v819_v0, 1 }
 0x25a   :  { %v7041_v41 = vadd.f32 %v836_v47, %v835_v35  ;;  %v1664_v31 = vrot.slane %v1610_v9, %v8943_v44  ;;  %v1897_v33 = vsel %vm1889_vm10, %v1656_v34, 0.0  ;;  %v858_v60 = vrot.slane %v691_v4, 4 }
 0x25b   :  { %8952 = vst [vmem:[#allocation50_spill] sm:$0xff] %v7037_v42  ;;  %8953 = vst [vmem:[#allocation34_spill] sm:$0xff] %v7039_v20  ;;  %v1657_v25 = vcombine.high %v1655_v17, %v1655_v17  ;;  %v1891_v3 = vrot.slane %v1890_v62, 4  ;;  %v1468_v49 = vunpack.c.h.bf16 %v1458_v11  ;;  %v832_v55 = vrot.slane %v831_v58, 1 }
 0x25c   :  { %v841_v8 = vadd.f32 %v840_v13, %v688_v28  ;;  %v847_v51 = vadd.f32 %v846_v57, %v689_v54  ;;  %v1666_v7 = vcombine.high %v1611_v21, %v1611_v21  ;;  %v853_v24 = vadd.f32 %v852_v15, %v690_v10  ;;  %v7055_v54 = vld [vmem:[%s8856_s20 + $0xc] sm:$0x3f] }
 0x25d   :  { %v1898_v61 = vrot.slane %v1897_v33, 4  ;;  %v1904_v53 = vsel %vm1889_vm10, %v1655_v17, 0.0  ;;  %v1673_v32 = vrot.slane %v1611_v21, %v8943_v44  ;;  %v7047_v35 = vadd.f32 %v820_v38, %v819_v0  ;;  %v1501_v21 = vpop.permute.xlu0 %1500 }
 0x25e   :  { %v1665_v39 = vcombine.high %v1664_v31, %v1664_v31  ;;  %v859_v1 = vadd.f32 %v858_v60, %v691_v4  ;;  %v1892_v52 = vadd.f32 %v1891_v3, %v1890_v62  ;;  %v1911_v11 = vsel %vm1889_vm10, %v1657_v25, 0.0 }
 0x25f   :  { %8954 = vst [vmem:[#allocation35_spill] sm:$0xff] %v7047_v35  ;;  %v1612_v28 = vmul.f32 %v1558_v26, %v1468_v49  ;;  %v7057_v37 = vadd.f32 %v832_v55, %v831_v58  ;;  %v842_v46 = vrot.slane %v841_v8, 2  ;;  %v1905_v0 = vrot.slane %v1904_v53, 4 }
 0x260   :  { %v1680_v10 = vrot.slane %v1666_v7, %v8943_v44  ;;  %v848_v47 = vrot.slane %v847_v51, 2  ;;  %v854_v22 = vrot.slane %v853_v24, 2  ;;  %v1899_v9 = vadd.f32 %v1898_v61, %v1897_v33 }
 0x261   :  { %8955 = vst [vmem:[#allocation36_spill] sm:$0xff] %v7057_v37  ;;  %v1681_v34 = vcombine.high %v1673_v32, %v1673_v32  ;;  %v1912_v18 = vrot.slane %v1911_v11, 4  ;;  %v1918_v4 = vsel %vm1889_vm10, %v1664_v31, 0.0  ;;  %v1925_v26 = vsel %vm1889_vm10, %v1665_v39, 0.0 }
 0x262   :  { %v1469_v17 = vunpack.c.l.bf16 %v7055_v54  ;;  %v860_v13 = vrot.slane %v859_v1, 2  ;;  %v1893_v57 = vrot.slane %v1892_v52, 2  ;;  %v1689_v58 = vrot.slane %v1612_v28, %v8943_v44 }
 0x263   :  { %v1932_v62 = vsel %vm1889_vm10, %v1673_v32, 0.0  ;;  %v7065_v15 = vadd.f32 %v842_v46, %v841_v8  ;;  %v1906_v38 = vadd.f32 %v1905_v0, %v1904_v53  ;;  %v1682_v60 = vcombine.high %v1680_v10, %v1680_v10 }
 0x264   :  { %v1565_v33 = vrot.slane %v1501_v21, %v8935_v2  ;;  %v1900_v25 = vrot.slane %v1899_v9, 2  ;;  %v1919_v3 = vrot.slane %v1918_v4, 4  ;;  %v1926_v31 = vrot.slane %v1925_v26, 4 }
 0x265   :  { %8956 = vst [vmem:[#allocation37_spill] sm:$0xff] %v7065_v15  ;;  %v1939_v49 = vsel %vm1889_vm10, %v1681_v34, 0.0  ;;  %v1913_v55 = vadd.f32 %v1912_v18, %v1911_v11  ;;  %v1933_v7 = vrot.slane %v1932_v62, 4  ;;  %v1946_v61 = vsel %vm1889_vm10, %v1680_v10, 0.0 }
 0x266   :  { %v1613_v39 = vmul.f32 %v1565_v33, %v1469_v17  ;;  %v7070_v28 = vadd.f32 %v848_v47, %v847_v51  ;;  %v7072_v32 = vadd.f32 %v854_v22, %v853_v24  ;;  %v1894_v8 = vadd.f32 %v1893_v57, %v1892_v52 }
 0x267   :  { %v1690_v46 = vcombine.high %v1689_v58, %v1689_v58  ;;  %v7074_v53 = vadd.f32 %v860_v13, %v859_v1  ;;  %v1907_v0 = vrot.slane %v1906_v38, 2  ;;  %v1940_v21 = vrot.slane %v1939_v49, 4 }
 0x268   :  { %8957 = vst [vmem:[#allocation41_spill] sm:$0xff] %v7072_v32  ;;  %v1953_v48 = vsel %vm1889_vm10, %v1682_v60, 0.0  ;;  %v1901_v12 = vadd.f32 %v1900_v25, %v1899_v9  ;;  %v7077_v37 = vadd.f32 %v1919_v3, %v1918_v4  ;;  %v1927_v11 = vadd.f32 %v1926_v31, %v1925_v26  ;;  %v1460_v25 = vld [vmem:[%s8856_s20 + $0x12] sm:$0x3f]  ;;  %v1175_v32 = vld [vmem:[#allocation10 + $0x28] sm:$0xff] }
 0x269   :  { %v1947_v34 = vrot.slane %v1946_v61, 4  ;;  %v1914_v18 = vrot.slane %v1913_v55, 2  ;;  %v1934_v10 = vadd.f32 %v1933_v7, %v1932_v62  ;;  %v1691_v17 = vcombine.high %v1613_v39, %v1613_v39 }
 0x26a   :  { %8958 = vst [vmem:[#allocation40_spill] sm:$0xff] %v7077_v37  ;;  %v1698_v51 = vrot.slane %v1613_v39, %v8943_v44  ;;  %v1895_v24 = vrot.slane %v1894_v8, 1  ;;  %v1954_v47 = vrot.slane %v1953_v48, 4  ;;  %v1967_v52 = vsel %vm1889_vm10, %v1690_v46, 0.0 }
 0x26b   :  { %v1470_v1 = vunpack.c.h.bf16 %v7055_v54  ;;  %v1908_v9 = vadd.f32 %v1907_v0, %v1906_v38  ;;  %v1941_v4 = vadd.f32 %v1940_v21, %v1939_v49  ;;  %v1902_v57 = vrot.slane %v1901_v12, 1 }
 0x26c   :  { %v1928_v60 = vrot.slane %v1927_v11, 2  ;;  %v1948_v62 = vadd.f32 %v1947_v34, %v1946_v61  ;;  %v1935_v3 = vrot.slane %v1934_v10, 2  ;;  %v1968_v31 = vrot.slane %v1967_v52, 4  ;;  %v1508_v61 = vpop.permute.xlu0 %1507 }
 0x26d   :  { %v1705_v7 = vrot.slane %v1691_v17, %v8943_v44  ;;  %v1706_v54 = vcombine.high %v1698_v51, %v1698_v51  ;;  %v7089_v39 = vadd.f32 %v1895_v24, %v1894_v8  ;;  %v1915_v46 = vadd.f32 %v1914_v18, %v1913_v55 }
 0x26e   :  { %v1955_v13 = vadd.f32 %v1954_v47, %v1953_v48  ;;  %v1614_v38 = vmul.f32 %v1565_v33, %v1470_v1  ;;  %v1909_v49 = vrot.slane %v1908_v9, 1  ;;  %v1942_v0 = vrot.slane %v1941_v4, 2 }
 0x26f   :  { %v1960_v21 = vsel %vm1889_vm10, %v1689_v58, 0.0  ;;  %v1471_v26 = vunpack.c.l.bf16 %v1460_v25  ;;  %v1929_v34 = vadd.f32 %v1928_v60, %v1927_v11  ;;  %v1949_v22 = vrot.slane %v1948_v62, 2 }
 0x270   :  { %v1974_v37 = vsel %vm1889_vm10, %v1698_v51, 0.0  ;;  %v1572_v42 = vrot.slane %v1508_v61, %v8935_v2  ;;  %v1936_v35 = vadd.f32 %v1935_v3, %v1934_v10  ;;  %v1969_v17 = vadd.f32 %v1968_v31, %v1967_v52 }
 0x271   :  { %v1707_v5 = vcombine.high %v1705_v7, %v1705_v7  ;;  %v1981_v8 = vsel %vm1889_vm10, %v1706_v54, 0.0  ;;  %v7095_v55 = vadd.f32 %v1902_v57, %v1901_v12  ;;  %v1956_v48 = vrot.slane %v1955_v13, 2 }
 0x272   :  { %v1961_v33 = vrot.slane %v1960_v21, 4  ;;  %v7098_v18 = vrot.slane %v1614_v38, %v8943_v44  ;;  %v1943_v58 = vadd.f32 %v1942_v0, %v1941_v4  ;;  %v1975_v24 = vrot.slane %v1974_v37, 4 }
 0x273   :  { %8959 = vst [vmem:[#allocation33_spill] sm:$0xff] %v7095_v55  ;;  %v1988_v11 = vsel %vm1889_vm10, %v1705_v7, 0.0  ;;  %v1615_v47 = vmul.f32 %v1572_v42, %v1471_v26  ;;  %v7101_v51 = vadd.f32 %v1909_v49, %v1908_v9  ;;  %v1916_v1 = vrot.slane %v1915_v46, 1 }
 0x274   :  { %v1950_v10 = vadd.f32 %v1949_v22, %v1948_v62  ;;  %v1982_v52 = vrot.slane %v1981_v8, 4  ;;  %v1930_v60 = vrot.slane %v1929_v34, 1  ;;  %v1937_v3 = vrot.slane %v1936_v35, 1 }
 0x275   :  { %8960 = vst [vmem:[#allocation38_spill] sm:$0xff] %v7101_v51  ;;  %v1970_v31 = vrot.slane %v1969_v17, 2  ;;  %v1995_v12 = vsel %vm1889_vm10, %v1707_v5, 0.0  ;;  %v1957_v57 = vadd.f32 %v1956_v48, %v1955_v13  ;;  %v1715_v54 = vcombine.high %v7098_v18, %v7098_v18 }
 0x276   :  { %v1989_v38 = vrot.slane %v1988_v11, 4  ;;  %v1472_v4 = vunpack.c.h.bf16 %v1460_v25  ;;  %v1944_v0 = vrot.slane %v1943_v58, 1  ;;  %v7106_v61 = vadd.f32 %v1961_v33, %v1960_v21 }
 0x277   :  { %v1976_v26 = vadd.f32 %v1975_v24, %v1974_v37  ;;  %v1723_v9 = vrot.slane %v1615_v47, %v8943_v44  ;;  %v1951_v7 = vrot.slane %v1950_v10, 1  ;;  %v1983_v22 = vadd.f32 %v1982_v52, %v1981_v8  ;;  %v1461_v37 = vld [vmem:[%s8856_s20 + $0x18] sm:$0x3f] }
 0x278   :  { %8961 = vst [vmem:[#allocation39_spill] sm:$0xff] %v7106_v61  ;;  %v1996_v62 = vrot.slane %v1995_v12, 4  ;;  %v1716_v49 = vcombine.high %v1615_v47, %v1615_v47  ;;  %v7109_v51 = vadd.f32 %v1916_v1, %v1915_v46  ;;  %v7111_v55 = vadd.f32 %v1930_v60, %v1929_v34 }
 0x279   :  { %v1938_v5 = vadd.f32 %v1937_v3, %v1936_v35  ;;  %v1971_v13 = vadd.f32 %v1970_v31, %v1969_v17  ;;  %v1958_v48 = vrot.slane %v1957_v57, 1  ;;  %v1990_v56 = vadd.f32 %v1989_v38, %v1988_v11 }
 0x27a   :  { %8962 = vst [vmem:[#allocation51_spill] sm:$0xff] %v7109_v51  ;;  %8963 = vst [vmem:[#allocation52_spill] sm:$0xff] %v7111_v55  ;;  %v2009_v25 = vsel %vm1889_vm10, %v1715_v54, 0.0  ;;  %v1616_v43 = vmul.f32 %v1572_v42, %v1472_v4  ;;  %v7117_v21 = vadd.f32 %v1944_v0, %v1943_v58  ;;  %v1977_v33 = vrot.slane %v1976_v26, 2 }
 0x27b   :  { %v1731_v46 = vcombine.high %v1723_v9, %v1723_v9  ;;  %v7120_v24 = vadd.f32 %v1951_v7, %v1950_v10  ;;  %v1984_v34 = vrot.slane %v1983_v22, 2  ;;  %v1997_v35 = vadd.f32 %v1996_v62, %v1995_v12  ;;  %v1515_v10 = vpop.permute.xlu0 %1514 }
 0x27c   :  { %8964 = vst [vmem:[#allocation53_spill] sm:$0xff] %v7117_v21  ;;  %v1730_v17 = vrot.slane %v1716_v49, %v8943_v44  ;;  %v1972_v11 = vrot.slane %v1971_v13, 1  ;;  %v2010_v47 = vrot.slane %v2009_v25, 4  ;;  %v2016_v42 = vsel %vm1889_vm10, %v1723_v9, 0.0 }
 0x27d   :  { %8965 = vst [vmem:[#allocation54_spill] sm:$0xff] %v7120_v24  ;;  %v1473_v1 = vunpack.c.l.bf16 %v1461_v37  ;;  %v7124_v52 = vadd.f32 %v1958_v48, %v1957_v57  ;;  %v7128_v58 = vsel %vm991_vm3, %v1938_v5, %v7089_v39  ;;  %v1991_v60 = vrot.slane %v1990_v56, 2 }
 0x27e   :  { %8967 = vst [vmem:[#allocation56_spill] sm:$0xff] %v7128_v58  ;;  %v7131_v3 = vrot.slane %v1616_v43, %v8943_v44  ;;  %v1978_v31 = vadd.f32 %v1977_v33, %v1976_v26  ;;  %v2023_v12 = vsel %vm1889_vm10, %v1731_v46, 0.0  ;;  %v1474_v54 = vunpack.c.h.bf16 %v1461_v37 }
 0x27f   :  { %8966 = vst [vmem:[#allocation55_spill] sm:$0xff] %v7124_v52  ;;  %v1579_v38 = vrot.slane %v1515_v10, %v8935_v2  ;;  %v1985_v4 = vadd.f32 %v1984_v34, %v1983_v22  ;;  %v1998_v0 = vrot.slane %v1997_v35, 2  ;;  %v1732_v9 = vcombine.high %v1730_v17, %v1730_v17  ;;  %v1187_v34 = vld [vmem:[#allocation10 + $0x88] sm:$0xff] }
 0x280   :  { %v2017_v57 = vrot.slane %v2016_v42, 4  ;;  %v7135_v7 = vadd.f32 %v1972_v11, %v1971_v13  ;;  %v2011_v62 = vadd.f32 %v2010_v47, %v2009_v25  ;;  %v7139_v43 = vsel %vm1889_vm10, %v7098_v18, 0.0  ;;  %v1186_v13 = vld [vmem:[#allocation10 + $0x80] sm:$0xff] }
 0x281   :  { %v1617_v39 = vmul.f32 %v1579_v38, %v1473_v1  ;;  %v1618_v49 = vmul.f32 %v1579_v38, %v1474_v54  ;;  %8969 = vst [vmem:[#allocation58_spill] sm:$0xff] %v7139_v43  ;;  %v1740_v26 = vcombine.high %v7131_v3, %v7131_v3  ;;  %v2024_v5 = vrot.slane %v2023_v12, 4 }
 0x282   :  { %8968 = vst [vmem:[#allocation57_spill] sm:$0xff] %v7135_v7  ;;  %v2030_v48 = vsel %vm1889_vm10, %v1730_v17, 0.0  ;;  %v1979_v37 = vrot.slane %v1978_v31, 1  ;;  %v1992_v22 = vadd.f32 %v1991_v60, %v1990_v56  ;;  %v1986_v25 = vrot.slane %v1985_v4, 1 }
 0x283   :  { %v1741_v33 = vcombine.high %v1617_v39, %v1617_v39  ;;  %v1748_v46 = vrot.slane %v1617_v39, %v8943_v44  ;;  %v1999_v11 = vadd.f32 %v1998_v0, %v1997_v35  ;;  %v2018_v47 = vadd.f32 %v2017_v57, %v2016_v42  ;;  %v1218_v0 = vld [vmem:[#allocation10 + $0x180] sm:$0xff]  ;;  %v1203_v35 = vld [vmem:[#allocation10 + $0x108] sm:$0xff] }
 0x284   :  { %v2037_v1 = vsel %vm1889_vm10, %v1732_v9, 0.0  ;;  %v2012_v18 = vrot.slane %v2011_v62, 2  ;;  %v2031_v10 = vrot.slane %v2030_v48, 4  ;;  %v7148_v38 = vrot.slane %v1618_v49, %v8943_v44  ;;  %v1219_v9 = vld [vmem:[#allocation10 + $0x188] sm:$0xff] }
 0x285   :  { %v1755_v54 = vrot.slane %v1741_v33, %v8943_v44  ;;  %v2025_v17 = vadd.f32 %v2024_v5, %v2023_v12  ;;  %v2051_v56 = vsel %vm1889_vm10, %v1740_v26, 0.0  ;;  %v1756_v60 = vcombine.high %v1748_v46, %v1748_v46  ;;  %v1170_v12 = vld [vmem:[#allocation10] sm:$0xff] }
 0x286   :  { %v5473_v8 = vpack.c.bf16 %v1187_v34, %v1186_v13  ;;  %v7151_v39 = vadd.f32 %v1979_v37, %v1978_v31  ;;  %v1993_v61 = vrot.slane %v1992_v22, 1  ;;  %v2038_v42 = vrot.slane %v2037_v1, 4  ;;  %v1171_v13 = vld [vmem:[#allocation10 + $0x8] sm:$0xff]  ;;  %v1202_v34 = vld [vmem:[#allocation10 + $0x100] sm:$0xff] }
 0x287   :  { %v7154_v57 = vadd.f32 %v1986_v25, %v1985_v4  ;;  %v2000_v7 = vrot.slane %v1999_v11, 1  ;;  %v2019_v33 = vrot.slane %v2018_v47, 2  ;;  %v2058_v49 = vsel %vm1889_vm10, %v1748_v46, 0.0 }
 0x288   :  { %8970 = vst [vmem:[#allocation59_spill] sm:$0xff] %v7151_v39  ;;  %5474 = vmatprep.subr.bf16.mxu0 %v5473_v8  ;;  %v2032_v5 = vadd.f32 %v2031_v10, %v2030_v48  ;;  %v2052_v26 = vrot.slane %v2051_v56, 4  ;;  %v1765_v31 = vcombine.high %v7148_v38, %v7148_v38  ;;  %v2072_v37 = vsel %vm1889_vm10, %v1755_v54, 0.0  ;;  %v1463_v10 = vld [vmem:[%s8856_s20 + $0x24] sm:$0x3f] }
 0x289   :  { %8971 = vst [vmem:[#allocation60_spill] sm:$0xff] %v7154_v57  ;;  %v7160_v43 = vadd.f32 %v2012_v18, %v2011_v62  ;;  %v2026_v4 = vrot.slane %v2025_v17, 2  ;;  %v2065_v25 = vsel %vm1889_vm10, %v1756_v60, 0.0  ;;  %v5505_v55 = vpack.c.bf16 %v1219_v9, %v1218_v0  ;;  %v1221_v9 = vld [vmem:[#allocation10 + $0x198] sm:$0xff] }
 0x28a   :  { %v7163_v24 = vadd.f32 %v1993_v61, %v1992_v22  ;;  %v2039_v8 = vadd.f32 %v2038_v42, %v2037_v1  ;;  %v1757_v46 = vcombine.high %v1755_v54, %v1755_v54  ;;  %v2059_v48 = vrot.slane %v2058_v49, 4  ;;  %v1529_v61 = vpop.permute.xlu0 %1528  ;;  %v1188_v22 = vld [vmem:[#allocation10 + $0x90] sm:$0xff]  ;;  %v1189_v1 = vld [vmem:[#allocation10 + $0x98] sm:$0xff] }
 0x28b   :  { %v7168_v39 = vadd.f32 %v2019_v33, %v2018_v47  ;;  %v2073_v58 = vrot.slane %v2072_v37, 4  ;;  %5506 = vmatprep.subr.bf16.mxu1 %v5505_v55  ;;  %v5475_v52 = vpack.c.bf16 %v1171_v13, %v1170_v12  ;;  %v5507_v62 = vpack.c.bf16 %v1203_v35, %v1202_v34  ;;  %v1220_v55 = vld [vmem:[#allocation10 + $0x190] sm:$0xff] }
 0x28c   :  { %8972 = vst [vmem:[#allocation61_spill] sm:$0xff] %v7163_v24  ;;  %v2033_v18 = vrot.slane %v2032_v5, 2  ;;  %v2053_v51 = vadd.f32 %v2052_v26, %v2051_v56  ;;  %v2066_v57 = vrot.slane %v2065_v25, 4  ;;  %v2093_v60 = vsel %vm1889_vm10, %v1765_v31, 0.0  ;;  %v1172_v26 = vld [vmem:[#allocation10 + $0x10] sm:$0xff]  ;;  %v1173_v31 = vld [vmem:[#allocation10 + $0x18] sm:$0xff] }
 0x28d   :  { %v7171_v54 = vadd.f32 %v2000_v7, %v1999_v11  ;;  %v7174_v0 = vadd.f32 %v2026_v4, %v2025_v17  ;;  %5476 = vmatpush3.bf16.msra.mxu0 %v5475_v52  ;;  %5508 = vmatpush3.bf16.msra.mxu1 %v5507_v62  ;;  %v1477_v47 = vunpack.c.l.bf16 %v1463_v10  ;;  %v2040_v35 = vrot.slane %v2039_v8, 2  ;;  %v1204_v13 = vld [vmem:[#allocation10 + $0x110] sm:$0xff]  ;;  %v1205_v17 = vld [vmem:[#allocation10 + $0x118] sm:$0xff]  ;;  %v1190_v4 = vld [vmem:[#allocation10 + $0xa0] sm:$0xff] }
 0x28e   :  { %v2060_v33 = vadd.f32 %v2059_v48, %v2058_v49  ;;  %v2079_v56 = vsel %vm1889_vm10, %v1757_v46, 0.0  ;;  %v1478_v12 = vunpack.c.h.bf16 %v1463_v10  ;;  %v2074_v34 = vadd.f32 %v2073_v58, %v2072_v37  ;;  %v1191_v52 = vld [vmem:[#allocation10 + $0xa8] sm:$0xff]  ;;  %v1222_v48 = vld [vmem:[#allocation10 + $0x1a0] sm:$0xff] }
 0x28f   :  { %8973 = vst [vmem:[#allocation62_spill] sm:$0xff] %v7171_v54  ;;  %v2094_v7 = vrot.slane %v2093_v60, 4  ;;  %v1593_v11 = vrot.slane %v1529_v61, %v8935_v2  ;;  %v5477_v42 = vpack.c.bf16 %v1189_v1, %v1188_v22  ;;  %v2021_v62 = vrot.slane %v7168_v39, 1  ;;  %v1223_v46 = vld [vmem:[#allocation10 + $0x1a8] sm:$0xff]  ;;  %v1174_v10 = vld [vmem:[#allocation10 + $0x20] sm:$0xff] }
 0x290   :  { %v7179_v24 = vadd.f32 %v2033_v18, %v2032_v5  ;;  %v2054_v54 = vrot.slane %v2053_v51, 2  ;;  %v2067_v49 = vadd.f32 %v2066_v57, %v2065_v25  ;;  %v2080_v21 = vrot.slane %v2079_v56, 4  ;;  %v1206_v61 = vld [vmem:[#allocation10 + $0x120] sm:$0xff]  ;;  %v1207_v22 = vld [vmem:[#allocation10 + $0x128] sm:$0xff] }
 0x291   :  { %v1621_v59 = vmul.f32 %v1593_v11, %v1477_v47  ;;  %5478 = vmatprep.subr.bf16.mxu0 %v5477_v42  ;;  %v5509_v58 = vpack.c.bf16 %v1221_v9, %v1220_v55  ;;  %v5479_v37 = vpack.c.bf16 %v1173_v31, %v1172_v26  ;;  %v2028_v1 = vrot.slane %v7174_v0, 1  ;;  %v2230_v47 = vpop.xlane.xlu1 %2229  ;;  %v1192_v42 = vld [vmem:[#allocation10 + $0xb0] sm:$0xff]  ;;  %v1193_v55 = vld [vmem:[#allocation10 + $0xb8] sm:$0xff] }
 0x292   :  { %v2061_v14 = vrot.slane %v2060_v33, 2  ;;  %v1622_v23 = vmul.f32 %v1593_v11, %v1478_v12  ;;  %v5511_v63 = vpack.c.bf16 %v1205_v17, %v1204_v13  ;;  %v7182_v5 = vadd.f32 %v2040_v35, %v2039_v8  ;;  %v1225_v11 = vld [vmem:[#allocation10 + $0x1b8] sm:$0xff] }
 0x293   :  { %v2075_v18 = vrot.slane %v2074_v34, 2  ;;  %v2095_v57 = vadd.f32 %v2094_v7, %v2093_v60  ;;  %v1798_v25 = vrot.slane %v1621_v59, %v8943_v44  ;;  %5510 = vmatprep.subr.bf16.mxu1 %v5509_v58  ;;  %5480 = vmatpush3.bf16.msra.mxu0 %v5479_v37  ;;  %v5481_v9 = vpack.c.bf16 %v1191_v52, %v1190_v4  ;;  %v1177_v17 = vld [vmem:[#allocation10 + $0x38] sm:$0xff] }
 0x294   :  { %5512 = vmatpush3.bf16.msra.mxu1 %v5511_v63  ;;  %v5513_v26 = vpack.c.bf16 %v1223_v46, %v1222_v48  ;;  %v5483_v31 = vpack.c.bf16 %v1175_v32, %v1174_v10  ;;  %v5515_v15 = vpack.c.bf16 %v1207_v22, %v1206_v61  ;;  %v2055_v20 = vadd.f32 %v2054_v54, %v2053_v51  ;;  %v1224_v63 = vld [vmem:[#allocation10 + $0x1b0] sm:$0xff]  ;;  %v1209_v4 = vld [vmem:[#allocation10 + $0x138] sm:$0xff] }
 0x295   :  { %v2068_v29 = vrot.slane %v2067_v49, 2  ;;  %v2081_v12 = vadd.f32 %v2080_v21, %v2079_v56  ;;  %v1791_v13 = vcombine.high %v1621_v59, %v1621_v59  ;;  %v7187_v8 = vsel %vm1889_vm10, %v7131_v3, 0.0  ;;  %5482 = vmatprep.subr.bf16.mxu0 %v5481_v9  ;;  %v7208_v48 = vpop.permute.xlu1 %662 }
 0x296   :  { %8974 = vst [vmem:[#allocation63_spill] sm:$0xff] %v7187_v8  ;;  %v2062_v60 = vadd.f32 %v2061_v14, %v2060_v33  ;;  %v7190_v35 = vrot.slane %v1622_v23, %v8943_v44  ;;  %5514 = vmatprep.subr.bf16.mxu1 %v5513_v26  ;;  %v5485_v7 = vpack.c.bf16 %v1193_v55, %v1192_v42  ;;  %v8976_v32 = vrot.slane %v7160_v43, 1  ;;  %v1176_v14 = vld [vmem:[#allocation10 + $0x30] sm:$0xff]  ;;  %v1195_v42 = vld [vmem:[#allocation10 + $0xc8] sm:$0xff]  ;;  %v1226_v55 = vld [vmem:[#allocation10 + $0x1c0] sm:$0xff] }
 0x297   :  { %v7198_v59 = vadd.f32 %v2021_v62, %v7168_v39  ;;  %v2035_v21 = vrot.slane %v7179_v24, 1  ;;  %v2076_v3 = vadd.f32 %v2075_v18, %v2074_v34  ;;  %5484 = vmatpush3.bf16.msra.mxu0 %v5483_v31  ;;  %v7202_v23 = vadd.f32 %v2028_v1, %v7174_v0 }
 0x298   :  { %8975 = vst [vmem:[#allocation64_spill] sm:$0xff] %v7190_v35  ;;  %v7195_v51 = vadd.f32 %v8976_v32, %v7160_v43  ;;  %v2096_v54 = vrot.slane %v2095_v57, 2  ;;  %v1806_v33 = vcombine.high %v1798_v25, %v1798_v25  ;;  %v2142_v56 = vsel %vm1889_vm10, %v1798_v25, 0.0  ;;  %5516 = vmatpush3.bf16.msra.mxu1 %v5515_v15  ;;  %5486 = vmatprep.subr.bf16.mxu0 %v5485_v7  ;;  %v1208_v43 = vld [vmem:[#allocation10 + $0x130] sm:$0xff]  ;;  %v1194_v25 = vld [vmem:[#allocation10 + $0xc0] sm:$0xff]  ;;  %v1179_v7 = vld [vmem:[#allocation10 + $0x48] sm:$0xff] }
 0x299   :  { %8978 = vst [vmem:[#allocation66_spill] sm:$0xff] %v7198_v59  ;;  %v2056_v52 = vrot.slane %v2055_v20, 1  ;;  %v7205_v39 = vadd.f32 %v2068_v29, %v2067_v49  ;;  %v1805_v62 = vrot.slane %v1791_v13, %v8943_v44  ;;  %v5517_v34 = vpack.c.bf16 %v1225_v11, %v1224_v63  ;;  %v1210_v32 = vld [vmem:[#allocation10 + $0x140] sm:$0xff] }
 0x29a   :  { %8977 = vst [vmem:[#allocation65_spill] sm:$0xff] %v7195_v51  ;;  %v2063_v46 = vrot.slane %v2062_v60, 1  ;;  %v2082_v10 = vrot.slane %v2081_v12, 2  ;;  %v1815_v58 = vcombine.high %v7190_v35, %v7190_v35  ;;  %v2077_v15 = vrot.slane %v2076_v3, 1  ;;  %v1184_v51 = vld [vmem:[#allocation10 + $0x70] sm:$0xff] }
 0x29b   :  { %v2143_v37 = vrot.slane %v2142_v56, 4  ;;  %5518 = vmatprep.subr.bf16.mxu1 %v5517_v34  ;;  %v5487_v61 = vpack.c.bf16 %v1177_v17, %v1176_v14  ;;  %v5519_v22 = vpack.c.bf16 %v1209_v4, %v1208_v43  ;;  %v7214_v29 = vadd.f32 %v2035_v21, %v7179_v24  ;;  %v1227_v24 = vld [vmem:[#allocation10 + $0x1c8] sm:$0xff]  ;;  %v575_v17 = vld [vmem:[#allocation2 + $0x78] sm:$0xff]  ;;  %v1196_v34 = vld [vmem:[#allocation10 + $0xd0] sm:$0xff] }
 0x29c   :  { %v7216_v49 = vadd.f32 %v2096_v54, %v2095_v57  ;;  %v2149_v1 = vsel %vm1889_vm10, %v1806_v33, 0.0  ;;  %v2231_v18 = vadd.f32 1e-09, %v2230_v47  ;;  %v7219_v9 = vadd.f32 %v2056_v52, %v2055_v20  ;;  %v1178_v57 = vld [vmem:[#allocation10 + $0x40] sm:$0xff]  ;;  %v1211_v21 = vld [vmem:[#allocation10 + $0x148] sm:$0xff]  ;;  %v574_v33 = vld [vmem:[#allocation2 + $0x70] sm:$0xff] }
 0x29d   :  { %8979 = vst [vmem:[#allocation67_spill] sm:$0xff] %v7214_v29  ;;  %v7224_v31 = vsel %vm1889_vm10, %v7148_v38, 0.0  ;;  %v1807_v13 = vcombine.high %v1805_v62, %v1805_v62  ;;  %5488 = vmatpush3.bf16.msra.mxu0 %v5487_v61  ;;  %5520 = vmatpush3.bf16.msra.mxu1 %v5519_v22  ;;  %v7226_v63 = vadd.f32 %v2063_v46, %v2062_v60  ;;  %v2156_v11 = vsel %vm1889_vm10, %v1805_v62, 0.0  ;;  %v1462_v60 = vld [vmem:[%s8856_s20 + $0x1e] sm:$0x3f]  ;;  %v1180_v61 = vld [vmem:[#allocation10 + $0x50] sm:$0xff] }
 0x29e   :  { %8980 = vst [vmem:[#allocation68_spill] sm:$0xff] %v7216_v49  ;;  %8981 = vst [vmem:[#allocation69_spill] sm:$0xff] %v7219_v9  ;;  %v7228_v47 = vadd.f32 %v2082_v10, %v2081_v12  ;;  %v2177_v20 = vsel %vm1889_vm10, %v1815_v58, 0.0  ;;  %v7232_v14 = vadd.f32 %v2077_v15, %v2076_v3  ;;  %v7234_v38 = vadd.f32 %v2143_v37, %v2142_v56  ;;  %v1522_v12 = vpop.permute.xlu1 %1521  ;;  %v1197_v46 = vld [vmem:[#allocation10 + $0xd8] sm:$0xff]  ;;  %v1228_v3 = vld [vmem:[#allocation10 + $0x1d0] sm:$0xff] }
 0x29f   :  { %8982 = vst [vmem:[#allocation70_spill] sm:$0xff] %v7224_v31  ;;  %8983 = vst [vmem:[#allocation71_spill] sm:$0xff] %v7226_v63  ;;  %v2150_v54 = vrot.slane %v2149_v1, 4  ;;  %v5489_v43 = vpack.c.bf16 %v1195_v42, %v1194_v25  ;;  %5880 = vrcp.f32 %v2231_v18  ;;  %v5521_v52 = vpack.c.bf16 %v1227_v24, %v1226_v55  ;;  %v1229_v37 = vld [vmem:[#allocation10 + $0x1d8] sm:$0xff]  ;;  %v1212_v4 = vld [vmem:[#allocation10 + $0x150] sm:$0xff] }
 0x2a0   :  { %8984 = vst [vmem:[#allocation72_spill] sm:$0xff] %v7232_v14  ;;  %v5491_v62 = vpack.c.bf16 %v1179_v7, %v1178_v57  ;;  %v2157_v10 = vrot.slane %v2156_v11, 4  ;;  %v7241_v56 = vsel %vm1889_vm10, %v1807_v13, 0.0  ;;  %v2178_v58 = vrot.slane %v2177_v20, 4  ;;  %v1181_v22 = vld [vmem:[#allocation10 + $0x58] sm:$0xff] }
 0x2a1   :  { %5490 = vmatprep.subr.bf16.mxu0 %v5489_v43  ;;  %v5523_v15 = vpack.c.bf16 %v1211_v21, %v1210_v32  ;;  %v604_v25 = vunpack.c.l.bf16 %v574_v33  ;;  %v606_v42 = vunpack.c.l.bf16 %v575_v17  ;;  %5522 = vmatprep.subr.bf16.mxu1 %v5521_v52  ;;  %v1475_v18 = vunpack.c.l.bf16 %v1462_v60  ;;  %v1213_v43 = vld [vmem:[#allocation10 + $0x158] sm:$0xff]  ;;  %v7250_v32 = vld [vmem:[%s8856_s20 + $0x2a] sm:$0x3f] }
 0x2a2   :  { %5492 = vmatpush3.bf16.msra.mxu0 %v5491_v62  ;;  %v1476_v55 = vunpack.c.h.bf16 %v1462_v60  ;;  %v2145_v24 = vrot.slane %v7234_v38, 2  ;;  %v7244_v57 = vadd.f32 %v2150_v54, %v2149_v1  ;;  %v1586_v13 = vrot.slane %v1522_v12, %v8935_v2  ;;  %v1536_v12 = vpop.permute.xlu1 %1535  ;;  %v1233_v14 = vld [vmem:[#allocation10 + $0x1f8] sm:$0xff] }
 0x2a3   :  { %5524 = vmatpush3.bf16.msra.mxu1 %v5523_v15  ;;  %v5493_v7 = vpack.c.bf16 %v1197_v46, %v1196_v34  ;;  %v605_v21 = vunpack.c.h.bf16 %v574_v33  ;;  %v607_v52 = vunpack.c.h.bf16 %v575_v17  ;;  %v5525_v62 = vpack.c.bf16 %v1229_v37, %v1228_v3  ;;  %v1198_v34 = vld [vmem:[#allocation10 + $0xe0] sm:$0xff]  ;;  %v1199_v46 = vld [vmem:[#allocation10 + $0xe8] sm:$0xff]  ;;  %v1185_v29 = vld [vmem:[#allocation10 + $0x78] sm:$0xff] }
 0x2a4   :  { %v5495_v0 = vpack.c.bf16 %v1181_v22, %v1180_v61  ;;  %v7252_v60 = vadd.f32 %v2157_v10, %v2156_v11  ;;  %v2164_v1 = vrot.slane %v7241_v56, 4  ;;  %v1619_v54 = vmul.f32 %v1586_v13, %v1475_v18 }
 0x2a5   :  { %v1620_v15 = vmul.f32 %v1586_v13, %v1476_v55  ;;  %5494 = vmatprep.subr.bf16.mxu0 %v5493_v7  ;;  %v692_v26 = vmul.f32 %v7208_v48, %v604_v25  ;;  %v694_v35 = vmul.f32 %v7208_v48, %v606_v42  ;;  %5526 = vmatprep.subr.bf16.mxu1 %v5525_v62  ;;  %v1479_v17 = vunpack.c.l.bf16 %v7250_v32 }
 0x2a6   :  { %5496 = vmatpush3.bf16.msra.mxu0 %v5495_v0  ;;  %v5527_v33 = vpack.c.bf16 %v1213_v43, %v1212_v4  ;;  %v7258_v3 = vadd.f32 %v2178_v58, %v2177_v20  ;;  %v1766_v11 = vcombine.high %v1619_v54, %v1619_v54  ;;  %v1773_v10 = vrot.slane %v1619_v54, %v8943_v44 }
 0x2a7   :  { %v7262_v37 = vrot.slane %v1620_v15, %v8943_v44  ;;  %v693_v61 = vmul.f32 %v7208_v48, %v605_v21  ;;  %v695_v22 = vmul.f32 %v7208_v48, %v607_v52  ;;  %v1600_v25 = vrot.slane %v1536_v12, %v8935_v2 }
 0x2a8   :  { %5528 = vmatpush3.bf16.msra.mxu1 %v5527_v33  ;;  %v5497_v42 = vpack.c.bf16 %v1199_v46, %v1198_v34  ;;  %v1780_v0 = vrot.slane %v1766_v11, %v8943_v44  ;;  %v1781_v4 = vcombine.high %v1773_v10, %v1773_v10  ;;  %v2100_v58 = vsel %vm1889_vm10, %v1773_v10, 0.0 }
 0x2a9   :  { %8985 = vst [vmem:[#allocation73_spill] sm:$0xff] %v7262_v37  ;;  %v1790_v20 = vcombine.high %v7262_v37, %v7262_v37  ;;  %v5881_v18 = vpop.eup %5880  ;;  %v864_v55 = vrot.slane %v692_v26, 4  ;;  %v876_v13 = vrot.slane %v694_v35, 4  ;;  %v2101_v7 = vrot.slane %v2100_v58, 4 }
 0x2aa   :  { %v1623_v43 = vmul.f32 %v1600_v25, %v1479_v17  ;;  %5498 = vmatprep.subr.bf16.mxu0 %v5497_v42  ;;  %v7272_v48 = vadd.f32 %v2145_v24, %v7234_v38  ;;  %v1782_v21 = vcombine.high %v1780_v0, %v1780_v0  ;;  %v2107_v2 = vsel %vm1889_vm10, %v1781_v4, 0.0 }
 0x2ab   :  { %v2114_v52 = vsel %vm1889_vm10, %v1780_v0, 0.0  ;;  %v2102_v62 = vadd.f32 %v2101_v7, %v2100_v58  ;;  %v2108_v54 = vrot.slane %v2107_v2, 4  ;;  %v2135_v12 = vsel %vm1889_vm10, %v1790_v20, 0.0 }
 0x2ac   :  { %v2115_v15 = vrot.slane %v2114_v52, 4  ;;  %v870_v34 = vrot.slane %v693_v61, 4  ;;  %v882_v46 = vrot.slane %v695_v22, 4  ;;  %v2121_v33 = vsel %vm1889_vm10, %v1782_v21, 0.0 }
 0x2ad   :  { %v1480_v17 = vunpack.c.h.bf16 %v7250_v32  ;;  %v865_v38 = vadd.f32 %v864_v55, %v692_v26  ;;  %v877_v24 = vadd.f32 %v876_v13, %v694_v35  ;;  %v1816_v10 = vcombine.high %v1623_v43, %v1623_v43  ;;  %v1201_v35 = vld [vmem:[#allocation10 + $0xf8] sm:$0xff] }
 0x2ae   :  { %v2103_v42 = vrot.slane %v2102_v62, 2  ;;  %v2109_v4 = vadd.f32 %v2108_v54, %v2107_v2  ;;  %v2136_v37 = vrot.slane %v2135_v12, 4  ;;  %v1823_v0 = vrot.slane %v1623_v43, %v8943_v44 }
 0x2af   :  { %v2159_v58 = vrot.slane %v7252_v60, 2  ;;  %v7283_v20 = vadd.f32 %v2164_v1, %v7241_v56  ;;  %v2116_v7 = vadd.f32 %v2115_v15, %v2114_v52  ;;  %v2122_v31 = vrot.slane %v2121_v33, 4  ;;  %v1230_v52 = vld [vmem:[#allocation10 + $0x1e0] sm:$0xff]  ;;  %v1231_v15 = vld [vmem:[#allocation10 + $0x1e8] sm:$0xff] }
 0x2b0   :  { %v7285_v21 = vadd.f32 %v870_v34, %v693_v61  ;;  %v7287_v32 = vadd.f32 %v882_v46, %v695_v22  ;;  %v1624_v11 = vmul.f32 %v1600_v25, %v1480_v17  ;;  %v1831_v26 = vcombine.high %v1823_v0, %v1823_v0  ;;  %v1182_v46 = vld [vmem:[#allocation10 + $0x60] sm:$0xff] }
 0x2b1   :  { %v866_v55 = vrot.slane %v865_v38, 2  ;;  %v878_v13 = vrot.slane %v877_v24, 2  ;;  %v1830_v2 = vrot.slane %v1816_v10, %v8943_v44  ;;  %v7291_v43 = vadd.f32 %v2103_v42, %v2102_v62  ;;  %v5886_v62 = vld [vmem:[%s8846_s7] sm:$0xff] }
 0x2b2   :  { %v2110_v54 = vrot.slane %v2109_v4, 2  ;;  %v7293_v8 = vadd.f32 %v2136_v37, %v2135_v12  ;;  %v2184_v56 = vsel %vm1889_vm10, %v1823_v0, 0.0  ;;  %v7297_v1 = vadd.f32 %v2159_v58, %v7252_v60  ;;  %v1215_v58 = vld [vmem:[#allocation10 + $0x168] sm:$0xff] }
 0x2b3   :  { %v2117_v61 = vrot.slane %v2116_v7, 2  ;;  %v7299_v22 = vadd.f32 %v2122_v31, %v2121_v33  ;;  %v2191_v25 = vsel %vm1889_vm10, %v1831_v26, 0.0  ;;  %v7305_v34 = vmul.f32 %v5886_v62, %v5881_v18  ;;  %v1183_v31 = vld [vmem:[#allocation10 + $0x68] sm:$0xff]  ;;  %v1214_v33 = vld [vmem:[#allocation10 + $0x160] sm:$0xff]  ;;  %v1200_v26 = vld [vmem:[#allocation10 + $0xf0] sm:$0xff] }
 0x2b4   :  { %8986 = vst [vmem:[#allocation74_spill] sm:$0xff] %v7297_v1  ;;  %v872_v37 = vrot.slane %v7285_v21, 2  ;;  %v884_v12 = vrot.slane %v7287_v32, 2  ;;  %v7310_v60 = vrot.slane %v1624_v11, %v8943_v44  ;;  %v7312_v17 = vadd.f32 %v866_v55, %v865_v38  ;;  %v1232_v11 = vld [vmem:[#allocation10 + $0x1f0] sm:$0xff] }
 0x2b5   :  { %v1832_v10 = vcombine.high %v1830_v2, %v1830_v2  ;;  %v2185_v42 = vrot.slane %v2184_v56, 4  ;;  %v2192_v0 = vrot.slane %v2191_v25, 4  ;;  %v7314_v18 = vadd.f32 %v878_v13, %v877_v24  ;;  %v1216_v24 = vld [vmem:[#allocation10 + $0x170] sm:$0xff]  ;;  %v1217_v13 = vld [vmem:[#allocation10 + $0x178] sm:$0xff] }
 0x2b6   :  { %v7317_v9 = vadd.f32 %v2110_v54, %v2109_v4  ;;  %v7320_v63 = vadd.f32 %v2117_v61, %v2116_v7  ;;  %v7324_v55 = vsel %vm1889_vm10, %v1830_v2, 0.0  ;;  %v5529_v49 = vpack.c.bf16 %v1231_v15, %v1230_v52  ;;  %v8987_v38 = vld [vmem:[#allocation26_spill] sm:$0xff] }
 0x2b7   :  { %v1840_v4 = vcombine.high %v7310_v60, %v7310_v60  ;;  %v5499_v54 = vpack.c.bf16 %v1183_v31, %v1182_v46  ;;  %v5531_v62 = vpack.c.bf16 %v1215_v58, %v1214_v33  ;;  %v5501_v44 = vpack.c.bf16 %v1201_v35, %v1200_v26  ;;  %v2885_v58 = vld [vmem:[#allocation11 + $0x188] sm:$0xff] }
 0x2b8   :  { %v7328_v1 = vadd.f32 %v2185_v42, %v2184_v56  ;;  %v7330_v59 = vadd.f32 %v2192_v0, %v2191_v25  ;;  %v7333_v7 = vsel %vm1889_vm10, %v1832_v10, 0.0  ;;  %5530 = vmatprep.subr.bf16.mxu1 %v5529_v49  ;;  %v5533_v2 = vpack.c.bf16 %v1233_v14, %v1232_v11  ;;  %v2852_v10 = vld [vmem:[#allocation11 + $0x80] sm:$0xff]  ;;  %v8990_v11 = vld [vmem:[#allocation45_spill] sm:$0xff] }
 0x2b9   :  { %v2199_v61 = vrot.slane %v7324_v55, 4  ;;  %5500 = vmatpush3.bf16.msra.mxu0 %v5499_v54  ;;  %5532 = vmatpush3.bf16.msra.mxu1 %v5531_v62  ;;  %v5503_v52 = vpack.c.bf16 %v1185_v29, %v1184_v51  ;;  %v5535_v15 = vpack.c.bf16 %v1217_v13, %v1216_v24  ;;  %v2278_v46 = vrot.slane %v7305_v34, %v8987_v38  ;;  %v2884_v0 = vld [vmem:[#allocation11 + $0x180] sm:$0xff]  ;;  %v7372_v54 = vld [vmem:[#allocation11 + $0x8] sm:$0xff] }
 0x2ba   :  { %5502 = vmatprep.subr.bf16.mxu0 %v5501_v44  ;;  %5534 = vmatprep.subr.bf16.mxu1 %v5533_v2  ;;  %v8988_v35 = vrot.slane %v7024_v27, 1  ;;  %v850_v25 = vrot.slane %v7070_v28, 1  ;;  %v873_v49 = vadd.f32 %v872_v37, %v7285_v21  ;;  %v1280_v14 = vsel %vm991_vm3, %v6961_v45, %v6833_v16  ;;  %v2853_v45 = vld [vmem:[#allocation11 + $0x88] sm:$0xff]  ;;  %v7370_v13 = vld [vmem:[#allocation11] sm:$0xff]  ;;  %v8991_v2 = vld [vmem:[#allocation34_spill] sm:$0xff] }
 0x2bb   :  { %v2206_v51 = vrot.slane %v7333_v7, 4  ;;  %2280 = vbcast.lane.b32.xlu1 %v2278_v46, 256  ;;  %v1281_v29 = vsel %vm993_vm4, %v6996_v30, %v1280_v14  ;;  %v8989_v31 = vrot.slane %v7041_v41, 1  ;;  %v885_v16 = vadd.f32 %v884_v12, %v7287_v32 }
 0x2bc   :  { %v827_v56 = vadd.f32 %v8988_v35, %v7024_v27  ;;  %v862_v27 = vrot.slane %v7074_v53, 1  ;;  %v851_v42 = vadd.f32 %v850_v25, %v7070_v28  ;;  %v874_v21 = vrot.slane %v873_v49, 1  ;;  %v7380_v35 = vld [vmem:[#allocation11 + $0x100] sm:$0xff]  ;;  %v7384_v25 = vld [vmem:[#allocation11 + $0x90] sm:$0xff] }
 0x2bd   :  { %v839_v33 = vadd.f32 %v8989_v31, %v7041_v41  ;;  %v1282_v37 = vsel %vm995_vm5, %v7004_v36, %v1281_v29  ;;  %5504 = vmatpush3.bf16.msra.mxu0 %v5503_v52  ;;  %5536 = vmatpush3.bf16.msra.mxu1 %v5535_v15  ;;  %v1294_v28 = vsel %vm991_vm3, %v6969_v50, %v6841_v6  ;;  %v868_v26 = vrot.slane %v7312_v17, 1  ;;  %v8992_v15 = vld [vmem:[#allocation37_spill] sm:$0xff]  ;;  %v8994_v29 = vld [vmem:[#allocation43_spill] sm:$0xff]  ;;  %v8995_v31 = vld [vmem:[#allocation46_spill] sm:$0xff] }
 0x2be   :  { %v1283_v30 = vsel %vm997_vm6, %v7035_v40, %v1282_v37  ;;  %v863_v41 = vadd.f32 %v862_v27, %v7074_v53  ;;  %v875_v62 = vadd.f32 %v874_v21, %v873_v49  ;;  %v886_v32 = vrot.slane %v885_v16, 1  ;;  %v7392_v21 = vld [vmem:[#allocation11 + $0x190] sm:$0xff]  ;;  %v7394_v37 = vld [vmem:[#allocation11 + $0x198] sm:$0xff] }
 0x2bf   :  { %v1284_v36 = vsel %vm999_vm7, %v827_v56, %v1283_v30  ;;  %v1295_v12 = vsel %vm993_vm4, %v7000_v19, %v1294_v28  ;;  %v5537_v24 = vpack.c.bf16 %v2853_v45, %v2852_v10  ;;  %v5569_v53 = vpack.c.bf16 %v2885_v58, %v2884_v0  ;;  %v7382_v56 = vld [vmem:[#allocation11 + $0x108] sm:$0xff]  ;;  %v8996_v45 = vld [vmem:[#allocation42_spill] sm:$0xff]  ;;  %v9000_v28 = vld [vmem:[#allocation48_spill] sm:$0xff] }
 0x2c0   :  { %v1285_v44 = vsel %vm1001_vm8, %v851_v42, %v1284_v36  ;;  %v1296_v40 = vsel %vm995_vm5, %v8990_v11, %v1295_v12  ;;  %v887_v50 = vadd.f32 %v886_v32, %v885_v16  ;;  %v8993_v19 = vrot.slane %v8992_v15, 1  ;;  %v2855_v42 = vld [vmem:[#allocation11 + $0x98] sm:$0xff]  ;;  %v8997_v0 = vld [vmem:[#allocation41_spill] sm:$0xff]  ;;  %v7409_v32 = vld [vmem:[#allocation11 + $0x110] sm:$0xff] }
 0x2c1   :  { %v1286_v6 = vsel %vm1003_vm9, %v875_v62, %v1285_v44  ;;  %v1297_v52 = vsel %vm997_vm6, %v8991_v2, %v1296_v40  ;;  %5538 = vmatprep.subr.bf16.mxu0 %v5537_v24  ;;  %v869_v14 = vadd.f32 %v868_v26, %v7312_v17  ;;  %v1274_v27 = vsel %vm993_vm4, %v8995_v31, %v8994_v29  ;;  %v8999_v30 = vld [vmem:[#allocation49_spill] sm:$0xff]  ;;  %v7405_v62 = vld [vmem:[#allocation11 + $0x10] sm:$0xff]  ;;  %v7407_v36 = vld [vmem:[#allocation11 + $0x18] sm:$0xff] }
 0x2c2   :  { %v845_v46 = vadd.f32 %v8993_v19, %v8992_v15  ;;  %1369 = vmatprep.mubr.f32.mxu0 %v1286_v6  ;;  %v1298_v49 = vsel %vm999_vm7, %v839_v33, %v1297_v52  ;;  %v880_v10 = vrot.slane %v7314_v18, 1  ;;  %5570 = vmatprep.subr.bf16.mxu1 %v5569_v53  ;;  %v1275_v33 = vsel %vm995_vm5, %v8996_v45, %v1274_v27  ;;  %v9001_v12 = vld [vmem:[#allocation47_spill] sm:$0xff]  ;;  %v9002_v40 = vld [vmem:[#allocation44_spill] sm:$0xff]  ;;  %v7421_v2 = vld [vmem:[#allocation11 + $0xa8] sm:$0xff] }
 0x2c3   :  { %v1299_v16 = vsel %vm1001_vm8, %v863_v41, %v1298_v49  ;;  %v8998_v17 = vrot.slane %v8997_v0, 1  ;;  %v1288_v26 = vsel %vm993_vm4, %v9000_v28, %v8999_v30  ;;  %v1276_v44 = vsel %vm997_vm6, %v9001_v12, %v1275_v33  ;;  %v7417_v53 = vld [vmem:[#allocation11 + $0x118] sm:$0xff]  ;;  %v7419_v6 = vld [vmem:[#allocation11 + $0xa0] sm:$0xff]  ;;  %v9004_v19 = vld [vmem:[#allocation50_spill] sm:$0xff] }
 0x2c4   :  { %v1300_v41 = vsel %vm1003_vm9, %v887_v50, %v1299_v16  ;;  %v881_v11 = vadd.f32 %v880_v10, %v7314_v18  ;;  %v1289_v24 = vsel %vm995_vm5, %v9002_v40, %v1288_v26  ;;  %v9003_v52 = vld [vmem:[#allocation35_spill] sm:$0xff]  ;;  %v5539_v49 = vpack.c.bf16 %v7372_v54, %v7370_v13  ;;  %v7431_v29 = vld [vmem:[#allocation11 + $0x1a0] sm:$0xff]  ;;  %v7433_v31 = vld [vmem:[#allocation11 + $0x1a8] sm:$0xff] }
 0x2c5   :  { %v857_v58 = vadd.f32 %v8998_v17, %v8997_v0  ;;  %1439 = vmatprep.mubr.f32.mxu1 %v1300_v41  ;;  %v1277_v15 = vsel %vm999_vm7, %v9003_v52, %v1276_v44  ;;  %v1290_v50 = vsel %vm997_vm6, %v9004_v19, %v1289_v24  ;;  %v5571_v18 = vpack.c.bf16 %v7382_v56, %v7380_v35  ;;  %v7435_v27 = vld [vmem:[#allocation11 + $0x20] sm:$0xff]  ;;  %v9006_v33 = vld [vmem:[#allocation25_spill] sm:$0xff]  ;;  %v7455_v26 = vld [vmem:[#allocation11 + $0xb0] sm:$0xff] }
 0x2c6   :  { %v1278_v10 = vsel %vm1001_vm8, %v845_v46, %v1277_v15  ;;  %v9005_v16 = vld [vmem:[#allocation36_spill] sm:$0xff]  ;;  %v2285_v0 = vrot.slane %v7305_v34, %v9006_v33  ;;  %v5541_v17 = vpack.c.bf16 %v2855_v42, %v7384_v25  ;;  %v7443_v13 = vld [vmem:[#allocation11 + $0x28] sm:$0xff]  ;;  %v5573_v46 = vpack.c.bf16 %v7394_v37, %v7392_v21  ;;  %v7457_v41 = vld [vmem:[#allocation11 + $0xb8] sm:$0xff] }
 0x2c7   :  { %v1291_v45 = vsel %vm999_vm7, %v9005_v16, %v1290_v50  ;;  %v7445_v54 = vld [vmem:[#allocation11 + $0x120] sm:$0xff]  ;;  %v7447_v35 = vld [vmem:[#allocation11 + $0x128] sm:$0xff]  ;;  %v1279_v56 = vsel %vm1003_vm9, %v869_v14, %v1278_v10  ;;  %v5543_v28 = vpack.c.bf16 %v7407_v36, %v7405_v62  ;;  %v7459_v25 = vld [vmem:[#allocation11 + $0x1b0] sm:$0xff]  ;;  %v7465_v42 = vsel %vm1889_vm10, %v1840_v4, 0.0 }
 0x2c8   :  { %v1292_v30 = vsel %vm1001_vm8, %v857_v58, %v1291_v45  ;;  %1370 = vmatmul.mubr.f32.vlgmr.msra.gmra.mrb[2].mxu0 %v1279_v56  ;;  %2287 = vbcast.lane.b32.xlu1 %v2285_v0, 256  ;;  %v5575_v21 = vpack.c.bf16 %v7417_v53, %v7409_v32  ;;  %v9007_v37 = vld [vmem:[#allocation28_spill] sm:$0xff]  ;;  %v7472_v62 = vld [vmem:[#allocation11 + $0x1b8] sm:$0xff]  ;;  %v7474_v36 = vld [vmem:[#allocation11 + $0x30] sm:$0xff]  ;;  %v5545_v4 = vpack.c.bf16 %v7421_v2, %v7419_v6  ;;  %v2112_v40 = vrot.slane %v7317_v9, 1 }
 0x2c9   :  { %v1293_v14 = vsel %vm1003_vm9, %v881_v11, %v1292_v30  ;;  %v2292_v58 = vrot.slane %v7305_v34, %v9007_v37  ;;  %v7476_v12 = vld [vmem:[#allocation11 + $0x38] sm:$0xff]  ;;  %5540 = vmatpush3.bf16.msra.mxu0 %v5539_v49  ;;  %v5577_v44 = vpack.c.bf16 %v7433_v31, %v7431_v29  ;;  %v7482_v11 = vld [vmem:[#allocation11 + $0x130] sm:$0xff]  ;;  %v2194_v24 = vrot.slane %v7330_v59, 2  ;;  %v7495_v19 = vld [vmem:[#allocation11 + $0xc0] sm:$0xff] }
 0x2ca   :  { %1440 = vmatmul.mubr.f32.vlgmr.msra.gmra.mrb[2].mxu1 %v1293_v14  ;;  %v7484_v32 = vld [vmem:[#allocation11 + $0x138] sm:$0xff]  ;;  %v2187_v53 = vrot.slane %v7328_v1, 2  ;;  %5542 = vmatprep.subr.bf16.mxu0 %v5541_v17  ;;  %v5547_v52 = vpack.c.bf16 %v7443_v13, %v7435_v27  ;;  %v5579_v6 = vpack.c.bf16 %v7447_v35, %v7445_v54  ;;  %v9008_v2 = vld [vmem:[#allocation30_spill] sm:$0xff]  ;;  %v7497_v50 = vld [vmem:[#allocation11 + $0xc8] sm:$0xff]  ;;  %v5549_v49 = vpack.c.bf16 %v7457_v41, %v7455_v26 }
 0x2cb   :  { %5572 = vmatpush3.bf16.msra.mxu1 %v5571_v18  ;;  %v2299_v15 = vrot.slane %v7305_v34, %v9008_v2  ;;  %v5581_v18 = vpack.c.bf16 %v7472_v62, %v7459_v25  ;;  %v5551_v29 = vpack.c.bf16 %v7476_v12, %v7474_v36  ;;  %v7505_v31 = vld [vmem:[#allocation11 + $0x1c0] sm:$0xff]  ;;  %v7507_v27 = vld [vmem:[#allocation11 + $0x1c8] sm:$0xff]  ;;  %v2084_v10 = vrot.slane %v7228_v47, 1 }
 0x2cc   :  { %5574 = vmatprep.subr.bf16.mxu1 %v5573_v46  ;;  %2294 = vbcast.lane.b32.xlu1 %v2292_v58, 256  ;;  %v5583_v16 = vpack.c.bf16 %v7484_v32, %v7482_v11  ;;  %v9009_v45 = vrot.slane %v7205_v39, 1  ;;  %v9010_v17 = vrot.slane %v7244_v57, 2  ;;  %v2195_v54 = vadd.f32 %v2194_v24, %v7330_v59  ;;  %v9011_v35 = vld [vmem:[#allocation32_spill] sm:$0xff]  ;;  %v9012_v46 = vld [vmem:[#allocation33_spill] sm:$0xff]  ;;  %v3660_v24 = vpop.xlane.xlu0 %3659 }
 0x2cd   :  { %5544 = vmatpush3.bf16.msra.mxu0 %v5543_v28  ;;  %v2306_v56 = vrot.slane %v7305_v34, %v9011_v35  ;;  %v2113_v30 = vadd.f32 %v2112_v40, %v7317_v9  ;;  %v9013_v26 = vld [vmem:[#allocation53_spill] sm:$0xff]  ;;  %v5553_v25 = vpack.c.bf16 %v7497_v50, %v7495_v19  ;;  %v5585_v28 = vpack.c.bf16 %v7507_v27, %v7505_v31  ;;  %v2844_v27 = vld [vmem:[#allocation11 + $0x40] sm:$0xff] }
 0x2ce   :  { %v2071_v0 = vadd.f32 %v9009_v45, %v7205_v39  ;;  %v2153_v13 = vadd.f32 %v9010_v17, %v7244_v57  ;;  %v2994_v41 = vsel %vm991_vm3, %v9013_v26, %v9012_v46  ;;  %5546 = vmatprep.subr.bf16.mxu0 %v5545_v4  ;;  %v2196_v14 = vrot.slane %v2195_v54, 1  ;;  %v9014_v57 = vld [vmem:[#allocation60_spill] sm:$0xff]  ;;  %v2865_v36 = vld [vmem:[#allocation11 + $0xe8] sm:$0xff] }
 0x2cf   :  { %5576 = vmatpush3.bf16.msra.mxu1 %v5575_v21  ;;  %v2995_v59 = vsel %vm993_vm4, %v9014_v57, %v2994_v41  ;;  %v9015_v58 = vrot.slane %v7182_v5, 1  ;;  %v2085_v40 = vadd.f32 %v2084_v10, %v7228_v47  ;;  %v9016_v21 = vrot.slane %v7299_v22, 2  ;;  %v9017_v47 = vld [vmem:[#allocation51_spill] sm:$0xff]  ;;  %v2876_v17 = vld [vmem:[#allocation11 + $0x140] sm:$0xff] }
 0x2d0   :  { %v2154_v39 = vrot.slane %v2153_v13, 1  ;;  %5578 = vmatprep.subr.bf16.mxu1 %v5577_v44  ;;  %v2996_v9 = vsel %vm995_vm5, %v7202_v23, %v2995_v59  ;;  %2301 = vbcast.lane.b32.xlu1 %v2299_v15, 256  ;;  %v2197_v50 = vadd.f32 %v2196_v14, %v2195_v54  ;;  %v2166_v44 = vrot.slane %v7283_v20, 2  ;;  %v9018_v10 = vld [vmem:[#allocation55_spill] sm:$0xff]  ;;  %v9019_v54 = vld [vmem:[#allocation62_spill] sm:$0xff]  ;;  %v2896_v12 = vld [vmem:[#allocation11 + $0x1e0] sm:$0xff] }
 0x2d1   :  { %v2043_v62 = vadd.f32 %v9015_v58, %v7182_v5  ;;  %v2125_v4 = vadd.f32 %v9016_v21, %v7299_v22  ;;  %v2997_v31 = vsel %vm997_vm6, %v2071_v0, %v2996_v9  ;;  %5548 = vmatpush3.bf16.msra.mxu0 %v5547_v52  ;;  %v2207_v5 = vadd.f32 %v2206_v51, %v7333_v7  ;;  %v2845_v0 = vld [vmem:[#allocation11 + $0x48] sm:$0xff]  ;;  %v2894_v59 = vld [vmem:[#allocation11 + $0x1d0] sm:$0xff]  ;;  %v2895_v9 = vld [vmem:[#allocation11 + $0x1d8] sm:$0xff] }
 0x2d2   :  { %v2155_v19 = vadd.f32 %v2154_v39, %v2153_v13  ;;  %v2998_v23 = vsel %vm999_vm7, %v2113_v30, %v2997_v31  ;;  %v3008_v22 = vsel %vm991_vm3, %v9018_v10, %v9017_v47  ;;  %5550 = vmatprep.subr.bf16.mxu0 %v5549_v49  ;;  %v2877_v13 = vld [vmem:[#allocation11 + $0x148] sm:$0xff]  ;;  %v2167_v52 = vadd.f32 %v2166_v44, %v7283_v20  ;;  %v2863_v49 = vld [vmem:[#allocation11 + $0xd8] sm:$0xff]  ;;  %v7566_v58 = vld [vmem:[#allocation11 + $0x50] sm:$0xff] }
 0x2d3   :  { %v2126_v45 = vrot.slane %v2125_v4, 1  ;;  %5580 = vmatpush3.bf16.msra.mxu1 %v5579_v6  ;;  %v3009_v30 = vsel %vm993_vm4, %v9019_v54, %v3008_v22  ;;  %v3661_v46 = vadd.f32 1e-09, %v3660_v24  ;;  %v2208_v26 = vrot.slane %v2207_v5, 2  ;;  %v2862_v6 = vld [vmem:[#allocation11 + $0xd0] sm:$0xff]  ;;  %v2879_v24 = vld [vmem:[#allocation11 + $0x158] sm:$0xff] }
 0x2d4   :  { %v2999_v15 = vsel %vm1001_vm8, %v2155_v19, %v2998_v23  ;;  %5582 = vmatprep.subr.bf16.mxu1 %v5581_v18  ;;  %v3010_v41 = vsel %vm995_vm5, %v2043_v62, %v3009_v30  ;;  %v9020_v39 = vrot.slane %v7293_v8, 2  ;;  %v7563_v20 = vadd.f32 %v2199_v61, %v7324_v55  ;;  %2308 = vbcast.lane.b32.xlu1 %v2306_v56, 256  ;;  %v2878_v56 = vld [vmem:[#allocation11 + $0x150] sm:$0xff]  ;;  %v2864_v44 = vld [vmem:[#allocation11 + $0xe0] sm:$0xff]  ;;  %v9023_v22 = vld [vmem:[#allocation29_spill] sm:$0xff] }
 0x2d5   :  { %v3000_v7 = vsel %vm1003_vm9, %v2197_v50, %v2999_v15  ;;  %v2127_v51 = vadd.f32 %v2126_v45, %v2125_v4  ;;  %v2220_v18 = vrot.slane %v7465_v42, 4  ;;  %v2168_v57 = vrot.slane %v2167_v52, 1  ;;  %5552 = vmatpush3.bf16.msra.mxu0 %v5551_v29  ;;  %v2847_v4 = vld [vmem:[#allocation11 + $0x58] sm:$0xff]  ;;  %v7593_v10 = vld [vmem:[#allocation11 + $0x160] sm:$0xff] }
 0x2d6   :  { %v7558_v14 = vadd.f32 %v9020_v39, %v7293_v8  ;;  %3099 = vmatprep.mubr.f32.mxu0 %v3000_v7  ;;  %v9021_v62 = vrot.slane %v7291_v43, 1  ;;  %v5555_v8 = vpack.c.bf16 %v2845_v0, %v2844_v27  ;;  %v5587_v55 = vpack.c.bf16 %v2877_v13, %v2876_v17  ;;  %5554 = vmatprep.subr.bf16.mxu0 %v5553_v25  ;;  %v9022_v50 = vld [vmem:[#allocation27_spill] sm:$0xff]  ;;  %v7586_v25 = vld [vmem:[#allocation11 + $0x60] sm:$0xff]  ;;  %v2866_v17 = vld [vmem:[#allocation11 + $0xf0] sm:$0xff] }
 0x2d7   :  { %v2209_v61 = vadd.f32 %v2208_v26, %v2207_v5  ;;  %5584 = vmatpush3.bf16.msra.mxu1 %v5583_v16  ;;  %v3011_v19 = vsel %vm997_vm6, %v2085_v40, %v3010_v41  ;;  %v5557_v31 = vpack.c.bf16 %v2863_v49, %v2862_v6  ;;  %5882 = vrcp.f32 %v3661_v46  ;;  %v2897_v16 = vld [vmem:[#allocation11 + $0x1e8] sm:$0xff]  ;;  %v2867_v13 = vld [vmem:[#allocation11 + $0xf8] sm:$0xff]  ;;  %v2898_v46 = vld [vmem:[#allocation11 + $0x1f0] sm:$0xff] }
 0x2d8   :  { %v7571_v21 = vadd.f32 %v9021_v62, %v7291_v43  ;;  %v2313_v43 = vrot.slane %v7305_v34, %v9022_v50  ;;  %v2188_v29 = vadd.f32 %v2187_v53, %v7328_v1  ;;  %5586 = vmatprep.subr.bf16.mxu1 %v5585_v28  ;;  %v3012_v11 = vsel %vm999_vm7, %v2127_v51, %v3011_v19  ;;  %v2849_v40 = vld [vmem:[#allocation11 + $0x68] sm:$0xff]  ;;  %v2899_v7 = vld [vmem:[#allocation11 + $0x1f8] sm:$0xff]  ;;  %v7600_v51 = vld [vmem:[#allocation11 + $0x70] sm:$0xff] }
 0x2d9   :  { %v2210_v23 = vrot.slane %v2209_v61, 1  ;;  %v5589_v32 = vpack.c.bf16 %v2895_v9, %v2894_v59  ;;  %v2201_v27 = vrot.slane %v7563_v20, 2  ;;  %v7590_v45 = vadd.f32 %v2220_v18, %v7465_v42  ;;  %v2881_v1 = vld [vmem:[#allocation11 + $0x168] sm:$0xff]  ;;  %5556 = vmatpush3.bf16.msra.mxu0 %v5555_v8  ;;  %v9024_v6 = vld [vmem:[#allocation31_spill] sm:$0xff]  ;;  %v7606_v18 = vld [vmem:[#allocation11 + $0x170] sm:$0xff] }
 0x2da   :  { %v2169_v5 = vadd.f32 %v2168_v57, %v2167_v52  ;;  %2315 = vbcast.lane.b32.xlu1 %v2313_v43, 256  ;;  %v5559_v47 = vpack.c.bf16 %v2847_v4, %v7566_v58  ;;  %v5591_v28 = vpack.c.bf16 %v2879_v24, %v2878_v56  ;;  %v2320_v15 = vrot.slane %v7305_v34, %v9023_v22  ;;  %v2851_v39 = vld [vmem:[#allocation11 + $0x78] sm:$0xff]  ;;  %v9025_v58 = vld [vmem:[#allocation56_spill] sm:$0xff]  ;;  %v9028_v4 = vld [vmem:[#allocation54_spill] sm:$0xff] }
 0x2db   :  { %v2211_v53 = vadd.f32 %v2210_v23, %v2209_v61  ;;  %v5561_v0 = vpack.c.bf16 %v2865_v36, %v2864_v44  ;;  %v2119_v54 = vrot.slane %v7320_v63, 1  ;;  %5588 = vmatpush3.bf16.msra.mxu1 %v5587_v55  ;;  %5558 = vmatprep.subr.bf16.mxu0 %v5557_v31  ;;  %v5593_v52 = vpack.c.bf16 %v2897_v16, %v2896_v12  ;;  %v7608_v57 = vld [vmem:[#allocation11 + $0x178] sm:$0xff]  ;;  %v9027_v61 = vld [vmem:[#allocation38_spill] sm:$0xff]  ;;  %v9029_v19 = vld [vmem:[#allocation61_spill] sm:$0xff] }
 0x2dc   :  { %v3013_v42 = vsel %vm1001_vm8, %v2169_v5, %v3012_v11  ;;  %v5563_v30 = vpack.c.bf16 %v2849_v40, %v7586_v25  ;;  %5590 = vmatprep.subr.bf16.mxu1 %v5589_v32  ;;  %v5595_v41 = vpack.c.bf16 %v2881_v1, %v7593_v10  ;;  %v2327_v49 = vrot.slane %v7305_v34, %v9024_v6  ;;  %v9026_v62 = vld [vmem:[#allocation59_spill] sm:$0xff]  ;;  %v9031_v32 = vld [vmem:[#allocation66_spill] sm:$0xff]  ;;  %v2916_v5 = vld [vmem:[#allocation11 + $0x280] sm:$0xff] }
 0x2dd   :  { %v3014_v26 = vsel %vm1003_vm9, %v2211_v53, %v3013_v42  ;;  %v2189_v59 = vrot.slane %v2188_v29, 1  ;;  %v2180_v9 = vrot.slane %v7258_v3, 2  ;;  %v2988_v8 = vsel %vm993_vm4, %v9026_v62, %v9025_v58  ;;  %5560 = vmatpush3.bf16.msra.mxu0 %v5559_v47  ;;  %v9032_v40 = vld [vmem:[#allocation74_spill] sm:$0xff]  ;;  %v2917_v47 = vld [vmem:[#allocation11 + $0x288] sm:$0xff]  ;;  %v9033_v53 = vld [vmem:[#allocation67_spill] sm:$0xff] }
 0x2de   :  { %3169 = vmatprep.mubr.f32.mxu1 %v3014_v26  ;;  %2322 = vbcast.lane.b32.xlu1 %v2320_v15, 256  ;;  %v2202_v55 = vadd.f32 %v2201_v27, %v7563_v20  ;;  %v3001_v34 = vsel %vm991_vm3, %v9028_v4, %v9027_v61  ;;  %v5565_v56 = vpack.c.bf16 %v2867_v13, %v2866_v17  ;;  %v2140_v31 = vrot.slane %v7558_v14, 1  ;;  %v9036_v42 = vld [vmem:[#allocation52_spill] sm:$0xff]  ;;  %v2901_v26 = vld [vmem:[#allocation11 + $0x208] sm:$0xff]  ;;  %v2918_v58 = vld [vmem:[#allocation11 + $0x290] sm:$0xff] }
 0x2df   :  { %v5597_v24 = vpack.c.bf16 %v2899_v7, %v2898_v46  ;;  %v3002_v43 = vsel %vm993_vm4, %v9029_v19, %v3001_v34  ;;  %5592 = vmatpush3.bf16.msra.mxu1 %v5591_v28  ;;  %5562 = vmatprep.subr.bf16.mxu0 %v5561_v0  ;;  %v5567_v44 = vpack.c.bf16 %v2851_v39, %v7600_v51  ;;  %v9030_v20 = vrot.slane %v7272_v48, 1  ;;  %v9038_v7 = vld [vmem:[#allocation71_spill] sm:$0xff]  ;;  %v2900_v51 = vld [vmem:[#allocation11 + $0x200] sm:$0xff]  ;;  %v9039_v39 = vld [vmem:[#allocation65_spill] sm:$0xff] }
 0x2e0   :  { %v5599_v36 = vpack.c.bf16 %v7608_v57, %v7606_v18  ;;  %v2222_v23 = vrot.slane %v7590_v45, 2  ;;  %5594 = vmatprep.subr.bf16.mxu1 %v5593_v52  ;;  %v2190_v11 = vadd.f32 %v2189_v59, %v2188_v29  ;;  %v2989_v16 = vsel %vm995_vm5, %v9031_v32, %v2988_v8  ;;  %v9037_v52 = vld [vmem:[#allocation57_spill] sm:$0xff]  ;;  %v2919_v62 = vld [vmem:[#allocation11 + $0x298] sm:$0xff]  ;;  %v2902_v32 = vld [vmem:[#allocation11 + $0x210] sm:$0xff] }
 0x2e1   :  { %v2148_v12 = vadd.f32 %v9030_v20, %v7272_v48  ;;  %v2120_v25 = vadd.f32 %v2119_v54, %v7320_v63  ;;  %v2161_v27 = vrot.slane %v9032_v40, 1  ;;  %v5883_v10 = vpop.eup %5882  ;;  %v2203_v1 = vrot.slane %v2202_v55, 1  ;;  %v9034_v48 = vld [vmem:[#allocation68_spill] sm:$0xff]  ;;  %5564 = vmatpush3.bf16.msra.mxu0 %v5563_v30 }
 0x2e2   :  { %2329 = vbcast.lane.b32.xlu1 %v2327_v49, 256  ;;  %v3003_v28 = vsel %vm995_vm5, %v9033_v53, %v3002_v43  ;;  %v9035_v15 = vrot.slane %v9034_v48, 1  ;;  %v2181_v29 = vadd.f32 %v2180_v9, %v7258_v3  ;;  %v5887_v63 = vld [vmem:[%s8847_s8] sm:$0xff]  ;;  %v2141_v13 = vadd.f32 %v2140_v31, %v7558_v14  ;;  %5566 = vmatprep.subr.bf16.mxu0 %v5565_v56  ;;  %v9042_v43 = vld [vmem:[#allocation63_spill] sm:$0xff] }
 0x2e3   :  { %v7641_v17 = vmul.f32 %v5887_v63, %v5883_v10  ;;  %v2223_v54 = vadd.f32 %v2222_v23, %v7590_v45  ;;  %v3022_v46 = vsel %vm991_vm3, %v9037_v52, %v9036_v42  ;;  %5596 = vmatpush3.bf16.msra.mxu1 %v5595_v41  ;;  %v2990_v3 = vsel %vm997_vm6, %v9038_v7, %v2989_v16  ;;  %v9040_v45 = vld [vmem:[#allocation72_spill] sm:$0xff]  ;;  %v9041_v41 = vld [vmem:[#allocation69_spill] sm:$0xff]  ;;  %v2903_v16 = vld [vmem:[#allocation11 + $0x218] sm:$0xff] }
 0x2e4   :  { %v2099_v0 = vadd.f32 %v9035_v15, %v9034_v48  ;;  %v5601_v30 = vpack.c.bf16 %v2917_v47, %v2916_v5  ;;  %v2182_v49 = vrot.slane %v2181_v29, 1  ;;  %v3023_v18 = vsel %vm993_vm4, %v9039_v39, %v3022_v46  ;;  %5598 = vmatprep.subr.bf16.mxu1 %v5597_v24  ;;  %v2920_v10 = vld [vmem:[#allocation11 + $0x2a0] sm:$0xff]  ;;  %v2905_v46 = vld [vmem:[#allocation11 + $0x228] sm:$0xff] }
 0x2e5   :  { %v2991_v14 = vsel %vm999_vm7, %v7571_v21, %v2990_v3  ;;  %v3004_v57 = vsel %vm997_vm6, %v9040_v45, %v3003_v28  ;;  %v2224_v59 = vrot.slane %v2223_v54, 1  ;;  %v3024_v9 = vsel %vm995_vm5, %v9041_v41, %v3023_v18  ;;  %5568 = vmatpush3.bf16.msra.mxu0 %v5567_v44  ;;  %v9046_v28 = vld [vmem:[#allocation73_spill] sm:$0xff]  ;;  %v2904_v52 = vld [vmem:[#allocation11 + $0x220] sm:$0xff] }
 0x2e6   :  { %v2162_v8 = vadd.f32 %v2161_v27, %v9032_v40  ;;  %v2204_v61 = vadd.f32 %v2203_v1, %v2202_v55  ;;  %v3005_v4 = vsel %vm999_vm7, %v2120_v25, %v3004_v57  ;;  %v3025_v34 = vsel %vm997_vm6, %v2099_v0, %v3024_v9  ;;  %5602 = vmatprep.subr.bf16.mxu0 %v5601_v30  ;;  %v3996_v25 = vpop.xlane.xlu0 %3995  ;;  %v9043_v40 = vld [vmem:[#allocation58_spill] sm:$0xff]  ;;  %v2921_v1 = vld [vmem:[#allocation11 + $0x2a8] sm:$0xff]  ;;  %v9051_v9 = vld [vmem:[#allocation64_spill] sm:$0xff] }
 0x2e7   :  { %v5603_v56 = vpack.c.bf16 %v2901_v26, %v2900_v51  ;;  %v2225_v24 = vadd.f32 %v2224_v59, %v2223_v54  ;;  %v3026_v21 = vsel %vm999_vm7, %v2141_v13, %v3025_v34  ;;  %v3716_v19 = vrot.slane %v7641_v17, %v8987_v38  ;;  %5600 = vmatpush3.bf16.msra.mxu1 %v5599_v36  ;;  %v2922_v30 = vld [vmem:[#allocation11 + $0x2b0] sm:$0xff]  ;;  %v2923_v51 = vld [vmem:[#allocation11 + $0x2b8] sm:$0xff] }
 0x2e8   :  { %v2045_v31 = vrot.slane %v9042_v43, 4  ;;  %v2992_v20 = vsel %vm1001_vm8, %v2148_v12, %v2991_v14  ;;  %v2183_v23 = vadd.f32 %v2182_v49, %v2181_v29  ;;  %v5605_v55 = vpack.c.bf16 %v2919_v62, %v2918_v58  ;;  %v9045_v12 = vld [vmem:[#allocation70_spill] sm:$0xff]  ;;  %v9047_v49 = vld [vmem:[#allocation40_spill] sm:$0xff]  ;;  %v9049_v14 = vld [vmem:[#allocation39_spill] sm:$0xff] }
 0x2e9   :  { %v9044_v44 = vrot.slane %v9043_v40, 4  ;;  %v2993_v5 = vsel %vm1003_vm9, %v2190_v11, %v2992_v20  ;;  %v3006_v47 = vsel %vm1001_vm8, %v2162_v8, %v3005_v4  ;;  %3718 = vbcast.lane.b32.xlu1 %v3716_v19, 256  ;;  %v3730_v36 = vrot.slane %v7641_v17, %v9007_v37  ;;  %v2906_v4 = vld [vmem:[#allocation11 + $0x230] sm:$0xff]  ;;  %v2907_v34 = vld [vmem:[#allocation11 + $0x238] sm:$0xff]  ;;  %v2924_v19 = vld [vmem:[#allocation11 + $0x2c0] sm:$0xff] }
 0x2ea   :  { %v2087_v53 = vrot.slane %v9045_v12, 4  ;;  %v2128_v48 = vsel %vm1889_vm10, %v9046_v28, 0.0  ;;  %3100 = vmatmul.mubr.f32.vlgmr.msra.gmra.mrb[4].mxu0 %v2993_v5  ;;  %v3007_v15 = vsel %vm1003_vm9, %v2204_v61, %v3006_v47  ;;  %v3027_v0 = vsel %vm1001_vm8, %v2183_v23, %v3026_v21 }
 0x2eb   :  { %v2004_v27 = vadd.f32 %v9044_v44, %v9043_v40  ;;  %3170 = vmatmul.mubr.f32.vlgmr.msra.gmra.mrb[4].mxu1 %v3007_v15  ;;  %5604 = vmatpush3.bf16.msra.mxu0 %v5603_v56  ;;  %v3028_v11 = vsel %vm1003_vm9, %v2225_v24, %v3027_v0  ;;  %v5607_v29 = vpack.c.bf16 %v2903_v16, %v2902_v32  ;;  %v3997_v13 = vadd.f32 1e-09, %v3996_v25  ;;  %v2908_v40 = vld [vmem:[#allocation11 + $0x240] sm:$0xff]  ;;  %v2909_v44 = vld [vmem:[#allocation11 + $0x248] sm:$0xff] }
 0x2ec   :  { %v3723_v63 = vrot.slane %v7641_v17, %v9006_v33  ;;  %v2046_v54 = vadd.f32 %v2045_v31, %v9042_v43  ;;  %3239 = vmatprep.mubr.f32.mxu0 %v3028_v11  ;;  %5606 = vmatprep.subr.bf16.mxu0 %v5605_v55  ;;  %v5609_v42 = vpack.c.bf16 %v2921_v1, %v2920_v10  ;;  %v2129_v3 = vrot.slane %v2128_v48, 4  ;;  %v2925_v43 = vld [vmem:[#allocation11 + $0x2c8] sm:$0xff]  ;;  %v2926_v10 = vld [vmem:[#allocation11 + $0x2d0] sm:$0xff]  ;;  %v2927_v1 = vld [vmem:[#allocation11 + $0x2d8] sm:$0xff] }
 0x2ed   :  { %v2005_v7 = vrot.slane %v2004_v27, 2  ;;  %3732 = vbcast.lane.b32.xlu1 %v3730_v36, 256  ;;  %v3737_v26 = vrot.slane %v7641_v17, %v9008_v2  ;;  %5884 = vrcp.f32 %v3997_v13  ;;  %v9048_v39 = vrot.slane %v9047_v49, 2  ;;  %v3262_v15 = vld [vmem:[#allocation13 + $0x88] sm:$0xff]  ;;  %v3245_v0 = vld [vmem:[#allocation13] sm:$0xff] }
 0x2ee   :  { %3725 = vbcast.lane.b32.xlu0 %v3723_v63, 256  ;;  %v9050_v45 = vrot.slane %v9049_v14, 2  ;;  %v2212_v59 = vsel %vm1889_vm10, %v7310_v60, 0.0  ;;  %v2088_v41 = vadd.f32 %v2087_v53, %v9045_v12  ;;  %v2170_v58 = vsel %vm1889_vm10, %v9051_v9, 0.0 }
 0x2ef   :  { %v1922_v18 = vadd.f32 %v9048_v39, %v9047_v49  ;;  %5608 = vmatpush3.bf16.msra.mxu0 %v5607_v29  ;;  %v5611_v62 = vpack.c.bf16 %v2905_v46, %v2904_v52  ;;  %v2047_v8 = vrot.slane %v2046_v54, 2  ;;  %v5613_v61 = vpack.c.bf16 %v2923_v51, %v2922_v30  ;;  %v2910_v46 = vld [vmem:[#allocation11 + $0x250] sm:$0xff] }
 0x2f0   :  { %v1964_v57 = vadd.f32 %v9050_v45, %v9049_v14  ;;  %5610 = vmatprep.subr.bf16.mxu0 %v5609_v42  ;;  %v2006_v56 = vadd.f32 %v2005_v7, %v2004_v27  ;;  %v2130_v24 = vadd.f32 %v2129_v3, %v2128_v48  ;;  %v2213_v21 = vrot.slane %v2212_v59, 4  ;;  %v3261_v48 = vld [vmem:[#allocation13 + $0x80] sm:$0xff]  ;;  %v2911_v7 = vld [vmem:[#allocation11 + $0x258] sm:$0xff]  ;;  %v2929_v14 = vld [vmem:[#allocation11 + $0x2e8] sm:$0xff] }
 0x2f1   :  { %3739 = vbcast.lane.b32.xlu1 %v3737_v26, 256  ;;  %v3744_v60 = vrot.slane %v7641_v17, %v9011_v35  ;;  %v1923_v31 = vrot.slane %v1922_v18, 1  ;;  %v2171_v23 = vrot.slane %v2170_v58, 4  ;;  %v2089_v55 = vrot.slane %v2088_v41, 2  ;;  %v5888_v3 = vld [vmem:[%s8705_s11] sm:$0xff] }
 0x2f2   :  { %v1965_v20 = vrot.slane %v1964_v57, 1  ;;  %v5615_v32 = vpack.c.bf16 %v2907_v34, %v2906_v4  ;;  %v2048_v16 = vadd.f32 %v2047_v8, %v2046_v54  ;;  %v5617_v25 = vpack.c.bf16 %v2925_v43, %v2924_v19  ;;  %v3246_v54 = vld [vmem:[#allocation13 + $0x8] sm:$0xff]  ;;  %v2930_v34 = vld [vmem:[#allocation11 + $0x2f0] sm:$0xff] }
 0x2f3   :  { %5612 = vmatpush3.bf16.msra.mxu0 %v5611_v62  ;;  %v2007_v27 = vrot.slane %v2006_v56, 1  ;;  %v2131_v5 = vrot.slane %v2130_v24, 2  ;;  %v2214_v47 = vadd.f32 %v2213_v21, %v2212_v59  ;;  %v3751_v36 = vrot.slane %v7641_v17, %v9022_v50  ;;  %v2912_v62 = vld [vmem:[#allocation11 + $0x260] sm:$0xff]  ;;  %v2913_v4 = vld [vmem:[#allocation11 + $0x268] sm:$0xff] }
 0x2f4   :  { %5614 = vmatprep.subr.bf16.mxu0 %v5613_v61  ;;  %v1924_v12 = vadd.f32 %v1923_v31, %v1922_v18  ;;  %v1966_v53 = vadd.f32 %v1965_v20, %v1964_v57  ;;  %v2172_v28 = vadd.f32 %v2171_v23, %v2170_v58  ;;  %v2090_v29 = vadd.f32 %v2089_v55, %v2088_v41  ;;  %v2928_v18 = vld [vmem:[#allocation11 + $0x2e0] sm:$0xff]  ;;  %v3263_v31 = vld [vmem:[#allocation13 + $0x90] sm:$0xff]  ;;  %v3264_v20 = vld [vmem:[#allocation13 + $0x98] sm:$0xff] }
 0x2f5   :  { %3746 = vbcast.lane.b32.xlu1 %v3744_v60, 256  ;;  %v5619_v63 = vpack.c.bf16 %v2909_v44, %v2908_v40  ;;  %v5633_v13 = vpack.c.bf16 %v3262_v15, %v3261_v48  ;;  %v2049_v42 = vrot.slane %v2048_v16, 1  ;;  %v5621_v52 = vpack.c.bf16 %v2927_v1, %v2926_v10  ;;  %v3248_v40 = vld [vmem:[#allocation13 + $0x18] sm:$0xff]  ;;  %v3266_v48 = vld [vmem:[#allocation13 + $0xa8] sm:$0xff] }
 0x2f6   :  { %v5635_v51 = vpack.c.bf16 %v3246_v54, %v3245_v0  ;;  %v2008_v26 = vadd.f32 %v2007_v27, %v2006_v56  ;;  %v2132_v49 = vadd.f32 %v2131_v5, %v2130_v24  ;;  %v2215_v39 = vrot.slane %v2214_v47, 2  ;;  %v2931_v56 = vld [vmem:[#allocation11 + $0x2f8] sm:$0xff]  ;;  %v3278_v54 = vld [vmem:[#allocation13 + $0x108] sm:$0xff] }
 0x2f7   :  { %v5885_v11 = vpop.eup %5884  ;;  %5616 = vmatpush3.bf16.msra.mxu0 %v5615_v32  ;;  %v3758_v45 = vrot.slane %v7641_v17, %v9023_v22  ;;  %5634 = vmatprep.subr.bf16.mxu1 %v5633_v13  ;;  %v3015_v57 = vsel %vm991_vm3, %v1966_v53, %v1924_v12  ;;  %v2173_v59 = vrot.slane %v2172_v28, 2  ;;  %v2091_v9 = vrot.slane %v2090_v29, 1  ;;  %v2915_v44 = vld [vmem:[#allocation11 + $0x278] sm:$0xff]  ;;  %v3294_v12 = vld [vmem:[#allocation13 + $0x188] sm:$0xff]  ;;  %v3277_v13 = vld [vmem:[#allocation13 + $0x100] sm:$0xff] }
 0x2f8   :  { %5618 = vmatprep.subr.bf16.mxu0 %v5617_v25  ;;  %v7702_v30 = vmul.f32 %v5888_v3, %v5885_v11  ;;  %5636 = vmatpush3.bf16.msra.mxu1 %v5635_v51  ;;  %v5623_v58 = vpack.c.bf16 %v2911_v7, %v2910_v46  ;;  %v2050_v8 = vadd.f32 %v2049_v42, %v2048_v16  ;;  %v2133_v21 = vrot.slane %v2132_v49, 1  ;;  %v3247_v25 = vld [vmem:[#allocation13 + $0x10] sm:$0xff]  ;;  %v3296_v51 = vld [vmem:[#allocation13 + $0x198] sm:$0xff] }
 0x2f9   :  { %3753 = vbcast.lane.b32.xlu1 %v3751_v36, 256  ;;  %v5625_v61 = vpack.c.bf16 %v2929_v14, %v2928_v18  ;;  %v2216_v19 = vadd.f32 %v2215_v39, %v2214_v47  ;;  %v3016_v43 = vsel %vm993_vm4, %v2008_v26, %v3015_v57  ;;  %v2174_v60 = vadd.f32 %v2173_v59, %v2172_v28  ;;  %v3293_v36 = vld [vmem:[#allocation13 + $0x180] sm:$0xff]  ;;  %v3295_v3 = vld [vmem:[#allocation13 + $0x190] sm:$0xff]  ;;  %v3268_v39 = vld [vmem:[#allocation13 + $0xb8] sm:$0xff] }
 0x2fa   :  { %v4052_v41 = vrot.slane %v7702_v30, %v8987_v38  ;;  %v4066_v24 = vrot.slane %v7702_v30, %v9007_v37  ;;  %v3765_v38 = vrot.slane %v7641_v17, %v9024_v6  ;;  %v2092_v23 = vadd.f32 %v2091_v9, %v2090_v29  ;;  %v2914_v37 = vld [vmem:[#allocation11 + $0x270] sm:$0xff]  ;;  %v3265_v28 = vld [vmem:[#allocation13 + $0xa0] sm:$0xff]  ;;  %v3250_v29 = vld [vmem:[#allocation13 + $0x28] sm:$0xff] }
 0x2fb   :  { %5620 = vmatpush3.bf16.msra.mxu0 %v5619_v63  ;;  %v5627_v55 = vpack.c.bf16 %v2913_v4, %v2912_v62  ;;  %v5629_v32 = vpack.c.bf16 %v2931_v56, %v2930_v34  ;;  %v5637_v16 = vpack.c.bf16 %v3264_v20, %v3263_v31  ;;  %v3017_v27 = vsel %vm995_vm5, %v2050_v8, %v3016_v43  ;;  %v3251_v14 = vld [vmem:[#allocation13 + $0x30] sm:$0xff]  ;;  %v3280_v9 = vld [vmem:[#allocation13 + $0x118] sm:$0xff]  ;;  %v3297_v8 = vld [vmem:[#allocation13 + $0x1a0] sm:$0xff] }
 0x2fc   :  { %5622 = vmatprep.subr.bf16.mxu0 %v5621_v52  ;;  %4054 = vbcast.lane.b32.xlu0 %v4052_v41, 256  ;;  %v4080_v5 = vrot.slane %v7702_v30, %v9011_v35  ;;  %v5639_v17 = vpack.c.bf16 %v3248_v40, %v3247_v25  ;;  %v2134_v47 = vadd.f32 %v2133_v21, %v2132_v49  ;;  %v2217_v10 = vrot.slane %v2216_v19, 1  ;;  %v3249_v35 = vld [vmem:[#allocation13 + $0x20] sm:$0xff]  ;;  %v3267_v49 = vld [vmem:[#allocation13 + $0xb0] sm:$0xff]  ;;  %v3270_v34 = vld [vmem:[#allocation13 + $0xc8] sm:$0xff] }
 0x2fd   :  { %3760 = vbcast.lane.b32.xlu1 %v3758_v45, 256  ;;  %v4059_v1 = vrot.slane %v7702_v30, %v9006_v33  ;;  %5638 = vmatprep.subr.bf16.mxu1 %v5637_v16  ;;  %v2175_v53 = vrot.slane %v2174_v60, 1  ;;  %v5631_v15 = vpack.c.bf16 %v2915_v44, %v2914_v37  ;;  %v3018_v0 = vsel %vm997_vm6, %v2092_v23, %v3017_v27  ;;  %v3252_v45 = vld [vmem:[#allocation13 + $0x38] sm:$0xff]  ;;  %v3279_v41 = vld [vmem:[#allocation13 + $0x110] sm:$0xff]  ;;  %v3269_v4 = vld [vmem:[#allocation13 + $0xc0] sm:$0xff] }
 0x2fe   :  { %5640 = vmatpush3.bf16.msra.mxu1 %v5639_v17  ;;  %v5641_v11 = vpack.c.bf16 %v3266_v48, %v3265_v28  ;;  %v4094_v63 = vrot.slane %v7702_v30, %v9023_v22  ;;  %v5665_v33 = vpack.c.bf16 %v3294_v12, %v3293_v36  ;;  %v5643_v42 = vpack.c.bf16 %v3250_v29, %v3249_v35  ;;  %v3253_v21 = vld [vmem:[#allocation13 + $0x40] sm:$0xff]  ;;  %v3299_v20 = vld [vmem:[#allocation13 + $0x1b0] sm:$0xff]  ;;  %v3300_v23 = vld [vmem:[#allocation13 + $0x1b8] sm:$0xff] }
 0x2ff   :  { %5624 = vmatpush3.bf16.msra.mxu0 %v5623_v58  ;;  %v2218_v52 = vadd.f32 %v2217_v10, %v2216_v19  ;;  %v3019_v46 = vsel %vm999_vm7, %v2134_v47, %v3018_v0  ;;  %v4073_v7 = vrot.slane %v7702_v30, %v9008_v2  ;;  %v2176_v26 = vadd.f32 %v2175_v53, %v2174_v60  ;;  %v3254_v19 = vld [vmem:[#allocation13 + $0x48] sm:$0xff]  ;;  %v3283_v25 = vld [vmem:[#allocation13 + $0x130] sm:$0xff]  ;;  %v3256_v27 = vld [vmem:[#allocation13 + $0x58] sm:$0xff] }
 0x300   :  { %5626 = vmatprep.subr.bf16.mxu0 %v5625_v61  ;;  %4068 = vbcast.lane.b32.xlu0 %v4066_v24, 256  ;;  %v5667_v22 = vpack.c.bf16 %v3278_v54, %v3277_v13  ;;  %v5645_v18 = vpack.c.bf16 %v3268_v39, %v3267_v49  ;;  %v5669_v59 = vpack.c.bf16 %v3296_v51, %v3295_v3  ;;  %v3298_v61 = vld [vmem:[#allocation13 + $0x1a8] sm:$0xff]  ;;  %v3255_v44 = vld [vmem:[#allocation13 + $0x50] sm:$0xff]  ;;  %v3284_v17 = vld [vmem:[#allocation13 + $0x138] sm:$0xff] }
 0x301   :  { %3767 = vbcast.lane.b32.xlu1 %v3765_v38, 256  ;;  %5642 = vmatprep.subr.bf16.mxu1 %v5641_v11  ;;  %v3020_v57 = vsel %vm1001_vm8, %v2176_v26, %v3019_v46  ;;  %v5647_v2 = vpack.c.bf16 %v3252_v45, %v3251_v14  ;;  %v4087_v62 = vrot.slane %v7702_v30, %v9022_v50  ;;  %v3281_v38 = vld [vmem:[#allocation13 + $0x120] sm:$0xff]  ;;  %v3282_v60 = vld [vmem:[#allocation13 + $0x128] sm:$0xff]  ;;  %v3276_v46 = vld [vmem:[#allocation13 + $0xf8] sm:$0xff] }
 0x302   :  { %5644 = vmatpush3.bf16.msra.mxu1 %v5643_v42  ;;  %v3021_v58 = vsel %vm1003_vm9, %v2218_v52, %v3020_v57  ;;  %v5671_v56 = vpack.c.bf16 %v3280_v9, %v3279_v41  ;;  %v5649_v24 = vpack.c.bf16 %v3270_v34, %v3269_v4  ;;  %v5673_v43 = vpack.c.bf16 %v3298_v61, %v3297_v8  ;;  %v3301_v47 = vld [vmem:[#allocation13 + $0x1c0] sm:$0xff]  ;;  %v3274_v28 = vld [vmem:[#allocation13 + $0xe8] sm:$0xff]  ;;  %v3275_v52 = vld [vmem:[#allocation13 + $0xf0] sm:$0xff] }
 0x303   :  { %5628 = vmatpush3.bf16.msra.mxu0 %v5627_v55  ;;  %5646 = vmatprep.subr.bf16.mxu1 %v5645_v18  ;;  %v5651_v31 = vpack.c.bf16 %v3254_v19, %v3253_v21  ;;  %v4101_v50 = vrot.slane %v7702_v30, %v9024_v6  ;;  %v3271_v55 = vld [vmem:[#allocation13 + $0xd0] sm:$0xff]  ;;  %v5675_v16 = vpack.c.bf16 %v3282_v60, %v3281_v38  ;;  %v4911_v6 = vld [vmem:[%s8707_s13] ss:$0 sm:$0xff]  ;;  %v3258_v11 = vld [vmem:[#allocation13 + $0x68] sm:$0xff]  ;;  %v6127_v60 = vmov 839922192  }
 0x304   :  { %5630 = vmatprep.subr.bf16.mxu0 %v5629_v32  ;;  %4082 = vbcast.lane.b32.xlu0 %v4080_v5, 256  ;;  %v3272_v32 = vld [vmem:[#allocation13 + $0xd8] sm:$0xff]  ;;  %v5677_v5 = vpack.c.bf16 %v3300_v23, %v3299_v20  ;;  %v5655_v10 = vpack.c.bf16 %v3256_v27, %v3255_v44  ;;  %v3273_v53 = vld [vmem:[#allocation13 + $0xe0] sm:$0xff]  ;;  %v5679_v35 = vpack.c.bf16 %v3284_v17, %v3283_v25  ;;  %v3303_v51 = vld [vmem:[#allocation13 + $0x1d0] sm:$0xff] }
 0x305   :  { %4061 = vbcast.lane.b32.xlu1 %v4059_v1, 256  ;;  %v5653_v37 = vpack.c.bf16 %v3272_v32, %v3271_v55  ;;  %v3302_v1 = vld [vmem:[#allocation13 + $0x1c8] sm:$0xff]  ;;  %v3257_v0 = vld [vmem:[#allocation13 + $0x60] sm:$0xff]  ;;  %v3304_v26 = vld [vmem:[#allocation13 + $0x1d8] sm:$0xff]  ;;  %v5661_v49 = vpack.c.bf16 %v3276_v46, %v3275_v52 }
 0x306   :  { %5648 = vmatpush3.bf16.msra.mxu1 %v5647_v2  ;;  %v3285_v29 = vld [vmem:[#allocation13 + $0x140] sm:$0xff]  ;;  %v5659_v54 = vpack.c.bf16 %v3258_v11, %v3257_v0  ;;  %v5681_v42 = vpack.c.bf16 %v3302_v1, %v3301_v47  ;;  %v3260_v39 = vld [vmem:[#allocation13 + $0x78] sm:$0xff]  ;;  %v5685_v14 = vpack.c.bf16 %v3304_v26, %v3303_v51  ;;  %v3287_v45 = vld [vmem:[#allocation13 + $0x150] sm:$0xff] }
 0x307   :  { %5632 = vmatpush3.bf16.msra.mxu0 %v5631_v15  ;;  %5650 = vmatprep.subr.bf16.mxu1 %v5649_v24  ;;  %v5657_v15 = vpack.c.bf16 %v3274_v28, %v3273_v53  ;;  %v3288_v57 = vld [vmem:[#allocation13 + $0x158] sm:$0xff]  ;;  %v3306_v41 = vld [vmem:[#allocation13 + $0x1e8] sm:$0xff]  ;;  %v3307_v8 = vld [vmem:[#allocation13 + $0x1f0] sm:$0xff] }
 0x308   :  { %4096 = vbcast.lane.b32.xlu0 %v4094_v63, 256  ;;  %5666 = vmatprep.subr.bf16.mxu0 %v5665_v33  ;;  %v3286_v63 = vld [vmem:[#allocation13 + $0x148] sm:$0xff]  ;;  %v5687_v9 = vpack.c.bf16 %v3288_v57, %v3287_v45  ;;  %v3308_v61 = vld [vmem:[#allocation13 + $0x1f8] sm:$0xff]  ;;  %v3325_v21 = vld [vmem:[#allocation13 + $0x280] sm:$0xff] }
 0x309   :  { %4075 = vbcast.lane.b32.xlu1 %v4073_v7, 256  ;;  %v3259_v7 = vld [vmem:[#allocation13 + $0x70] sm:$0xff]  ;;  %v5683_v18 = vpack.c.bf16 %v3286_v63, %v3285_v29  ;;  %v5693_v34 = vpack.c.bf16 %v3308_v61, %v3307_v8  ;;  %v3292_v24 = vld [vmem:[#allocation13 + $0x178] sm:$0xff]  ;;  %v3326_v19 = vld [vmem:[#allocation13 + $0x288] sm:$0xff] }
 0x30a   :  { %3240 = vmatmul.mubr.f32.vlgmr.msra.gmra.mrb[6].mxu0 %v3021_v58  ;;  %5652 = vmatpush3.bf16.msra.mxu1 %v5651_v31  ;;  %v3289_v58 = vld [vmem:[#allocation13 + $0x160] sm:$0xff]  ;;  %v5697_v38 = vpack.c.bf16 %v3326_v19, %v3325_v21  ;;  %v2340_v31 = vunpack.c.l.s4 %v6127_v60  ;;  %v7742_v23 = vld [vmem:[%s9053_s14 + $0x8] ss:$12 sps:$4 sm:$0xff]   ;;  %v7755_v25 = vld [vmem:[%s9053_s14 + $0x18] sm:$0xff] }
 0x30b   :  { %5668 = vmatpush3.bf16.msra.mxu0 %v5667_v22  ;;  %5654 = vmatprep.subr.bf16.mxu1 %v5653_v37  ;;  %v5663_v22 = vpack.c.bf16 %v3260_v39, %v3259_v7  ;;  %v2235_v20 = vld [vmem:[%s9053_s14] sm:$0xff]  ;;  %v7771_v17 = vld [vmem:[%s9053_s14 + $0x30] sm:$0xff]  ;;  %v7794_v0 = vld [vmem:[%s9053_s14 + $0x48] sm:$0xff] }
 0x30c   :  { %5670 = vmatprep.subr.bf16.mxu0 %v5669_v59  ;;  %v4951_v40 = vpop.f32.mrb[0].mxu0  ;;  %v3305_v59 = vld [vmem:[#allocation13 + $0x1e0] sm:$0xff]  ;;  %v2251_v44 = vunpack.c.l.bf16 %v2235_v20  ;;  %v2252_v27 = vunpack.c.h.bf16 %v2235_v20  ;;  %v7807_v51 = vld [vmem:[%s9053_s14 + $0x50] ss:$12 sps:$4 sm:$0xff]  }
 0x30d   :  { %4089 = vbcast.lane.b32.xlu1 %v4087_v62, 256  ;;  %v4952_v30 = vpop.f32.mrb[1].mxu0  ;;  %v5689_v2 = vpack.c.bf16 %v3306_v41, %v3305_v59  ;;  %v3290_v62 = vld [vmem:[#allocation13 + $0x168] sm:$0xff]  ;;  %v9054_v55 = vld [vmem:[#allocation24_spill] sm:$0xff] }
 0x30e   :  { %v4953_v12 = vadd.f32 %v4952_v30, %v4951_v40  ;;  %5656 = vmatpush3.bf16.msra.mxu1 %v5655_v10  ;;  %v5691_v4 = vpack.c.bf16 %v3290_v62, %v3289_v58  ;;  %v7760_v40 = vld [vmem:[%s9053_s14 + $0x20] ss:$12 sps:$4 sm:$0xff]   ;;  %v7765_v37 = vld [vmem:[%s9053_s14 + $0x24] sm:$0xff]  ;;  %v2256_v10 = vunpack.c.h.bf16 %v7742_v23 }
 0x30f   :  { %5672 = vmatpush3.bf16.msra.mxu0 %v5671_v56  ;;  %v4986_v36 = vpop.f32.mrb[0].mxu1  ;;  %5658 = vmatprep.subr.bf16.mxu1 %v5657_v15  ;;  %v3291_v56 = vld [vmem:[#allocation13 + $0x170] sm:$0xff]  ;;  %v7789_v15 = vld [vmem:[%s9053_s14 + $0x3c] sm:$0xff]  ;;  %v4346_v58 = vld [vmem:[#allocation14 + $0x88] sm:$0xff] }
 0x310   :  { %5674 = vmatprep.subr.bf16.mxu0 %v5673_v43  ;;  %v4987_v48 = vpop.f32.mrb[1].mxu1  ;;  %v1097_v33 = vadd.f32 %v4953_v12, %v4911_v6  ;;  %v5695_v43 = vpack.c.bf16 %v3292_v24, %v3291_v56  ;;  %v7833_v60 = vld [vmem:[#allocation5 + $0x20] sm:$0xff]  ;;  %v7872_v24 = vld [vmem:[#allocation14 + $0x8] sm:$0xff] }
 0x311   :  { %4103 = vbcast.lane.b32.xlu1 %v4101_v50, 256  ;;  %v4988_v13 = vadd.f32 %v4987_v48, %v4986_v36  ;;  %v2341_v50 = vunpack.c.0.s8 %v2340_v31  ;;  %v7780_v36 = vld [vmem:[%s9053_s14 + $0x38] ss:$12 sps:$4 sm:$0xff]   ;;  %9065 = vst [vmem:[#allocation44_spill] sm:$0xff] %v7872_v24 }
 0x312   :  { %5660 = vmatpush3.bf16.msra.mxu1 %v5659_v54  ;;  %v7863_v21 = vld [vmem:[#allocation13 + $0x2a0] sm:$0xff] }
 0x313   :  { %5676 = vmatpush3.bf16.msra.mxu0 %v5675_v16  ;;  %v7734_v3 = vadd.f32 %v4988_v13, %v1097_v33  ;;  %5662 = vmatprep.subr.bf16.mxu1 %v5661_v49  ;;  %v7745_v32 = vsub.s32 %v2341_v50, %v9054_v55  ;;  %v7750_v16 = vld [vmem:[%s9053_s14 + $0xc] sm:$0xff]  ;;  %9062 = vst [vmem:[#allocation49_spill] sm:$0xff] %v7863_v21  ;;  %v7870_v20 = vld [vmem:[#allocation14] sm:$0xff] }
 0x314   :  { %5678 = vmatprep.subr.bf16.mxu0 %v5677_v5  ;;  %v2253_v5 = vunpack.c.l.bf16 %v7742_v23  ;;  %v2254_v6 = vunpack.c.l.bf16 %v7750_v16  ;;  %v2255_v30 = vunpack.c.h.bf16 %v7750_v16  ;;  %v7837_v55 = vld [vmem:[#allocation5 + $0x28] sm:$0xff]  ;;  %9064 = vst [vmem:[#allocation47_spill] sm:$0xff] %v7870_v20  ;;  %v7900_v1 = vld [vmem:[#allocation5 + $0x40] sm:$0xff] }
 0x315   :  { %9052 = vst [vmem:[#allocation26_spill] sm:$0xff] %v7734_v3  ;;  %9055 = vst [vmem:[#allocation45_spill] sm:$0xff] %v7837_v55 }
 0x316   :  { %5664 = vmatpush3.bf16.msra.mxu1 %v5663_v22  ;;  %9068 = vst [vmem:[#allocation36_spill] sm:$0xff] %v7900_v1 }
 0x317   :  { %5680 = vmatpush3.bf16.msra.mxu0 %v5679_v35  ;;  %5698 = vmatprep.subr.bf16.mxu1 %v5697_v38  ;;  %v7831_v38 = vld [vmem:[#allocation13 + $0x208] sm:$0xff] }
 0x318   :  { %5682 = vmatprep.subr.bf16.mxu0 %v5681_v42 }
 0x31b   :  { %5684 = vmatpush3.bf16.msra.mxu0 %v5683_v18 }
 0x31c   :  { %5686 = vmatprep.subr.bf16.mxu0 %v5685_v14  ;;  %v7815_v14 = vld [vmem:[%s9053_s14 + $0x54] sm:$0xff] }
 0x31f   :  { %5688 = vmatpush3.bf16.msra.mxu0 %v5687_v9  ;;  %v7819_v9 = vld [vmem:[#allocation5] sm:$0xff] }
 0x320   :  { %5690 = vmatprep.subr.bf16.mxu0 %v5689_v2  ;;  %v4345_v2 = vld [vmem:[#allocation14 + $0x80] sm:$0xff] }
 0x323   :  { %5692 = vmatpush3.bf16.msra.mxu0 %v5691_v4 }
 0x324   :  { %5694 = vmatprep.subr.bf16.mxu0 %v5693_v34  ;;  %v7824_v34 = vld [vmem:[#allocation5 + $0x8] sm:$0xff] }
 0x327   :  { %5696 = vmatpush3.bf16.msra.mxu0 %v5695_v43  ;;  %v7829_v43 = vld [vmem:[#allocation13 + $0x200] sm:$0xff] }
 0x32d   :  { %v2281_v47 = vpop.permute.xlu1 %2280 }
 0x32e   :  { %v2345_v12 = vrot.slane %v2281_v47, %v7745_v32 }
 0x330   :  { %v2403_v33 = vmul.f32 %v2345_v12, %v2251_v44  ;;  %v2404_v13 = vmul.f32 %v2345_v12, %v2252_v27  ;;  %v2405_v54 = vmul.f32 %v2345_v12, %v2253_v5  ;;  %v5729_v44 = vpack.c.bf16 %v4346_v58, %v4345_v2  ;;  %v7851_v2 = vld [vmem:[#allocation13 + $0x218] sm:$0xff]  ;;  %v7853_v58 = vld [vmem:[#allocation5 + $0x30] sm:$0xff] }
 0x331   :  { %9059 = vst [vmem:[#allocation46_spill] sm:$0xff] %v7851_v2  ;;  %9060 = vst [vmem:[#allocation42_spill] sm:$0xff] %v7853_v58 }
 0x332   :  { %v2451_v49 = vcombine.high %v2403_v33, %v2403_v33  ;;  %v2452_v39 = vcombine.high %v2404_v13, %v2404_v13  ;;  %v2500_v22 = vsel %vm2499_vm11, %v2403_v33, 0.0  ;;  %v2453_v45 = vcombine.high %v2405_v54, %v2405_v54  ;;  %v7841_v33 = vld [vmem:[#allocation13 + $0x290] sm:$0xff]  ;;  %5730 = vmatprep.subr.bf16.mxu0 %v5729_v44  ;;  %v7865_v44 = vld [vmem:[#allocation13 + $0x2a8] sm:$0xff] }
 0x333   :  { %v2501_v57 = vrot.slane %v2500_v22, 4  ;;  %v2514_v59 = vsel %vm2499_vm11, %v2404_v13, 0.0  ;;  %v2528_v41 = vsel %vm2499_vm11, %v2405_v54, 0.0  ;;  %9056 = vst [vmem:[#allocation34_spill] sm:$0xff] %v7841_v33  ;;  %v7843_v13 = vld [vmem:[#allocation13 + $0x298] sm:$0xff]  ;;  %9063 = vst [vmem:[#allocation48_spill] sm:$0xff] %v7865_v44  ;;  %v9074_v44 = vunpack.c.h.bf16 %v7765_v37 }
 0x334   :  { %v2507_v62 = vsel %vm2499_vm11, %v2451_v49, 0.0  ;;  %v2515_v8 = vrot.slane %v2514_v59, 4  ;;  %v2521_v61 = vsel %vm2499_vm11, %v2452_v39, 0.0  ;;  %v2529_v56 = vrot.slane %v2528_v41, 4  ;;  %9057 = vst [vmem:[#allocation37_spill] sm:$0xff] %v7843_v13  ;;  %v7858_v49 = vld [vmem:[#allocation5 + $0x38] sm:$0xff] }
 0x335   :  { %v2502_v31 = vadd.f32 %v2501_v57, %v2500_v22  ;;  %v2508_v27 = vrot.slane %v2507_v62, 4  ;;  %v2522_v5 = vrot.slane %v2521_v61, 4  ;;  %v2535_v47 = vsel %vm2499_vm11, %v2453_v45, 0.0  ;;  %v7849_v57 = vld [vmem:[#allocation13 + $0x210] sm:$0xff]  ;;  %9061 = vst [vmem:[#allocation41_spill] sm:$0xff] %v7858_v49 }
 0x336   :  { %v2516_v54 = vadd.f32 %v2515_v8, %v2514_v59  ;;  %9058 = vst [vmem:[#allocation43_spill] sm:$0xff] %v7849_v57  ;;  %v2530_v45 = vadd.f32 %v2529_v56, %v2528_v41  ;;  %v2536_v50 = vrot.slane %v2535_v47, 4 }
 0x337   :  { %v2503_v39 = vrot.slane %v2502_v31, 2  ;;  %v2509_v41 = vadd.f32 %v2508_v27, %v2507_v62  ;;  %v2523_v56 = vadd.f32 %v2522_v5, %v2521_v61 }
 0x338   :  { %v2517_v4 = vrot.slane %v2516_v54, 2  ;;  %v2531_v26 = vrot.slane %v2530_v45, 2  ;;  %v2537_v8 = vadd.f32 %v2536_v50, %v2535_v47  ;;  %v7891_v47 = vld [vmem:[#allocation13 + $0x220] sm:$0xff] }
 0x339   :  { %v2504_v5 = vadd.f32 %v2503_v39, %v2502_v31  ;;  %v2510_v19 = vrot.slane %v2509_v41, 2  ;;  %v2524_v7 = vrot.slane %v2523_v56, 2  ;;  %9066 = vst [vmem:[#allocation35_spill] sm:$0xff] %v7891_v47  ;;  %v7893_v39 = vld [vmem:[#allocation13 + $0x228] sm:$0xff] }
 0x33a   :  { %v2288_v12 = vpop.permute.xlu1 %2287  ;;  %v2518_v52 = vadd.f32 %v2517_v4, %v2516_v54  ;;  %9067 = vst [vmem:[#allocation50_spill] sm:$0xff] %v7893_v39 }
 0x33b   :  { %v2352_v22 = vrot.slane %v2288_v12, %v7745_v32  ;;  %v2505_v11 = vrot.slane %v2504_v5, 1  ;;  %v2511_v48 = vadd.f32 %v2510_v19, %v2509_v41  ;;  %v2525_v3 = vadd.f32 %v2524_v7, %v2523_v56 }
 0x33c   :  { %v9071_v7 = vunpack.c.l.bf16 %v7760_v40 }
 0x33d   :  { %v2406_v12 = vmul.f32 %v2352_v22, %v2254_v6  ;;  %v2407_v62 = vmul.f32 %v2352_v22, %v2255_v30  ;;  %v2408_v59 = vmul.f32 %v2352_v22, %v2256_v10  ;;  %v2538_v6 = vrot.slane %v2537_v8, 2 }
 0x33e   :  { %v2295_v10 = vpop.permute.xlu1 %2294  ;;  %v7907_v41 = vadd.f32 %v2505_v11, %v2504_v5 }
 0x33f   :  { %v2454_v18 = vcombine.high %v2406_v12, %v2406_v12  ;;  %v2455_v46 = vcombine.high %v2407_v62, %v2407_v62  ;;  %v2456_v16 = vcombine.high %v2408_v59, %v2408_v59  ;;  %v2542_v30 = vsel %vm2499_vm11, %v2406_v12, 0.0 }
 0x340   :  { %v2556_v61 = vsel %vm2499_vm11, %v2407_v62, 0.0  ;;  %v2543_v42 = vrot.slane %v2542_v30, 4  ;;  %v2570_v4 = vsel %vm2499_vm11, %v2408_v59, 0.0  ;;  %v2532_v12 = vadd.f32 %v2531_v26, %v2530_v45 }
 0x341   :  { %v2549_v31 = vsel %vm2499_vm11, %v2454_v18, 0.0  ;;  %v2557_v50 = vrot.slane %v2556_v61, 4  ;;  %v2563_v23 = vsel %vm2499_vm11, %v2455_v46, 0.0  ;;  %v2577_v54 = vsel %vm2499_vm11, %v2456_v16, 0.0 }
 0x342   :  { %v2550_v22 = vrot.slane %v2549_v31, 4  ;;  %v2564_v27 = vrot.slane %v2563_v23, 4  ;;  %v2544_v62 = vadd.f32 %v2543_v42, %v2542_v30  ;;  %v2571_v63 = vrot.slane %v2570_v4, 4 }
 0x343   :  { %v2558_v29 = vadd.f32 %v2557_v50, %v2556_v61  ;;  %v2578_v18 = vrot.slane %v2577_v54, 4  ;;  %v2359_v35 = vrot.slane %v2295_v10, %v7745_v32  ;;  %v2519_v59 = vrot.slane %v2518_v52, 1 }
 0x344   :  { %v2551_v28 = vadd.f32 %v2550_v22, %v2549_v31  ;;  %v2565_v53 = vadd.f32 %v2564_v27, %v2563_v23  ;;  %v9069_v26 = vunpack.c.l.bf16 %v7755_v25  ;;  %v9070_v42 = vunpack.c.h.bf16 %v7755_v25 }
 0x345   :  { %v2533_v16 = vrot.slane %v2532_v12, 1  ;;  %v2539_v30 = vadd.f32 %v2538_v6, %v2537_v8  ;;  %v2545_v50 = vrot.slane %v2544_v62, 2  ;;  %v2572_v10 = vadd.f32 %v2571_v63, %v2570_v4  ;;  %v2302_v8 = vpop.permute.xlu1 %2301 }
 0x346   :  { %v2409_v45 = vmul.f32 %v2359_v35, %v9069_v26  ;;  %v2410_v61 = vmul.f32 %v2359_v35, %v9070_v42  ;;  %v2559_v49 = vrot.slane %v2558_v29, 2  ;;  %v2579_v46 = vadd.f32 %v2578_v18, %v2577_v54 }
 0x347   :  { %v2552_v27 = vrot.slane %v2551_v28, 2  ;;  %v2566_v31 = vrot.slane %v2565_v53, 2  ;;  %v2411_v56 = vmul.f32 %v2359_v35, %v9071_v7  ;;  %v2512_v23 = vrot.slane %v2511_v48, 1 }
 0x348   :  { %v2457_v47 = vcombine.high %v2409_v45, %v2409_v45  ;;  %v7911_v22 = vadd.f32 %v2519_v59, %v2518_v52  ;;  %v2526_v25 = vrot.slane %v2525_v3, 1  ;;  %v2458_v26 = vcombine.high %v2410_v61, %v2410_v61 }
 0x349   :  { %v7913_v6 = vadd.f32 %v2533_v16, %v2532_v12  ;;  %v2540_v63 = vrot.slane %v2539_v30, 1  ;;  %v2546_v4 = vadd.f32 %v2545_v50, %v2544_v62  ;;  %v2573_v54 = vrot.slane %v2572_v10, 2 }
 0x34a   :  { %v2560_v18 = vadd.f32 %v2559_v49, %v2558_v29  ;;  %v2580_v42 = vrot.slane %v2579_v46, 2  ;;  %v2584_v11 = vsel %vm2499_vm11, %v2409_v45, 0.0  ;;  %v2591_v5 = vsel %vm2499_vm11, %v2457_v47, 0.0 }
 0x34b   :  { %v2553_v19 = vadd.f32 %v2552_v27, %v2551_v28  ;;  %v2567_v1 = vadd.f32 %v2566_v31, %v2565_v53  ;;  %v2459_v35 = vcombine.high %v2411_v56, %v2411_v56  ;;  %v2366_v52 = vrot.slane %v2302_v8, %v7745_v32 }
 0x34c   :  { %v2585_v59 = vrot.slane %v2584_v11, 4  ;;  %v2592_v7 = vrot.slane %v2591_v5, 4  ;;  %v2598_v39 = vsel %vm2499_vm11, %v2410_v61, 0.0  ;;  %v2605_v12 = vsel %vm2499_vm11, %v2458_v26, 0.0 }
 0x34d   :  { %v7920_v16 = vadd.f32 %v2512_v23, %v2511_v48  ;;  %v2574_v62 = vadd.f32 %v2573_v54, %v2572_v10  ;;  %v2599_v29 = vrot.slane %v2598_v39, 4  ;;  %v2612_v49 = vsel %vm2499_vm11, %v2411_v56, 0.0 }
 0x34e   :  { %v2547_v45 = vrot.slane %v2546_v4, 1  ;;  %v2561_v50 = vrot.slane %v2560_v18, 1  ;;  %v2581_v47 = vadd.f32 %v2580_v42, %v2579_v46  ;;  %v2606_v28 = vrot.slane %v2605_v12, 4 }
 0x34f   :  { %v2586_v53 = vadd.f32 %v2585_v59, %v2584_v11  ;;  %v2593_v27 = vadd.f32 %v2592_v7, %v2591_v5  ;;  %v2619_v31 = vsel %vm2499_vm11, %v2459_v35, 0.0  ;;  %v9072_v8 = vunpack.c.l.bf16 %v7765_v37 }
 0x350   :  { %v7926_v61 = vadd.f32 %v2526_v25, %v2525_v3  ;;  %v2554_v26 = vrot.slane %v2553_v19, 1  ;;  %v2568_v48 = vrot.slane %v2567_v1, 1  ;;  %v2613_v23 = vrot.slane %v2612_v49, 4 }
 0x351   :  { %v2412_v21 = vmul.f32 %v2366_v52, %v9072_v8  ;;  %v7928_v10 = vadd.f32 %v2540_v63, %v2539_v30  ;;  %v2575_v54 = vrot.slane %v2574_v62, 1  ;;  %v2600_v56 = vadd.f32 %v2599_v29, %v2598_v39 }
 0x352   :  { %v2413_v46 = vmul.f32 %v2366_v52, %v9074_v44  ;;  %v2548_v42 = vadd.f32 %v2547_v45, %v2546_v4  ;;  %v2582_v11 = vrot.slane %v2581_v47, 1  ;;  %v2607_v5 = vadd.f32 %v2606_v28, %v2605_v12 }
 0x353   :  { %9073 = vst [vmem:[#allocation25_spill] sm:$0xff] %v7928_v10  ;;  %v2620_v59 = vrot.slane %v2619_v31, 4  ;;  %v2562_v35 = vadd.f32 %v2561_v50, %v2560_v18  ;;  %v2587_v7 = vrot.slane %v2586_v53, 2  ;;  %v2594_v58 = vrot.slane %v2593_v27, 2 }
 0x354   :  { %v2460_v8 = vcombine.high %v2412_v21, %v2412_v21  ;;  %v7932_v3 = vadd.f32 %v2554_v26, %v2553_v19  ;;  %v7934_v25 = vadd.f32 %v2568_v48, %v2567_v1  ;;  %v2614_v57 = vadd.f32 %v2613_v23, %v2612_v49  ;;  %v2309_v26 = vpop.permute.xlu1 %2308 }
 0x355   :  { %v9075_v30 = vunpack.c.h.bf16 %v7760_v40  ;;  %v2576_v39 = vadd.f32 %v2575_v54, %v2574_v62  ;;  %v2601_v29 = vrot.slane %v2600_v56, 2  ;;  %v2461_v37 = vcombine.high %v2413_v46, %v2413_v46 }
 0x356   :  { %v2626_v44 = vsel %vm2499_vm11, %v2412_v21, 0.0  ;;  %v7939_v4 = vadd.f32 %v2582_v11, %v2581_v47  ;;  %v7943_v18 = vsel %vm991_vm3, %v2548_v42, %v7907_v41  ;;  %v2608_v12 = vrot.slane %v2607_v5, 2 }
 0x357   :  { %v2414_v63 = vmul.f32 %v2366_v52, %v9075_v30  ;;  %v2621_v19 = vadd.f32 %v2620_v59, %v2619_v31  ;;  %v2588_v45 = vadd.f32 %v2587_v7, %v2586_v53  ;;  %v2595_v1 = vadd.f32 %v2594_v58, %v2593_v27 }
 0x358   :  { %9076 = vst [vmem:[#allocation28_spill] sm:$0xff] %v7939_v4  ;;  %v2627_v50 = vrot.slane %v2626_v44, 4  ;;  %v2633_v49 = vsel %vm2499_vm11, %v2460_v8, 0.0  ;;  %v2615_v40 = vrot.slane %v2614_v57, 2  ;;  %v2640_v28 = vsel %vm2499_vm11, %v2413_v46, 0.0 }
 0x359   :  { %v2462_v52 = vcombine.high %v2414_v63, %v2414_v63  ;;  %v2634_v62 = vrot.slane %v2633_v49, 4  ;;  %v2602_v21 = vadd.f32 %v2601_v29, %v2600_v56  ;;  %v2641_v47 = vrot.slane %v2640_v28, 4 }
 0x35a   :  { %v2647_v48 = vsel %vm2499_vm11, %v2461_v37, 0.0  ;;  %v2654_v41 = vsel %vm2499_vm11, %v2414_v63, 0.0  ;;  %v2609_v23 = vadd.f32 %v2608_v12, %v2607_v5  ;;  %v2622_v54 = vrot.slane %v2621_v19, 2 }
 0x35b   :  { %v2648_v31 = vrot.slane %v2647_v48, 4  ;;  %v2655_v53 = vrot.slane %v2654_v41, 4  ;;  %v2589_v58 = vrot.slane %v2588_v45, 1  ;;  %v2596_v27 = vrot.slane %v2595_v1, 1 }
 0x35c   :  { %v2628_v42 = vadd.f32 %v2627_v50, %v2626_v44  ;;  %v2373_v11 = vrot.slane %v2309_v26, %v7745_v32  ;;  %v2616_v59 = vadd.f32 %v2615_v40, %v2614_v57  ;;  %v2635_v7 = vadd.f32 %v2634_v62, %v2633_v49 }
 0x35d   :  { %v2642_v8 = vadd.f32 %v2641_v47, %v2640_v28  ;;  %v2661_v46 = vsel %vm2499_vm11, %v2462_v52, 0.0  ;;  %v2603_v56 = vrot.slane %v2602_v21, 1  ;;  %v2649_v30 = vadd.f32 %v2648_v31, %v2647_v48 }
 0x35e   :  { %v9077_v29 = vunpack.c.l.bf16 %v7771_v17  ;;  %v9078_v5 = vunpack.c.h.bf16 %v7771_v17  ;;  %v7957_v12 = vsel %vm991_vm3, %v2562_v35, %v7911_v22  ;;  %v7961_v44 = vsel %vm991_vm3, %v2576_v39, %v7913_v6 }
 0x35f   :  { %9079 = vst [vmem:[#allocation30_spill] sm:$0xff] %v7961_v44  ;;  %v2623_v57 = vadd.f32 %v2622_v54, %v2621_v19  ;;  %v2656_v50 = vadd.f32 %v2655_v53, %v2654_v41  ;;  %v2610_v49 = vrot.slane %v2609_v23, 1  ;;  %v2629_v40 = vrot.slane %v2628_v42, 2  ;;  %v2316_v54 = vpop.permute.xlu1 %2315 }
 0x360   :  { %v2415_v37 = vmul.f32 %v2373_v11, %v9077_v29  ;;  %v2416_v63 = vmul.f32 %v2373_v11, %v9078_v5  ;;  %v2662_v52 = vrot.slane %v2661_v46, 4  ;;  %v7963_v28 = vadd.f32 %v2589_v58, %v2588_v45 }
 0x361   :  { %v7965_v26 = vadd.f32 %v2596_v27, %v2595_v1  ;;  %v2636_v17 = vrot.slane %v2635_v7, 2  ;;  %v2643_v47 = vrot.slane %v2642_v8, 2  ;;  %v7967_v48 = vadd.f32 %v2603_v56, %v2602_v21 }
 0x362   :  { %v2463_v62 = vcombine.high %v2415_v37, %v2415_v37  ;;  %v2617_v22 = vrot.slane %v2616_v59, 1  ;;  %v2650_v35 = vrot.slane %v2649_v30, 2  ;;  %v2464_v31 = vcombine.high %v2416_v63, %v2416_v63 }
 0x363   :  { %v2624_v29 = vrot.slane %v2623_v57, 1  ;;  %v2657_v6 = vrot.slane %v2656_v50, 2  ;;  %v9080_v39 = vunpack.c.l.bf16 %v7780_v36  ;;  %v2668_v41 = vsel %vm2499_vm11, %v2415_v37, 0.0 }
 0x364   :  { %v2630_v53 = vadd.f32 %v2629_v40, %v2628_v42  ;;  %v2663_v45 = vadd.f32 %v2662_v52, %v2661_v46  ;;  %v2669_v58 = vrot.slane %v2668_v41, 4  ;;  %v2675_v1 = vsel %vm2499_vm11, %v2463_v62, 0.0 }
 0x365   :  { %v2417_v19 = vmul.f32 %v2373_v11, %v9080_v39  ;;  %v2637_v27 = vadd.f32 %v2636_v17, %v2635_v7  ;;  %v2644_v5 = vadd.f32 %v2643_v47, %v2642_v8  ;;  %v2676_v21 = vrot.slane %v2675_v1, 4 }
 0x366   :  { %v2682_v56 = vsel %vm2499_vm11, %v2416_v63, 0.0  ;;  %v2651_v44 = vadd.f32 %v2650_v35, %v2649_v30  ;;  %v2670_v2 = vadd.f32 %v2669_v58, %v2668_v41  ;;  %v2689_v20 = vsel %vm2499_vm11, %v2464_v31, 0.0 }
 0x367   :  { %v2380_v24 = vrot.slane %v2316_v54, %v7745_v32  ;;  %v7976_v11 = vadd.f32 %v2610_v49, %v2609_v23  ;;  %v2658_v37 = vadd.f32 %v2657_v6, %v2656_v50  ;;  %v2465_v39 = vcombine.high %v2417_v19, %v2417_v19 }
 0x368   :  { %v2683_v42 = vrot.slane %v2682_v56, 4  ;;  %v7978_v46 = vadd.f32 %v2617_v22, %v2616_v59  ;;  %v2631_v40 = vrot.slane %v2630_v53, 1  ;;  %v2664_v52 = vrot.slane %v2663_v45, 2 }
 0x369   :  { %v2690_v7 = vrot.slane %v2689_v20, 4  ;;  %v2638_v8 = vrot.slane %v2637_v27, 1  ;;  %v2645_v62 = vrot.slane %v2644_v5, 1  ;;  %v2677_v17 = vadd.f32 %v2676_v21, %v2675_v1 }
 0x36a   :  { %9081 = vst [vmem:[#allocation32_spill] sm:$0xff] %v7978_v46  ;;  %v2696_v30 = vsel %vm2499_vm11, %v2417_v19, 0.0  ;;  %v7981_v63 = vadd.f32 %v2624_v29, %v2623_v57  ;;  %v2652_v47 = vrot.slane %v2651_v44, 1  ;;  %v2671_v35 = vrot.slane %v2670_v2, 2 }
 0x36b   :  { %v9083_v23 = vunpack.c.l.bf16 %v7789_v15  ;;  %v2659_v50 = vrot.slane %v2658_v37, 1  ;;  %v2684_v31 = vadd.f32 %v2683_v42, %v2682_v56  ;;  %v2703_v59 = vsel %vm2499_vm11, %v2465_v39, 0.0 }
 0x36c   :  { %9082 = vst [vmem:[#allocation33_spill] sm:$0xff] %v7981_v63  ;;  %v9084_v22 = vunpack.c.h.bf16 %v7789_v15  ;;  %v7988_v41 = vadd.f32 %v2631_v40, %v2630_v53  ;;  %v2665_v54 = vadd.f32 %v2664_v52, %v2663_v45  ;;  %v2691_v58 = vadd.f32 %v2690_v7, %v2689_v20  ;;  %v2323_v7 = vpop.permute.xlu1 %2322 }
 0x36d   :  { %v2418_v49 = vmul.f32 %v2380_v24, %v9083_v23  ;;  %v2697_v1 = vrot.slane %v2696_v30, 4  ;;  %v7990_v19 = vadd.f32 %v2638_v8, %v2637_v27  ;;  %v7992_v57 = vadd.f32 %v2645_v62, %v2644_v5 }
 0x36e   :  { %v2419_v6 = vmul.f32 %v2380_v24, %v9084_v22  ;;  %v2678_v29 = vrot.slane %v2677_v17, 2  ;;  %v9085_v21 = vunpack.c.h.bf16 %v7780_v36  ;;  %v7996_v46 = vadd.f32 %v2652_v47, %v2651_v44 }
 0x36f   :  { %v2672_v56 = vadd.f32 %v2671_v35, %v2670_v2  ;;  %v2704_v39 = vrot.slane %v2703_v59, 4  ;;  %v2466_v42 = vcombine.high %v2418_v49, %v2418_v49  ;;  %v7998_v15 = vadd.f32 %v2659_v50, %v2658_v37 }
 0x370   :  { %v2420_v23 = vmul.f32 %v2380_v24, %v9085_v21  ;;  %v2685_v53 = vrot.slane %v2684_v31, 2  ;;  %v2467_v40 = vcombine.high %v2419_v6, %v2419_v6  ;;  %v2710_v20 = vsel %vm2499_vm11, %v2418_v49, 0.0 }
 0x371   :  { %9086 = vst [vmem:[#allocation53_spill] sm:$0xff] %v7998_v15  ;;  %v2666_v45 = vrot.slane %v2665_v54, 1  ;;  %v2692_v27 = vrot.slane %v2691_v58, 2  ;;  %v2698_v52 = vadd.f32 %v2697_v1, %v2696_v30  ;;  %v2711_v5 = vrot.slane %v2710_v20, 4 }
 0x372   :  { %v8001_v8 = vadd.f32 %v2678_v29, %v2677_v17  ;;  %v2468_v36 = vcombine.high %v2420_v23, %v2420_v23  ;;  %v2724_v24 = vsel %vm2499_vm11, %v2419_v6, 0.0  ;;  %v2738_v2 = vsel %vm2499_vm11, %v2420_v23, 0.0 }
 0x373   :  { %v2673_v44 = vrot.slane %v2672_v56, 1  ;;  %v2705_v62 = vadd.f32 %v2704_v39, %v2703_v59  ;;  %v2712_v37 = vadd.f32 %v2711_v5, %v2710_v20  ;;  %v2717_v47 = vsel %vm2499_vm11, %v2466_v42, 0.0 }
 0x374   :  { %v2686_v35 = vadd.f32 %v2685_v53, %v2684_v31  ;;  %v2725_v50 = vrot.slane %v2724_v24, 4  ;;  %v2731_v49 = vsel %vm2499_vm11, %v2467_v40, 0.0  ;;  %v2387_v30 = vrot.slane %v2323_v7, %v7745_v32 }
 0x375   :  { %v8008_v22 = vadd.f32 %v2666_v45, %v2665_v54  ;;  %v8010_v17 = vadd.f32 %v2692_v27, %v2691_v58  ;;  %v2699_v1 = vrot.slane %v2698_v52, 2  ;;  %v2739_v29 = vrot.slane %v2738_v2, 4 }
 0x376   :  { %v2718_v6 = vrot.slane %v2717_v47, 4  ;;  %v2745_v21 = vsel %vm2499_vm11, %v2468_v36, 0.0  ;;  %v9088_v59 = vunpack.c.l.bf16 %v7794_v0  ;;  %v9089_v39 = vunpack.c.h.bf16 %v7794_v0 }
 0x377   :  { %9087 = vst [vmem:[#allocation60_spill] sm:$0xff] %v8008_v22  ;;  %v2706_v53 = vrot.slane %v2705_v62, 2  ;;  %v2713_v40 = vrot.slane %v2712_v37, 2  ;;  %v2732_v20 = vrot.slane %v2731_v49, 4  ;;  %v8018_v54 = vadd.f32 %v2673_v44, %v2672_v56 }
 0x378   :  { %v2421_v23 = vmul.f32 %v2387_v30, %v9088_v59  ;;  %v2422_v31 = vmul.f32 %v2387_v30, %v9089_v39  ;;  %v2687_v58 = vrot.slane %v2686_v35, 1  ;;  %v2726_v45 = vadd.f32 %v2725_v50, %v2724_v24 }
 0x379   :  { %v9090_v27 = vunpack.c.l.bf16 %v7807_v51  ;;  %v8023_v36 = vadd.f32 %v2699_v1, %v2698_v52  ;;  %v2740_v59 = vadd.f32 %v2739_v29, %v2738_v2  ;;  %v2746_v15 = vrot.slane %v2745_v21, 4  ;;  %v2330_v29 = vpop.permute.xlu1 %2329 }
 0x37a   :  { %v2719_v0 = vadd.f32 %v2718_v6, %v2717_v47  ;;  %v2469_v39 = vcombine.high %v2421_v23, %v2421_v23  ;;  %v2470_v22 = vcombine.high %v2422_v31, %v2422_v31  ;;  %v2752_v42 = vsel %vm2499_vm11, %v2421_v23, 0.0 }
 0x37b   :  { %v2423_v5 = vmul.f32 %v2387_v30, %v9090_v27  ;;  %9091 = vst [vmem:[#allocation51_spill] sm:$0xff] %v8023_v36  ;;  %v8026_v55 = vadd.f32 %v2706_v53, %v2705_v62  ;;  %v2714_v56 = vadd.f32 %v2713_v40, %v2712_v37  ;;  %v2733_v44 = vadd.f32 %v2732_v20, %v2731_v49 }
 0x37c   :  { %v2753_v63 = vrot.slane %v2752_v42, 4  ;;  %v8028_v24 = vadd.f32 %v2687_v58, %v2686_v35  ;;  %v2727_v50 = vrot.slane %v2726_v45, 2  ;;  %v2766_v27 = vsel %vm2499_vm11, %v2422_v31, 0.0 }
 0x37d   :  { %v2471_v30 = vcombine.high %v2423_v5, %v2423_v5  ;;  %v2741_v2 = vrot.slane %v2740_v59, 2  ;;  %v2747_v1 = vadd.f32 %v2746_v15, %v2745_v21  ;;  %v2767_v47 = vrot.slane %v2766_v27, 4 }
 0x37e   :  { %v2720_v6 = vrot.slane %v2719_v0, 2  ;;  %v2754_v7 = vadd.f32 %v2753_v63, %v2752_v42  ;;  %v2759_v62 = vsel %vm2499_vm11, %v2469_v39, 0.0  ;;  %v2773_v37 = vsel %vm2499_vm11, %v2470_v22, 0.0 }
 0x37f   :  { %v2715_v35 = vrot.slane %v2714_v56, 1  ;;  %v2734_v23 = vrot.slane %v2733_v44, 2  ;;  %v2780_v53 = vsel %vm2499_vm11, %v2423_v5, 0.0  ;;  %v2728_v40 = vadd.f32 %v2727_v50, %v2726_v45 }
 0x380   :  { %v2768_v31 = vadd.f32 %v2767_v47, %v2766_v27  ;;  %v2787_v20 = vsel %vm2499_vm11, %v2471_v30, 0.0  ;;  %v2394_v15 = vrot.slane %v2330_v29, %v7745_v32  ;;  %v8038_v21 = vadd.f32 %v2741_v2, %v2740_v59 }
 0x381   :  { %v2748_v58 = vrot.slane %v2747_v1, 2  ;;  %v2760_v63 = vrot.slane %v2759_v62, 4  ;;  %v2774_v42 = vrot.slane %v2773_v37, 4  ;;  %v2721_v39 = vadd.f32 %v2720_v6, %v2719_v0 }
 0x382   :  { %9092 = vst [vmem:[#allocation55_spill] sm:$0xff] %v8038_v21  ;;  %v2755_v52 = vrot.slane %v2754_v7, 2  ;;  %v2781_v22 = vrot.slane %v2780_v53, 4  ;;  %v9093_v49 = vunpack.c.l.bf16 %v7815_v14  ;;  %v8042_v33 = vadd.f32 %v2715_v35, %v2714_v56 }
 0x383   :  { %v8044_v5 = vadd.f32 %v2734_v23, %v2733_v44  ;;  %v2788_v45 = vrot.slane %v2787_v20, 4  ;;  %v9094_v50 = vunpack.c.h.bf16 %v7815_v14  ;;  %v2729_v32 = vrot.slane %v2728_v40, 1 }
 0x384   :  { %v2424_v36 = vmul.f32 %v2394_v15, %v9093_v49  ;;  %v2769_v59 = vrot.slane %v2768_v31, 2  ;;  %v9095_v27 = vunpack.c.h.bf16 %v7807_v51  ;;  %v8051_v29 = vadd.f32 %v2748_v58, %v2747_v1 }
 0x385   :  { %v2425_v30 = vmul.f32 %v2394_v15, %v9094_v50  ;;  %v2761_v6 = vadd.f32 %v2760_v63, %v2759_v62  ;;  %v8053_v49 = vadd.f32 %v2774_v42, %v2773_v37  ;;  %v8055_v56 = vadd.f32 %v2755_v52, %v2754_v7 }
 0x386   :  { %v2426_v2 = vmul.f32 %v2394_v15, %v9095_v27  ;;  %v2472_v47 = vcombine.high %v2424_v36, %v2424_v36  ;;  %v8057_v44 = vadd.f32 %v2781_v22, %v2780_v53  ;;  %v2794_v14 = vsel %vm2499_vm11, %v2424_v36, 0.0  ;;  %v3719_v27 = vpop.permute.xlu1 %3718 }
 0x387   :  { %v8061_v23 = vadd.f32 %v2788_v45, %v2787_v20  ;;  %v2473_v51 = vcombine.high %v2425_v30, %v2425_v30  ;;  %v2808_v50 = vsel %vm2499_vm11, %v2425_v30, 0.0  ;;  %v8064_v1 = vadd.f32 %v2729_v32, %v2728_v40 }
 0x388   :  { %9096 = vst [vmem:[#allocation62_spill] sm:$0xff] %v8057_v44  ;;  %v2801_v35 = vsel %vm2499_vm11, %v2472_v47, 0.0  ;;  %v8066_v62 = vadd.f32 %v2769_v59, %v2768_v31  ;;  %v2474_v37 = vcombine.high %v2426_v2, %v2426_v2  ;;  %v9097_v7 = vunpack.c.l.bf16 %v7819_v9 }
 0x389   :  { %v2802_v15 = vrot.slane %v2801_v35, 4  ;;  %v2762_v53 = vrot.slane %v2761_v6, 2  ;;  %v2776_v36 = vrot.slane %v8053_v49, 2  ;;  %v2795_v58 = vrot.slane %v2794_v14, 4 }
 0x38a   :  { %v3769_v52 = vmul.f32 %v3719_v27, %v9097_v7  ;;  %v9098_v20 = vunpack.c.h.bf16 %v7819_v9  ;;  %v2809_v45 = vrot.slane %v2808_v50, 4  ;;  %v9099_v40 = vunpack.c.l.bf16 %v7824_v34 }
 0x38b   :  { %v2803_v22 = vadd.f32 %v2802_v15, %v2801_v35  ;;  %v2815_v59 = vsel %vm2499_vm11, %v2473_v51, 0.0  ;;  %v9100_v47 = vunpack.c.h.bf16 %v7824_v34  ;;  %v8083_v9 = vsel %vm2499_vm11, %v2426_v2, 0.0 }
 0x38c   :  { %v3770_v63 = vmul.f32 %v3719_v27, %v9098_v20  ;;  %v3771_v30 = vmul.f32 %v3719_v27, %v9099_v40  ;;  %v2829_v35 = vsel %vm2499_vm11, %v2474_v37, 0.0  ;;  %v3801_v15 = vrot.slane %v3769_v52, 4 }
 0x38d   :  { %v3772_v7 = vmul.f32 %v3719_v27, %v9100_v47  ;;  %v2796_v20 = vadd.f32 %v2795_v58, %v2794_v14  ;;  %v2722_v40 = vrot.slane %v2721_v39, 1  ;;  %v2763_v21 = vadd.f32 %v2762_v53, %v2761_v6 }
 0x38e   :  { %v3807_v42 = vrot.slane %v3770_v63, 4  ;;  %v2810_v31 = vadd.f32 %v2809_v45, %v2808_v50  ;;  %v2816_v44 = vrot.slane %v2815_v59, 4  ;;  %v3813_v32 = vrot.slane %v3771_v30, 4 }
 0x38f   :  { %v2804_v13 = vrot.slane %v2803_v22, 2  ;;  %v2830_v51 = vrot.slane %v2829_v35, 4  ;;  %v3819_v4 = vrot.slane %v3772_v7, 4  ;;  %v9101_v34 = vrot.slane %v8001_v8, 1 }
 0x390   :  { %v2764_v47 = vrot.slane %v2763_v21, 1  ;;  %v8089_v2 = vadd.f32 %v3801_v15, %v3769_v52  ;;  %v2723_v0 = vadd.f32 %v2722_v40, %v2721_v39  ;;  %v3403_v14 = vsel %vm991_vm3, %v7932_v3, %v7920_v16 }
 0x391   :  { %v2681_v27 = vadd.f32 %v9101_v34, %v8001_v8  ;;  %v2805_v37 = vadd.f32 %v2804_v13, %v2803_v22  ;;  %v2823_v6 = vrot.slane %v8083_v9, 4  ;;  %v8095_v50 = vadd.f32 %v3807_v42, %v3770_v63 }
 0x392   :  { %v2765_v53 = vadd.f32 %v2764_v47, %v2763_v21  ;;  %v3404_v58 = vsel %vm993_vm4, %v7965_v26, %v3403_v14  ;;  %v2817_v45 = vadd.f32 %v2816_v44, %v2815_v59  ;;  %v8099_v10 = vadd.f32 %v3813_v32, %v3771_v30 }
 0x393   :  { %v2806_v8 = vrot.slane %v2805_v37, 1  ;;  %v3405_v39 = vsel %vm995_vm5, %v7990_v19, %v3404_v58  ;;  %v2797_v13 = vrot.slane %v2796_v20, 2  ;;  %v2811_v52 = vrot.slane %v2810_v31, 2 }
 0x394   :  { %v8103_v22 = vadd.f32 %v3819_v4, %v3772_v7  ;;  %v3406_v16 = vsel %vm997_vm6, %v2681_v27, %v3405_v39  ;;  %v8106_v3 = vadd.f32 %v2830_v51, %v2829_v35  ;;  %v3803_v21 = vrot.slane %v8089_v2, 2 }
 0x395   :  { %v2807_v63 = vadd.f32 %v2806_v8, %v2805_v37  ;;  %v3407_v26 = vsel %vm999_vm7, %v2723_v0, %v3406_v16  ;;  %v3809_v44 = vrot.slane %v8095_v50, 2  ;;  %v2736_v30 = vrot.slane %v8044_v5, 1 }
 0x396   :  { %v3408_v42 = vsel %vm1001_vm8, %v2765_v53, %v3407_v26  ;;  %v2777_v19 = vadd.f32 %v2776_v36, %v8053_v49  ;;  %v3815_v4 = vrot.slane %v8099_v10, 2  ;;  %v9102_v59 = vrot.slane %v8010_v17, 1 }
 0x397   :  { %v3409_v32 = vsel %vm1003_vm9, %v2807_v63, %v3408_v42  ;;  %v2818_v35 = vrot.slane %v2817_v45, 2  ;;  %v3821_v15 = vrot.slane %v8103_v22, 2  ;;  %v2737_v0 = vadd.f32 %v2736_v30, %v8044_v5 }
 0x398   :  { %v2695_v7 = vadd.f32 %v9102_v59, %v8010_v17  ;;  %3508 = vmatprep.mubr.f32.mxu1 %v3409_v32  ;;  %v2778_v40 = vrot.slane %v2777_v19, 1  ;;  %v3417_v51 = vsel %vm991_vm3, %v7934_v25, %v7926_v61  ;;  %v2798_v34 = vadd.f32 %v2797_v13, %v2796_v20 }
 0x399   :  { %v2819_v49 = vadd.f32 %v2818_v35, %v2817_v45  ;;  %v3418_v36 = vsel %vm993_vm4, %v7976_v11, %v3417_v51  ;;  %v3397_v17 = vsel %vm993_vm4, %v7963_v28, %v7943_v18  ;;  %v9103_v5 = vrot.slane %v8055_v56, 1 }
 0x39a   :  { %v2779_v27 = vadd.f32 %v2778_v40, %v2777_v19  ;;  %v3419_v47 = vsel %vm995_vm5, %v7996_v46, %v3418_v36  ;;  %v3398_v61 = vsel %vm995_vm5, %v7988_v41, %v3397_v17  ;;  %v2799_v11 = vrot.slane %v2798_v34, 1  ;;  %v9113_v36 = vld [vmem:[#allocation25_spill] sm:$0xff] }
 0x39b   :  { %v2758_v37 = vadd.f32 %v9103_v5, %v8055_v56  ;;  %v2820_v25 = vrot.slane %v2819_v49, 1  ;;  %v3420_v14 = vsel %vm997_vm6, %v2695_v7, %v3419_v47  ;;  %v3399_v20 = vsel %vm997_vm6, %v8018_v54, %v3398_v61  ;;  %v8139_v53 = vpop.f32.mrb[2].mxu0  ;;  %v9116_v47 = vld [vmem:[#allocation37_spill] sm:$0xff] }
 0x39c   :  { %9104 = vst [vmem:[#allocation27_spill] sm:$0xff] %v8139_v53  ;;  %v3421_v18 = vsel %vm999_vm7, %v2737_v0, %v3420_v14  ;;  %v3400_v28 = vsel %vm999_vm7, %v8042_v33, %v3399_v20  ;;  %v9105_v46 = vrot.slane %v8066_v62, 1  ;;  %v2812_v58 = vadd.f32 %v2811_v52, %v2810_v31  ;;  %v8149_v45 = vpop.f32.mrb[3].mxu0  ;;  %v3733_v52 = vpop.permute.xlu1 %3732  ;;  %v9120_v61 = vld [vmem:[#allocation45_spill] sm:$0xff]  ;;  %v9122_v20 = vld [vmem:[#allocation60_spill] sm:$0xff] }
 0x39d   :  { %v8147_v41 = vpop.f32.mrb[2].mxu1  ;;  %9107 = vst [vmem:[#allocation31_spill] sm:$0xff] %v8149_v45  ;;  %v2821_v8 = vadd.f32 %v2820_v25, %v2819_v49  ;;  %v3422_v39 = vsel %vm1001_vm8, %v2779_v27, %v3421_v18  ;;  %v2800_v54 = vadd.f32 %v2799_v11, %v2798_v34  ;;  %v3411_v13 = vsel %vm993_vm4, %v7967_v48, %v7957_v12  ;;  %v4358_v45 = vld [vmem:[#allocation14 + $0xe8] sm:$0xff] }
 0x39e   :  { %v2772_v56 = vadd.f32 %v9105_v46, %v8066_v62  ;;  %9106 = vst [vmem:[#allocation29_spill] sm:$0xff] %v8147_v41  ;;  %v8155_v16 = vpop.f32.mrb[3].mxu1  ;;  %v3401_v33 = vsel %vm1001_vm8, %v2758_v37, %v3400_v28  ;;  %v2813_v63 = vrot.slane %v2812_v58, 1  ;;  %v3412_v62 = vsel %vm995_vm5, %v7992_v57, %v3411_v13  ;;  %v9119_v37 = vld [vmem:[#allocation33_spill] sm:$0xff]  ;;  %v9127_v13 = vld [vmem:[#allocation46_spill] sm:$0xff] }
 0x39f   :  { %9108 = vst [vmem:[#allocation56_spill] sm:$0xff] %v8155_v16  ;;  %v2750_v31 = vrot.slane %v8051_v29, 1  ;;  %v3423_v26 = vsel %vm1003_vm9, %v2821_v8, %v3422_v39  ;;  %v3402_v42 = vsel %vm1003_vm9, %v2800_v54, %v3401_v33  ;;  %v3413_v30 = vsel %vm997_vm6, %v8028_v24, %v3412_v62  ;;  %v9128_v33 = vld [vmem:[#allocation43_spill] sm:$0xff]  ;;  %v9130_v62 = vld [vmem:[#allocation42_spill] sm:$0xff] }
 0x3a0   :  { %v9109_v12 = vrot.slane %v8061_v23, 2  ;;  %3578 = vmatprep.mubr.f32.mxu0 %v3423_v26  ;;  %3509 = vmatmul.mubr.f32.vlgmr.msra.gmra.mrb[6].mxu1 %v3402_v42  ;;  %v2814_v19 = vadd.f32 %v2813_v63, %v2812_v58  ;;  %v3414_v57 = vsel %vm999_vm7, %v8064_v1, %v3413_v30  ;;  %v9110_v32 = vrot.slane %v8026_v55, 1  ;;  %v3740_v46 = vpop.permute.xlu1 %3739  ;;  %v9124_v58 = vld [vmem:[#allocation47_spill] sm:$0xff] }
 0x3a1   :  { %v2832_v7 = vrot.slane %v8106_v3, 2  ;;  %v3415_v35 = vsel %vm1001_vm8, %v2772_v56, %v3414_v57  ;;  %v9111_v24 = vpack.c.bf16 %v7831_v38, %v7829_v43  ;;  %v9112_v40 = vunpack.c.l.bf16 %v7833_v60  ;;  %v9117_v43 = vld [vmem:[#allocation34_spill] sm:$0xff]  ;;  %v9123_v56 = vld [vmem:[#allocation44_spill] sm:$0xff]  ;;  %v9133_v57 = vld [vmem:[#allocation49_spill] sm:$0xff] }
 0x3a2   :  { %v2791_v48 = vadd.f32 %v9109_v12, %v8061_v23  ;;  %v2709_v59 = vadd.f32 %v9110_v32, %v8026_v55  ;;  %v2751_v23 = vadd.f32 %v2750_v31, %v8051_v29  ;;  %v3416_v1 = vsel %vm1003_vm9, %v2814_v19, %v3415_v35  ;;  %v9114_v55 = vld [vmem:[#allocation28_spill] sm:$0xff] }
 0x3a3   :  { %5700 = vmatpush3.bf16.msra.mxu1 %v9111_v24  ;;  %v3777_v51 = vmul.f32 %v3733_v52, %v9112_v40  ;;  %v2833_v49 = vadd.f32 %v2832_v7, %v8106_v3  ;;  %v3431_v34 = vsel %vm991_vm3, %v9114_v55, %v9113_v36  ;;  %v9115_v17 = vunpack.c.h.bf16 %v7833_v60  ;;  %3579 = vmatmul.mubr.f32.vlgmr.msra.gmra.mrb[8].mxu0 %v3416_v1  ;;  %v9132_v19 = vld [vmem:[#allocation48_spill] sm:$0xff]  ;;  %v9138_v36 = vld [vmem:[#allocation62_spill] sm:$0xff] }
 0x3a4   :  { %v2792_v0 = vrot.slane %v2791_v48, 1  ;;  %v9118_v38 = vpack.c.bf16 %v9116_v47, %v9117_v43  ;;  %v3804_v29 = vadd.f32 %v3803_v21, %v8089_v2  ;;  %v3432_v3 = vsel %vm993_vm4, %v9119_v37, %v3431_v34  ;;  %v9140_v34 = vld [vmem:[#allocation50_spill] sm:$0xff] }
 0x3a5   :  { %v3778_v27 = vmul.f32 %v3733_v52, %v9115_v17  ;;  %v9121_v25 = vunpack.c.h.bf16 %v9120_v61  ;;  %v2834_v11 = vrot.slane %v2833_v49, 1  ;;  %v3433_v60 = vsel %vm995_vm5, %v9122_v20, %v3432_v3  ;;  %v9141_v17 = vld [vmem:[#allocation35_spill] sm:$0xff] }
 0x3a6   :  { %5702 = vmatprep.subr.bf16.mxu1 %v9118_v38  ;;  %v2793_v5 = vadd.f32 %v2792_v0, %v2791_v48  ;;  %v3849_v18 = vrot.slane %v3777_v51, 4  ;;  %v9125_v8 = vpack.c.bf16 %v9123_v56, %v9124_v58  ;;  %v3434_v2 = vsel %vm997_vm6, %v2709_v59, %v3433_v60 }
 0x3a7   :  { %v3780_v14 = vmul.f32 %v3733_v52, %v9121_v25  ;;  %v3855_v28 = vrot.slane %v3778_v27, 4  ;;  %v9126_v21 = vunpack.c.l.bf16 %v9120_v61  ;;  %v9129_v63 = vpack.c.bf16 %v9127_v13, %v9128_v33  ;;  %v9144_v25 = vld [vmem:[#allocation51_spill] sm:$0xff]  ;;  %v3674_v13 = vld [vmem:[#allocation5 + $0x48] sm:$0xff] }
 0x3a8   :  { %5732 = vmatpush3.bf16.msra.mxu0 %v9125_v8  ;;  %v9131_v31 = vunpack.c.l.bf16 %v9130_v62  ;;  %v2835_v42 = vadd.f32 %v2834_v11, %v2833_v49  ;;  %v3435_v30 = vsel %vm999_vm7, %v2751_v23, %v3434_v2  ;;  %v3850_v12 = vadd.f32 %v3849_v18, %v3777_v51  ;;  %v9136_v51 = vld [vmem:[#allocation41_spill] sm:$0xff] }
 0x3a9   :  { %v3779_v39 = vmul.f32 %v3733_v52, %v9126_v21  ;;  %v3867_v54 = vrot.slane %v3780_v14, 4  ;;  %5704 = vmatpush3.bf16.msra.mxu1 %v9129_v63  ;;  %v3856_v48 = vadd.f32 %v3855_v28, %v3778_v27  ;;  %v9134_v32 = vpack.c.bf16 %v9132_v19, %v9133_v57  ;;  %v9146_v28 = vld [vmem:[#allocation55_spill] sm:$0xff]  ;;  %v3747_v57 = vpop.permute.xlu1 %3746 }
 0x3aa   :  { %v3781_v26 = vmul.f32 %v3740_v46, %v9131_v31  ;;  %v3810_v52 = vadd.f32 %v3809_v44, %v8095_v50  ;;  %v3816_v59 = vadd.f32 %v3815_v4, %v8099_v10  ;;  %v3436_v7 = vsel %vm1001_vm8, %v2793_v5, %v3435_v30 }
 0x3ab   :  { %5706 = vmatprep.subr.bf16.mxu1 %v9134_v32  ;;  %v9135_v35 = vunpack.c.h.bf16 %v9130_v62  ;;  %v3437_v23 = vsel %vm1003_vm9, %v2835_v42, %v3436_v7  ;;  %v3851_v0 = vrot.slane %v3850_v12, 2  ;;  %v3868_v40 = vadd.f32 %v3867_v54, %v3780_v14 }
 0x3ac   :  { %v9137_v1 = vunpack.c.h.bf16 %v9136_v51  ;;  %v9139_v55 = vrot.slane %v9138_v36, 2  ;;  %v3822_v10 = vadd.f32 %v3821_v15, %v8103_v22  ;;  %3648 = vmatprep.mubr.f32.mxu1 %v3437_v23  ;;  %v3873_v44 = vrot.slane %v3781_v26, 4 }
 0x3ad   :  { %v3782_v24 = vmul.f32 %v3740_v46, %v9135_v35  ;;  %v9142_v27 = vpack.c.bf16 %v9140_v34, %v9141_v17  ;;  %v8241_v47 = vadd.f32 %v2823_v6, %v8083_v9  ;;  %v3857_v43 = vrot.slane %v3856_v48, 2 }
 0x3ae   :  { %v3784_v49 = vmul.f32 %v3740_v46, %v9137_v1  ;;  %v8230_v50 = vadd.f32 %v9139_v55, %v9138_v36  ;;  %v3861_v38 = vrot.slane %v3779_v39, 4  ;;  %v3805_v37 = vrot.slane %v3804_v29, 1 }
 0x3af   :  { %v3879_v4 = vrot.slane %v3782_v24, 4  ;;  %5708 = vmatpush3.bf16.msra.mxu1 %v9142_v27  ;;  %v3811_v3 = vrot.slane %v3810_v52, 1  ;;  %v3817_v61 = vrot.slane %v3816_v59, 1  ;;  %v9143_v22 = vunpack.c.l.bf16 %v9136_v51  ;;  %v3331_v51 = vld [vmem:[#allocation13 + $0x2b0] sm:$0xff] }
 0x3b0   :  { %v3891_v5 = vrot.slane %v3784_v49, 4  ;;  %v9145_v14 = vrot.slane %v9144_v25, 1  ;;  %v3852_v20 = vadd.f32 %v3851_v0, %v3850_v12  ;;  %v3869_v60 = vrot.slane %v3868_v40, 2  ;;  %v9148_v12 = vld [vmem:[#allocation36_spill] sm:$0xff]  ;;  %v4348_v0 = vld [vmem:[#allocation14 + $0x98] sm:$0xff] }
 0x3b1   :  { %v3783_v15 = vmul.f32 %v3740_v46, %v9143_v22  ;;  %v3874_v18 = vadd.f32 %v3873_v44, %v3781_v26  ;;  %v9147_v9 = vrot.slane %v9146_v28, 1  ;;  %v3823_v58 = vrot.slane %v3822_v10, 1  ;;  %v4332_v44 = vld [vmem:[#allocation14 + $0x18] sm:$0xff]  ;;  %v3726_v22 = vpop.permute.xlu0 %3725 }
 0x3b2   :  { %v8248_v11 = vadd.f32 %v9145_v14, %v9144_v25  ;;  %v3880_v8 = vadd.f32 %v3879_v4, %v3782_v24  ;;  %v3858_v46 = vadd.f32 %v3857_v43, %v3856_v48  ;;  %v8257_v21 = vadd.f32 %v3861_v38, %v3779_v39  ;;  %v3667_v4 = vld [vmem:[#allocation5 + $0x10] sm:$0xff]  ;;  %v3668_v38 = vld [vmem:[#allocation5 + $0x18] sm:$0xff] }
 0x3b3   :  { %v8253_v6 = vadd.f32 %v9147_v9, %v9146_v28  ;;  %v3892_v54 = vadd.f32 %v3891_v5, %v3784_v49  ;;  %v8259_v33 = vadd.f32 %v3805_v37, %v3804_v29  ;;  %v8261_v63 = vadd.f32 %v3811_v3, %v3810_v52  ;;  %v4347_v29 = vld [vmem:[#allocation14 + $0x90] sm:$0xff] }
 0x3b4   :  { %v8263_v62 = vadd.f32 %v3817_v61, %v3816_v59  ;;  %v3885_v31 = vrot.slane %v3783_v15, 4  ;;  %v3853_v26 = vrot.slane %v3852_v20, 1  ;;  %v3870_v42 = vadd.f32 %v3869_v60, %v3868_v40  ;;  %v3332_v40 = vld [vmem:[#allocation13 + $0x2b8] sm:$0xff] }
 0x3b5   :  { %v3875_v30 = vrot.slane %v3874_v18, 2  ;;  %v3698_v19 = vunpack.c.h.bf16 %v9148_v12  ;;  %v8266_v32 = vadd.f32 %v3823_v58, %v3822_v10  ;;  %v3881_v48 = vrot.slane %v3880_v8, 2  ;;  %v4331_v10 = vld [vmem:[#allocation14 + $0x10] sm:$0xff] }
 0x3b6   :  { %v3700_v39 = vunpack.c.h.bf16 %v3674_v13  ;;  %v9149_v7 = vunpack.c.l.bf16 %v9148_v12  ;;  %v3859_v24 = vrot.slane %v3858_v46, 1  ;;  %v3893_v59 = vrot.slane %v3892_v54, 2 }
 0x3b7   :  { %v3786_v23 = vmul.f32 %v3747_v57, %v3698_v19  ;;  %v8271_v1 = vadd.f32 %v3885_v31, %v3783_v15  ;;  %v3699_v49 = vunpack.c.l.bf16 %v3674_v13  ;;  %v8273_v34 = vadd.f32 %v3853_v26, %v3852_v20 }
 0x3b8   :  { %v3785_v35 = vmul.f32 %v3747_v57, %v9149_v7  ;;  %v3788_v36 = vmul.f32 %v3747_v57, %v3700_v39  ;;  %v3871_v17 = vrot.slane %v3870_v42, 1  ;;  %v3876_v27 = vadd.f32 %v3875_v30, %v3874_v18 }
 0x3b9   :  { %v3903_v43 = vrot.slane %v3786_v23, 4  ;;  %v3882_v5 = vadd.f32 %v3881_v48, %v3880_v8  ;;  %v5733_v3 = vpack.c.bf16 %v4348_v0, %v4347_v29  ;;  %v5709_v61 = vpack.c.bf16 %v3332_v40, %v3331_v51  ;;  %v3315_v51 = vld [vmem:[#allocation13 + $0x230] sm:$0xff]  ;;  %v3316_v40 = vld [vmem:[#allocation13 + $0x238] sm:$0xff] }
 0x3ba   :  { %v3897_v55 = vrot.slane %v3785_v35, 4  ;;  %v3894_v25 = vadd.f32 %v3893_v59, %v3892_v54  ;;  %v3915_v15 = vrot.slane %v3788_v36, 4  ;;  %v5735_v14 = vpack.c.bf16 %v4332_v44, %v4331_v10 }
 0x3bb   :  { %v3685_v60 = vunpack.c.l.bf16 %v3667_v4  ;;  %v8275_v28 = vadd.f32 %v3859_v24, %v3858_v46  ;;  %v3787_v9 = vmul.f32 %v3747_v57, %v3699_v49  ;;  %5734 = vmatprep.subr.bf16.mxu0 %v5733_v3  ;;  %5710 = vmatprep.subr.bf16.mxu1 %v5709_v61  ;;  %v3686_v20 = vunpack.c.h.bf16 %v3667_v4  ;;  %v3676_v61 = vld [vmem:[#allocation5 + $0x58] sm:$0xff] }
 0x3bc   :  { %v3898_v37 = vadd.f32 %v3897_v55, %v3785_v35  ;;  %v3687_v58 = vunpack.c.l.bf16 %v3668_v38  ;;  %v3877_v13 = vrot.slane %v3876_v27, 1  ;;  %v3904_v18 = vadd.f32 %v3903_v43, %v3786_v23  ;;  %5736 = vmatpush3.bf16.msra.mxu0 %v5735_v14 }
 0x3bd   :  { %v3688_v31 = vunpack.c.h.bf16 %v3668_v38  ;;  %v3773_v8 = vmul.f32 %v3726_v22, %v3685_v60  ;;  %v3883_v26 = vrot.slane %v3882_v5, 1  ;;  %v3774_v12 = vmul.f32 %v3726_v22, %v3686_v20 }
 0x3be   :  { %v3899_v30 = vrot.slane %v3898_v37, 2  ;;  %v3775_v19 = vmul.f32 %v3726_v22, %v3687_v58  ;;  %v3895_v54 = vrot.slane %v3894_v25, 1  ;;  %v3916_v48 = vadd.f32 %v3915_v15, %v3788_v36  ;;  %v3675_v36 = vld [vmem:[#allocation5 + $0x50] sm:$0xff] }
 0x3bf   :  { %v3776_v39 = vmul.f32 %v3726_v22, %v3688_v31  ;;  %v3825_v7 = vrot.slane %v3773_v8, 4  ;;  %v3909_v57 = vrot.slane %v3787_v9, 4  ;;  %v3831_v35 = vrot.slane %v3774_v12, 4  ;;  %v3754_v31 = vpop.permute.xlu1 %3753 }
 0x3c0   :  { %v3837_v29 = vrot.slane %v3775_v19, 4  ;;  %v8278_v24 = vadd.f32 %v3871_v17, %v3870_v42  ;;  %v3905_v59 = vrot.slane %v3904_v18, 2  ;;  %v8280_v49 = vadd.f32 %v3877_v13, %v3876_v27 }
 0x3c1   :  { %v3826_v23 = vadd.f32 %v3825_v7, %v3773_v8  ;;  %v3843_v0 = vrot.slane %v3776_v39, 4  ;;  %v3900_v55 = vadd.f32 %v3899_v30, %v3898_v37  ;;  %v3832_v10 = vadd.f32 %v3831_v35, %v3774_v12  ;;  %v8289_v7 = vpop.f32.mrb[4].mxu0 }
 0x3c2   :  { %v3838_v44 = vadd.f32 %v3837_v29, %v3775_v19  ;;  %v8282_v4 = vadd.f32 %v3883_v26, %v3882_v5  ;;  %v8284_v43 = vadd.f32 %v3895_v54, %v3894_v25  ;;  %v3917_v38 = vrot.slane %v3916_v48, 2  ;;  %9151 = vst [vmem:[#allocation38_spill] sm:$0xff] %v8289_v7 }
 0x3c3   :  { %v3844_v3 = vadd.f32 %v3843_v0, %v3776_v39  ;;  %v8286_v42 = vadd.f32 %v3909_v57, %v3787_v9  ;;  %v3827_v17 = vrot.slane %v3826_v23, 2  ;;  %v5711_v15 = vpack.c.bf16 %v3316_v40, %v3315_v51  ;;  %v4349_v39 = vld [vmem:[#allocation14 + $0xa0] sm:$0xff]  ;;  %v8291_v57 = vpop.f32.mrb[4].mxu1  ;;  %v3761_v56 = vpop.permute.xlu1 %3760 }
 0x3c4   :  { %v3839_v22 = vrot.slane %v3838_v44, 2  ;;  %v3906_v14 = vadd.f32 %v3905_v59, %v3904_v18  ;;  %v3833_v60 = vrot.slane %v3832_v10, 2  ;;  %v3701_v27 = vunpack.c.l.bf16 %v3675_v36  ;;  %v4350_v18 = vld [vmem:[#allocation14 + $0xa8] sm:$0xff]  ;;  %9152 = vst [vmem:[#allocation54_spill] sm:$0xff] %v8291_v57  ;;  %v3333_v51 = vld [vmem:[#allocation13 + $0x2c0] sm:$0xff]  ;;  %v8295_v40 = vpop.f32.mrb[5].mxu1 }
 0x3c5   :  { %9150 = vst [vmem:[#allocation59_spill] sm:$0xff] %v8286_v42  ;;  %v3702_v20 = vunpack.c.h.bf16 %v3675_v36  ;;  %v3901_v37 = vrot.slane %v3900_v55, 1  ;;  %v3845_v13 = vrot.slane %v3844_v3, 2  ;;  %5712 = vmatpush3.bf16.msra.mxu1 %v5711_v15  ;;  %v3704_v5 = vunpack.c.h.bf16 %v3676_v61  ;;  %9154 = vst [vmem:[#allocation66_spill] sm:$0xff] %v8295_v40  ;;  %v3677_v9 = vld [vmem:[#allocation5 + $0x60] sm:$0xff] }
 0x3c6   :  { %v3840_v58 = vadd.f32 %v3839_v22, %v3838_v44  ;;  %v3918_v25 = vadd.f32 %v3917_v38, %v3916_v48  ;;  %v3703_v8 = vunpack.c.l.bf16 %v3676_v61  ;;  %v3789_v26 = vmul.f32 %v3754_v31, %v3701_v27  ;;  %v8293_v48 = vpop.f32.mrb[5].mxu0  ;;  %v3334_v61 = vld [vmem:[#allocation13 + $0x2c8] sm:$0xff] }
 0x3c7   :  { %v3790_v30 = vmul.f32 %v3754_v31, %v3702_v20  ;;  %v3828_v12 = vadd.f32 %v3827_v17, %v3826_v23  ;;  %v3792_v54 = vmul.f32 %v3754_v31, %v3704_v5  ;;  %v3907_v35 = vrot.slane %v3906_v14, 1  ;;  %9153 = vst [vmem:[#allocation61_spill] sm:$0xff] %v8293_v48  ;;  %v4333_v17 = vld [vmem:[#allocation14 + $0x20] sm:$0xff]  ;;  %v4334_v22 = vld [vmem:[#allocation14 + $0x28] sm:$0xff]  ;;  %v3768_v57 = vpop.permute.xlu1 %3767 }
 0x3c8   :  { %v3841_v19 = vrot.slane %v3840_v58, 1  ;;  %v3834_v29 = vadd.f32 %v3833_v60, %v3832_v10  ;;  %v3921_v59 = vrot.slane %v3789_v26, 4  ;;  %v8297_v44 = vadd.f32 %v3901_v37, %v3900_v55  ;;  %v3317_v10 = vld [vmem:[#allocation13 + $0x240] sm:$0xff]  ;;  %v3318_v60 = vld [vmem:[#allocation13 + $0x248] sm:$0xff] }
 0x3c9   :  { %v3927_v0 = vrot.slane %v3790_v30, 4  ;;  %v3846_v36 = vadd.f32 %v3845_v13, %v3844_v3  ;;  %v3939_v38 = vrot.slane %v3792_v54, 4  ;;  %v3919_v15 = vrot.slane %v3918_v25, 1 }
 0x3ca   :  { %v3842_v23 = vadd.f32 %v3841_v19, %v3840_v58  ;;  %v3791_v27 = vmul.f32 %v3754_v31, %v3703_v8  ;;  %v3922_v20 = vadd.f32 %v3921_v59, %v3789_v26  ;;  %v3829_v46 = vrot.slane %v3828_v12, 1  ;;  %v3678_v58 = vld [vmem:[#allocation5 + $0x68] sm:$0xff] }
 0x3cb   :  { %v3928_v5 = vadd.f32 %v3927_v0, %v3790_v30  ;;  %v3940_v55 = vadd.f32 %v3939_v38, %v3792_v54  ;;  %v5737_v37 = vpack.c.bf16 %v4350_v18, %v4349_v39  ;;  %v3835_v3 = vrot.slane %v3834_v29, 1  ;;  %v4352_v38 = vld [vmem:[#allocation14 + $0xb8] sm:$0xff] }
 0x3cc   :  { %v8301_v52 = vsel %vm991_vm3, %v3842_v23, %v8263_v62  ;;  %v3923_v13 = vrot.slane %v3922_v20, 2  ;;  %v5713_v19 = vpack.c.bf16 %v3334_v61, %v3333_v51  ;;  %v5739_v2 = vpack.c.bf16 %v4334_v22, %v4333_v17  ;;  %v4351_v23 = vld [vmem:[#allocation14 + $0xb0] sm:$0xff] }
 0x3cd   :  { %9155 = vst [vmem:[#allocation74_spill] sm:$0xff] %v8301_v52  ;;  %v8303_v40 = vadd.f32 %v3907_v35, %v3906_v14  ;;  %v3847_v31 = vrot.slane %v3846_v36, 1  ;;  %5738 = vmatprep.subr.bf16.mxu0 %v5737_v37  ;;  %v5715_v8 = vpack.c.bf16 %v3318_v60, %v3317_v10  ;;  %v3705_v26 = vunpack.c.l.bf16 %v3677_v9  ;;  %v3335_v22 = vld [vmem:[#allocation13 + $0x2d0] sm:$0xff]  ;;  %v3336_v10 = vld [vmem:[#allocation13 + $0x2d8] sm:$0xff] }
 0x3ce   :  { %v3929_v30 = vrot.slane %v3928_v5, 2  ;;  %v3933_v59 = vrot.slane %v3791_v27, 4  ;;  %5714 = vmatprep.subr.bf16.mxu1 %v5713_v19  ;;  %5740 = vmatpush3.bf16.msra.mxu0 %v5739_v2  ;;  %v3706_v62 = vunpack.c.h.bf16 %v3677_v9  ;;  %v3707_v0 = vunpack.c.l.bf16 %v3678_v58  ;;  %v4335_v60 = vld [vmem:[#allocation14 + $0x30] sm:$0xff] }
 0x3cf   :  { %v8305_v54 = vadd.f32 %v3919_v15, %v3918_v25  ;;  %v3941_v39 = vrot.slane %v3940_v55, 2  ;;  %5716 = vmatpush3.bf16.msra.mxu1 %v5715_v8  ;;  %v3708_v18 = vunpack.c.h.bf16 %v3678_v58  ;;  %v3793_v51 = vmul.f32 %v3761_v56, %v3705_v26  ;;  %v4336_v15 = vld [vmem:[#allocation14 + $0x38] sm:$0xff]  ;;  %v3319_v19 = vld [vmem:[#allocation13 + $0x250] sm:$0xff] }
 0x3d0   :  { %v3830_v14 = vadd.f32 %v3829_v46, %v3828_v12  ;;  %v8307_v35 = vadd.f32 %v3835_v3, %v3834_v29  ;;  %v3924_v61 = vadd.f32 %v3923_v13, %v3922_v20  ;;  %v3794_v17 = vmul.f32 %v3761_v56, %v3706_v62  ;;  %v3320_v8 = vld [vmem:[#allocation13 + $0x258] sm:$0xff]  ;;  %v3679_v29 = vld [vmem:[#allocation5 + $0x70] sm:$0xff] }
 0x3d1   :  { %v8309_v37 = vadd.f32 %v3847_v31, %v3846_v36  ;;  %v3795_v2 = vmul.f32 %v3761_v56, %v3707_v0  ;;  %v3796_v9 = vmul.f32 %v3761_v56, %v3708_v18  ;;  %v3945_v25 = vrot.slane %v3793_v51, 4  ;;  %v3680_v36 = vld [vmem:[#allocation5 + $0x78] sm:$0xff] }
 0x3d2   :  { %v8311_v58 = vadd.f32 %v3929_v30, %v3928_v5  ;;  %v8313_v26 = vadd.f32 %v3933_v59, %v3791_v27  ;;  %v3951_v46 = vrot.slane %v3794_v17, 4  ;;  %v5741_v12 = vpack.c.bf16 %v4352_v38, %v4351_v23  ;;  %v4353_v23 = vld [vmem:[#allocation14 + $0xc0] sm:$0xff]  ;;  %v4354_v38 = vld [vmem:[#allocation14 + $0xc8] sm:$0xff] }
 0x3d3   :  { %v8315_v20 = vadd.f32 %v3941_v39, %v3940_v55  ;;  %v3946_v3 = vadd.f32 %v3945_v25, %v3793_v51  ;;  %v3963_v13 = vrot.slane %v3796_v9, 4  ;;  %v5717_v62 = vpack.c.bf16 %v3336_v10, %v3335_v22  ;;  %v3340_v22 = vld [vmem:[#allocation13 + $0x2f8] sm:$0xff] }
 0x3d4   :  { %9156 = vst [vmem:[#allocation67_spill] sm:$0xff] %v8313_v26  ;;  %v3925_v31 = vrot.slane %v3924_v61, 1  ;;  %v3952_v0 = vadd.f32 %v3951_v46, %v3794_v17  ;;  %5742 = vmatprep.subr.bf16.mxu0 %v5741_v12  ;;  %v5743_v56 = vpack.c.bf16 %v4336_v15, %v4335_v60  ;;  %v5719_v18 = vpack.c.bf16 %v3320_v8, %v3319_v19  ;;  %v3337_v17 = vld [vmem:[#allocation13 + $0x2e0] sm:$0xff]  ;;  %v3338_v15 = vld [vmem:[#allocation13 + $0x2e8] sm:$0xff] }
 0x3d5   :  { %v3947_v48 = vrot.slane %v3946_v3, 2  ;;  %v3957_v5 = vrot.slane %v3795_v2, 4  ;;  %5718 = vmatprep.subr.bf16.mxu1 %v5717_v62  ;;  %v3709_v27 = vunpack.c.l.bf16 %v3679_v29  ;;  %v3710_v30 = vunpack.c.h.bf16 %v3679_v29  ;;  %v4337_v19 = vld [vmem:[#allocation14 + $0x40] sm:$0xff]  ;;  %v4338_v8 = vld [vmem:[#allocation14 + $0x48] sm:$0xff] }
 0x3d6   :  { %v8319_v59 = vsel %vm991_vm3, %v3830_v14, %v8259_v33  ;;  %v3953_v55 = vrot.slane %v3952_v0, 2  ;;  %v3964_v39 = vadd.f32 %v3963_v13, %v3796_v9  ;;  %5744 = vmatpush3.bf16.msra.mxu0 %v5743_v56  ;;  %5720 = vmatpush3.bf16.msra.mxu1 %v5719_v18  ;;  %v3712_v51 = vunpack.c.h.bf16 %v3680_v36  ;;  %v3321_v12 = vld [vmem:[#allocation13 + $0x260] sm:$0xff]  ;;  %v3322_v29 = vld [vmem:[#allocation13 + $0x268] sm:$0xff]  ;;  %v4355_v13 = vld [vmem:[#allocation14 + $0xd0] sm:$0xff] }
 0x3d7   :  { %v3797_v60 = vmul.f32 %v3768_v57, %v3709_v27  ;;  %v3798_v25 = vmul.f32 %v3768_v57, %v3710_v30  ;;  %v8323_v46 = vadd.f32 %v3925_v31, %v3924_v61  ;;  %v3711_v14 = vunpack.c.l.bf16 %v3680_v36  ;;  %v4356_v27 = vld [vmem:[#allocation14 + $0xd8] sm:$0xff]  ;;  %v3339_v30 = vld [vmem:[#allocation13 + $0x2f0] sm:$0xff]  ;;  %v4341_v26 = vld [vmem:[#allocation14 + $0x60] sm:$0xff] }
 0x3d8   :  { %v3800_v9 = vmul.f32 %v3768_v57, %v3712_v51  ;;  %v8326_v62 = vadd.f32 %v3947_v48, %v3946_v3  ;;  %v8328_v56 = vadd.f32 %v3957_v5, %v3795_v2  ;;  %v8330_v7 = vadd.f32 %v3953_v55, %v3952_v0  ;;  %v4339_v33 = vld [vmem:[#allocation14 + $0x50] sm:$0xff]  ;;  %v4340_v36 = vld [vmem:[#allocation14 + $0x58] sm:$0xff]  ;;  %v4357_v5 = vld [vmem:[#allocation14 + $0xe0] sm:$0xff] }
 0x3d9   :  { %v3969_v18 = vrot.slane %v3797_v60, 4  ;;  %v3975_v10 = vrot.slane %v3798_v25, 4  ;;  %v3965_v61 = vrot.slane %v3964_v39, 2  ;;  %v5745_v52 = vpack.c.bf16 %v4354_v38, %v4353_v23  ;;  %v3323_v51 = vld [vmem:[#allocation13 + $0x270] sm:$0xff]  ;;  %v3324_v2 = vld [vmem:[#allocation13 + $0x278] sm:$0xff]  ;;  %v4342_v23 = vld [vmem:[#allocation14 + $0x68] sm:$0xff] }
 0x3da   :  { %9157 = vst [vmem:[#allocation68_spill] sm:$0xff] %v8328_v56  ;;  %v3987_v31 = vrot.slane %v3800_v9, 4  ;;  %v5721_v48 = vpack.c.bf16 %v3338_v15, %v3337_v17  ;;  %v5747_v3 = vpack.c.bf16 %v4338_v8, %v4337_v19  ;;  %v8334_v53 = vmul.f32 %v3768_v57, %v3711_v14  ;;  %v4377_v38 = vld [vmem:[#allocation14 + $0x180] sm:$0xff]  ;;  %v4362_v19 = vld [vmem:[#allocation14 + $0x108] sm:$0xff] }
 0x3db   :  { %v3970_v16 = vadd.f32 %v3969_v18, %v3797_v60  ;;  %v8332_v41 = vadd.f32 %v3975_v10, %v3798_v25  ;;  %5746 = vmatprep.subr.bf16.mxu0 %v5745_v52  ;;  %v5723_v0 = vpack.c.bf16 %v3322_v29, %v3321_v12  ;;  %v5749_v55 = vpack.c.bf16 %v4356_v27, %v4355_v13  ;;  %v4378_v25 = vld [vmem:[#allocation14 + $0x188] sm:$0xff]  ;;  %v4361_v15 = vld [vmem:[#allocation14 + $0x100] sm:$0xff]  ;;  %v4360_v12 = vld [vmem:[#allocation14 + $0xf8] sm:$0xff] }
 0x3dc   :  { %v8336_v56 = vadd.f32 %v3987_v31, %v3800_v9  ;;  %v3949_v42 = vrot.slane %v8326_v62, 1  ;;  %5722 = vmatprep.subr.bf16.mxu1 %v5721_v48  ;;  %5748 = vmatpush3.bf16.msra.mxu0 %v5747_v3  ;;  %v5725_v17 = vpack.c.bf16 %v3340_v22, %v3339_v30  ;;  %v5751_v10 = vpack.c.bf16 %v4340_v36, %v4339_v33  ;;  %v4359_v9 = vld [vmem:[#allocation14 + $0xf0] sm:$0xff]  ;;  %v9161_v30 = vld [vmem:[#allocation32_spill] sm:$0xff]  ;;  %v4344_v31 = vld [vmem:[#allocation14 + $0x78] sm:$0xff] }
 0x3dd   :  { %v3971_v60 = vrot.slane %v3970_v16, 2  ;;  %v3966_v57 = vadd.f32 %v3965_v61, %v3964_v39  ;;  %v3977_v8 = vrot.slane %v8332_v41, 2  ;;  %5724 = vmatpush3.bf16.msra.mxu1 %v5723_v0  ;;  %5750 = vmatprep.subr.bf16.mxu0 %v5749_v55  ;;  %v5727_v52 = vpack.c.bf16 %v3324_v2, %v3323_v51  ;;  %v4343_v29 = vld [vmem:[#allocation14 + $0x70] sm:$0xff]  ;;  %v4380_v36 = vld [vmem:[#allocation14 + $0x198] sm:$0xff]  ;;  %v8350_v51 = vpop.f32.mrb[6].mxu0  ;;  %v9163_v3 = vld [vmem:[#allocation53_spill] sm:$0xff] }
 0x3de   :  { %v5753_v14 = vpack.c.bf16 %v4358_v45, %v4357_v5  ;;  %v3989_v13 = vrot.slane %v8336_v56, 2  ;;  %5726 = vmatprep.subr.bf16.mxu1 %v5725_v17  ;;  %v9158_v22 = vrot.slane %v8230_v50, 1  ;;  %v9159_v18 = vrot.slane %v8241_v47, 2  ;;  %v9160_v27 = vld [vmem:[#allocation30_spill] sm:$0xff]  ;;  %9162 = vst [vmem:[#allocation52_spill] sm:$0xff] %v8350_v51  ;;  %v4364_v55 = vld [vmem:[#allocation14 + $0x118] sm:$0xff] }
 0x3df   :  { %v3425_v61 = vsel %vm993_vm4, %v9161_v30, %v9160_v27  ;;  %v4379_v45 = vld [vmem:[#allocation14 + $0x190] sm:$0xff]  ;;  %v8352_v48 = vadd.f32 %v3971_v60, %v3970_v16  ;;  %v5755_v5 = vpack.c.bf16 %v4342_v23, %v4341_v26  ;;  %v5757_v27 = vpack.c.bf16 %v4360_v12, %v4359_v9  ;;  %v4001_v30 = vld [vmem:[#allocation7] sm:$0xff]  ;;  %v4376_v51 = vld [vmem:[#allocation14 + $0x178] sm:$0xff] }
 0x3e0   :  { %v2786_v33 = vadd.f32 %v9158_v22, %v8230_v50  ;;  %v2826_v39 = vadd.f32 %v9159_v18, %v8241_v47  ;;  %v3426_v2 = vsel %vm995_vm5, %v9163_v3, %v3425_v61  ;;  %v5761_v50 = vpack.c.bf16 %v4378_v25, %v4377_v38  ;;  %v8356_v0 = vld [vmem:[#allocation14 + $0x110] sm:$0xff]  ;;  %v8358_v47 = vpop.f32.mrb[7].mxu0  ;;  %5752 = vmatpush3.bf16.msra.mxu0 %v5751_v10 }
 0x3e1   :  { %9164 = vst [vmem:[#allocation57_spill] sm:$0xff] %v8358_v47  ;;  %v3427_v22 = vsel %vm997_vm6, %v8248_v11, %v3426_v2  ;;  %v5763_v18 = vpack.c.bf16 %v4362_v19, %v4361_v15  ;;  %5728 = vmatpush3.bf16.msra.mxu1 %v5727_v52  ;;  %5754 = vmatprep.subr.bf16.mxu0 %v5753_v14  ;;  %v3955_v23 = vrot.slane %v8330_v7, 1  ;;  %v9165_v11 = vrot.slane %v8311_v58, 1  ;;  %v4629_v47 = vld [vmem:[#allocation16 + $0xc8] sm:$0xff] }
 0x3e2   :  { %v2827_v17 = vrot.slane %v2826_v39, 1  ;;  %v3428_v16 = vsel %vm999_vm7, %v8253_v6, %v3427_v22  ;;  %v5759_v60 = vpack.c.bf16 %v4344_v31, %v4343_v29  ;;  %v5765_v26 = vpack.c.bf16 %v4380_v36, %v4379_v45  ;;  %5762 = vmatprep.subr.bf16.mxu1 %v5761_v50  ;;  %v4366_v31 = vld [vmem:[#allocation14 + $0x128] sm:$0xff]  ;;  %v4620_v45 = vld [vmem:[#allocation16 + $0x80] sm:$0xff]  ;;  %v4383_v22 = vld [vmem:[#allocation14 + $0x1b0] sm:$0xff] }
 0x3e3   :  { %v3429_v25 = vsel %vm1001_vm8, %v2786_v33, %v3428_v16  ;;  %v5767_v10 = vpack.c.bf16 %v4364_v55, %v8356_v0  ;;  %v3932_v15 = vadd.f32 %v9165_v11, %v8311_v58  ;;  %v3956_v19 = vadd.f32 %v3955_v23, %v8330_v7  ;;  %v4621_v36 = vld [vmem:[#allocation16 + $0x88] sm:$0xff]  ;;  %v4604_v50 = vld [vmem:[#allocation16] sm:$0xff] }
 0x3e4   :  { %v2828_v38 = vadd.f32 %v2827_v17, %v2826_v39  ;;  %v3978_v52 = vadd.f32 %v3977_v8, %v8332_v41  ;;  %v4439_v6 = vsel %vm991_vm3, %v8307_v35, %v8261_v63  ;;  %v9166_v14 = vrot.slane %v8315_v20, 1  ;;  %5756 = vmatpush3.bf16.msra.mxu0 %v5755_v5  ;;  %v4605_v0 = vld [vmem:[#allocation16 + $0x8] sm:$0xff] }
 0x3e5   :  { %v4440_v29 = vsel %vm993_vm4, %v8275_v28, %v4439_v6  ;;  %v3967_v33 = vrot.slane %v3966_v57, 1  ;;  %v3990_v58 = vadd.f32 %v3989_v13, %v8336_v56  ;;  %5758 = vmatprep.subr.bf16.mxu0 %v5757_v27  ;;  %v4453_v63 = vsel %vm991_vm3, %v8309_v37, %v8266_v32  ;;  %v4381_v13 = vld [vmem:[#allocation14 + $0x1a0] sm:$0xff]  ;;  %v4002_v55 = vld [vmem:[#allocation7 + $0x8] sm:$0xff] }
 0x3e6   :  { %v3944_v9 = vadd.f32 %v9166_v14, %v8315_v20  ;;  %v3430_v12 = vsel %vm1003_vm9, %v2828_v38, %v3429_v25  ;;  %v3979_v41 = vrot.slane %v3978_v52, 1  ;;  %v4441_v7 = vsel %vm995_vm5, %v8282_v4, %v4440_v29 }
 0x3e7   :  { %3649 = vmatmul.mubr.f32.vlgmr.msra.gmra.mrb[8].mxu1 %v3430_v12  ;;  %v3950_v35 = vadd.f32 %v3949_v42, %v8326_v62  ;;  %v4442_v28 = vsel %vm997_vm6, %v8303_v40, %v4441_v7  ;;  %v3968_v20 = vadd.f32 %v3967_v33, %v3966_v57  ;;  %v3991_v56 = vrot.slane %v3990_v58, 1  ;;  %v4382_v42 = vld [vmem:[#allocation14 + $0x1a8] sm:$0xff]  ;;  %v4365_v62 = vld [vmem:[#allocation14 + $0x120] sm:$0xff] }
 0x3e8   :  { %5764 = vmatpush3.bf16.msra.mxu1 %v5763_v18  ;;  %v4454_v8 = vsel %vm993_vm4, %v8278_v24, %v4453_v63  ;;  %v3980_v4 = vadd.f32 %v3979_v41, %v3978_v52  ;;  %v4443_v39 = vsel %vm999_vm7, %v3932_v15, %v4442_v28  ;;  %v3973_v37 = vrot.slane %v8352_v48, 1  ;;  %5760 = vmatpush3.bf16.msra.mxu0 %v5759_v60  ;;  %v4384_v18 = vld [vmem:[#allocation14 + $0x1b8] sm:$0xff]  ;;  %v4003_v60 = vld [vmem:[#allocation7 + $0x10] sm:$0xff]  ;;  %v4062_v41 = vpop.permute.xlu1 %4061 }
 0x3e9   :  { %5766 = vmatprep.subr.bf16.mxu1 %v5765_v26  ;;  %v4455_v32 = vsel %vm995_vm5, %v8284_v43, %v4454_v8  ;;  %v4444_v40 = vsel %vm1001_vm8, %v3956_v19, %v4443_v39  ;;  %v3992_v57 = vadd.f32 %v3991_v56, %v3990_v58  ;;  %v4433_v61 = vsel %vm993_vm4, %v8273_v34, %v8319_v59 }
 0x3ea   :  { %v4456_v24 = vsel %vm997_vm6, %v8305_v54, %v4455_v32  ;;  %v4445_v43 = vsel %vm1003_vm9, %v3980_v4, %v4444_v40  ;;  %v3974_v2 = vadd.f32 %v3973_v37, %v8352_v48  ;;  %v4434_v5 = vsel %vm995_vm5, %v8280_v49, %v4433_v61  ;;  %v9173_v40 = vld [vmem:[#allocation68_spill] sm:$0xff] }
 0x3eb   :  { %v4457_v3 = vsel %vm999_vm7, %v3944_v9, %v4456_v24  ;;  %4528 = vmatprep.mubr.f32.mxu0 %v4445_v43  ;;  %v4435_v34 = vsel %vm997_vm6, %v8297_v44, %v4434_v5  ;;  %v5769_v59 = vpack.c.bf16 %v4382_v42, %v4381_v13  ;;  %v4017_v17 = vunpack.c.l.bf16 %v4001_v30  ;;  %v4055_v44 = vpop.permute.xlu0 %4054  ;;  %v9169_v13 = vld [vmem:[#allocation59_spill] sm:$0xff] }
 0x3ec   :  { %5768 = vmatpush3.bf16.msra.mxu1 %v5767_v10  ;;  %v4458_v54 = vsel %vm1001_vm8, %v3968_v20, %v4457_v3  ;;  %v4436_v48 = vsel %vm999_vm7, %v8323_v46, %v4435_v34  ;;  %v5771_v49 = vpack.c.bf16 %v4366_v31, %v4365_v62  ;;  %v5793_v16 = vpack.c.bf16 %v4621_v36, %v4620_v45  ;;  %v4004_v10 = vld [vmem:[#allocation7 + $0x18] sm:$0xff] }
 0x3ed   :  { %v4459_v27 = vsel %vm1003_vm9, %v3992_v57, %v4458_v54  ;;  %v4437_v26 = vsel %vm1001_vm8, %v3950_v35, %v4436_v48  ;;  %5770 = vmatprep.subr.bf16.mxu1 %v5769_v59  ;;  %v5795_v23 = vpack.c.bf16 %v4605_v0, %v4604_v50  ;;  %v4018_v38 = vunpack.c.h.bf16 %v4001_v30  ;;  %v9171_v42 = vld [vmem:[#allocation67_spill] sm:$0xff] }
 0x3ee   :  { %4598 = vmatprep.mubr.f32.mxu1 %v4459_v27  ;;  %v4019_v25 = vunpack.c.l.bf16 %v4002_v55  ;;  %v4438_v11 = vsel %vm1003_vm9, %v3974_v2, %v4437_v26  ;;  %5794 = vmatprep.subr.bf16.mxu0 %v5793_v16  ;;  %v4020_v15 = vunpack.c.h.bf16 %v4002_v55  ;;  %v4105_v19 = vmul.f32 %v4055_v44, %v4017_v17  ;;  %v4368_v16 = vld [vmem:[#allocation14 + $0x138] sm:$0xff] }
 0x3ef   :  { %v5773_v52 = vpack.c.bf16 %v4384_v18, %v4383_v22  ;;  %4529 = vmatmul.mubr.f32.vlgmr.msra.gmra.mrb[10].mxu0 %v4438_v11  ;;  %v4106_v46 = vmul.f32 %v4055_v44, %v4018_v38  ;;  %v4021_v14 = vunpack.c.l.bf16 %v4003_v60  ;;  %v4022_v9 = vunpack.c.h.bf16 %v4003_v60  ;;  %v4622_v60 = vld [vmem:[#allocation16 + $0x90] sm:$0xff] }
 0x3f0   :  { %5772 = vmatpush3.bf16.msra.mxu1 %v5771_v49  ;;  %v4107_v6 = vmul.f32 %v4055_v44, %v4019_v25  ;;  %5796 = vmatpush3.bf16.msra.mxu0 %v5795_v23  ;;  %v4108_v12 = vmul.f32 %v4055_v44, %v4020_v15  ;;  %v4137_v29 = vrot.slane %v4105_v19, 4  ;;  %v4023_v33 = vunpack.c.l.bf16 %v4004_v10  ;;  %v4367_v49 = vld [vmem:[#allocation14 + $0x130] sm:$0xff]  ;;  %v4623_v44 = vld [vmem:[#allocation16 + $0x98] sm:$0xff] }
 0x3f1   :  { %5774 = vmatprep.subr.bf16.mxu1 %v5773_v52  ;;  %v4024_v58 = vunpack.c.h.bf16 %v4004_v10  ;;  %v9167_v7 = vrot.slane %v8257_v21, 2  ;;  %v4143_v35 = vrot.slane %v4106_v46, 4  ;;  %v4109_v20 = vmul.f32 %v4062_v41, %v4021_v14  ;;  %v4607_v10 = vld [vmem:[#allocation16 + $0x18] sm:$0xff] }
 0x3f2   :  { %v4149_v28 = vrot.slane %v4107_v6, 4  ;;  %v9168_v56 = vrot.slane %v8271_v1, 2  ;;  %v9170_v4 = vrot.slane %v9169_v13, 2  ;;  %v4110_v32 = vmul.f32 %v4062_v41, %v4022_v9 }
 0x3f3   :  { %v3864_v63 = vadd.f32 %v9167_v7, %v8257_v21  ;;  %v4111_v37 = vmul.f32 %v4062_v41, %v4023_v33  ;;  %v9172_v62 = vrot.slane %v9171_v42, 2  ;;  %v3959_v57 = vrot.slane %v9173_v40, 2  ;;  %v4385_v33 = vld [vmem:[#allocation14 + $0x1c0] sm:$0xff] }
 0x3f4   :  { %v3888_v8 = vadd.f32 %v9168_v56, %v8271_v1  ;;  %v3912_v39 = vadd.f32 %v9170_v4, %v9169_v13  ;;  %v3981_v21 = vrot.slane %v8334_v53, 4  ;;  %v4112_v24 = vmul.f32 %v4062_v41, %v4024_v58  ;;  %v4386_v58 = vld [vmem:[#allocation14 + $0x1c8] sm:$0xff]  ;;  %v4008_v4 = vld [vmem:[#allocation7 + $0x38] sm:$0xff] }
 0x3f5   :  { %v3936_v30 = vadd.f32 %v9172_v62, %v9171_v42  ;;  %v4138_v61 = vadd.f32 %v4137_v29, %v4105_v19  ;;  %v4155_v31 = vrot.slane %v4108_v12, 4  ;;  %v4161_v45 = vrot.slane %v4109_v20, 4  ;;  %v4006_v29 = vld [vmem:[#allocation7 + $0x28] sm:$0xff]  ;;  %v4069_v42 = vpop.permute.xlu0 %4068 }
 0x3f6   :  { %v3865_v36 = vrot.slane %v3864_v63, 1  ;;  %v4144_v1 = vadd.f32 %v4143_v35, %v4106_v46  ;;  %v4150_v43 = vadd.f32 %v4149_v28, %v4107_v6  ;;  %v3889_v3 = vrot.slane %v3888_v8, 1  ;;  %v4005_v46 = vld [vmem:[#allocation7 + $0x20] sm:$0xff]  ;;  %v4007_v28 = vld [vmem:[#allocation7 + $0x30] sm:$0xff] }
 0x3f7   :  { %v3913_v2 = vrot.slane %v3912_v39, 1  ;;  %v4167_v5 = vrot.slane %v4110_v32, 4  ;;  %v4173_v50 = vrot.slane %v4111_v37, 4  ;;  %v3937_v0 = vrot.slane %v3936_v30, 1 }
 0x3f8   :  { %v8432_v55 = vadd.f32 %v3959_v57, %v9173_v40  ;;  %v8435_v54 = vadd.f32 %v3981_v21, %v8334_v53  ;;  %v4179_v34 = vrot.slane %v4112_v24, 4  ;;  %v4139_v59 = vrot.slane %v4138_v61, 2  ;;  %v4606_v53 = vld [vmem:[#allocation16 + $0x10] sm:$0xff] }
 0x3f9   :  { %v4156_v17 = vadd.f32 %v4155_v31, %v4108_v12  ;;  %v4162_v22 = vadd.f32 %v4161_v45, %v4109_v20  ;;  %v8437_v18 = vadd.f32 %v3865_v36, %v3864_v63  ;;  %v4145_v27 = vrot.slane %v4144_v1, 2  ;;  %v4076_v36 = vpop.permute.xlu1 %4075 }
 0x3fa   :  { %v4151_v48 = vrot.slane %v4150_v43, 2  ;;  %v8439_v26 = vadd.f32 %v3889_v3, %v3888_v8  ;;  %v8441_v23 = vadd.f32 %v3913_v2, %v3912_v39  ;;  %v4168_v38 = vadd.f32 %v4167_v5, %v4110_v32 }
 0x3fb   :  { %v4174_v25 = vadd.f32 %v4173_v50, %v4111_v37  ;;  %v8443_v11 = vadd.f32 %v3937_v0, %v3936_v30  ;;  %v3983_v19 = vrot.slane %v8435_v54, 2  ;;  %v4180_v52 = vadd.f32 %v4179_v34, %v4112_v24 }
 0x3fc   :  { %v4140_v6 = vadd.f32 %v4139_v59, %v4138_v61  ;;  %v4157_v14 = vrot.slane %v4156_v17, 2  ;;  %v4163_v9 = vrot.slane %v4162_v22, 2  ;;  %v5775_v12 = vpack.c.bf16 %v4368_v16, %v4367_v49 }
 0x3fd   :  { %v4146_v41 = vadd.f32 %v4145_v27, %v4144_v1  ;;  %v8447_v7 = vadd.f32 %v4151_v48, %v4150_v43  ;;  %v5797_v63 = vpack.c.bf16 %v4623_v44, %v4622_v60  ;;  %v5799_v35 = vpack.c.bf16 %v4607_v10, %v4606_v53 }
 0x3fe   :  { %v4169_v20 = vrot.slane %v4168_v38, 2  ;;  %v4175_v56 = vrot.slane %v4174_v25, 2  ;;  %5776 = vmatpush3.bf16.msra.mxu1 %v5775_v12  ;;  %v4025_v8 = vunpack.c.l.bf16 %v4005_v46  ;;  %v4026_v13 = vunpack.c.h.bf16 %v4005_v46 }
 0x3ff   :  { %v4181_v39 = vrot.slane %v4180_v52, 2  ;;  %5798 = vmatprep.subr.bf16.mxu0 %v5797_v63  ;;  %v4027_v32 = vunpack.c.l.bf16 %v4006_v29  ;;  %v4028_v37 = vunpack.c.h.bf16 %v4006_v29  ;;  %v5777_v62 = vpack.c.bf16 %v4386_v58, %v4385_v33 }
 0x400   :  { %v4164_v30 = vadd.f32 %v4163_v9, %v4162_v22  ;;  %5800 = vmatpush3.bf16.msra.mxu0 %v5799_v35  ;;  %v4113_v40 = vmul.f32 %v4069_v42, %v4025_v8  ;;  %v4114_v57 = vmul.f32 %v4069_v42, %v4026_v13  ;;  %v4029_v21 = vunpack.c.l.bf16 %v4007_v28  ;;  %v4369_v13 = vld [vmem:[#allocation14 + $0x140] sm:$0xff] }
 0x401   :  { %v4115_v24 = vmul.f32 %v4069_v42, %v4027_v32  ;;  %v4116_v61 = vmul.f32 %v4069_v42, %v4028_v37  ;;  %5778 = vmatprep.subr.bf16.mxu1 %v5777_v62  ;;  %v4030_v31 = vunpack.c.h.bf16 %v4007_v28  ;;  %v4031_v45 = vunpack.c.l.bf16 %v4008_v4  ;;  %v4370_v42 = vld [vmem:[#allocation14 + $0x148] sm:$0xff]  ;;  %v4624_v62 = vld [vmem:[#allocation16 + $0xa0] sm:$0xff] }
 0x402   :  { %v4185_v1 = vrot.slane %v4113_v40, 4  ;;  %v4191_v43 = vrot.slane %v4114_v57, 4  ;;  %v4032_v3 = vunpack.c.h.bf16 %v4008_v4  ;;  %v4117_v2 = vmul.f32 %v4076_v36, %v4029_v21  ;;  %v4609_v21 = vld [vmem:[#allocation16 + $0x28] sm:$0xff] }
 0x403   :  { %v4141_v5 = vrot.slane %v4140_v6, 1  ;;  %v4158_v50 = vadd.f32 %v4157_v14, %v4156_v17  ;;  %v4203_v0 = vrot.slane %v4116_v61, 4  ;;  %v4118_v34 = vmul.f32 %v4076_v36, %v4030_v31 }
 0x404   :  { %v4170_v59 = vadd.f32 %v4169_v20, %v4168_v38  ;;  %v4176_v22 = vadd.f32 %v4175_v56, %v4174_v25  ;;  %v4182_v27 = vadd.f32 %v4181_v39, %v4180_v52  ;;  %v4120_v48 = vmul.f32 %v4076_v36, %v4032_v3 }
 0x405   :  { %v4165_v49 = vrot.slane %v4164_v30, 1  ;;  %v4186_v16 = vadd.f32 %v4185_v1, %v4113_v40  ;;  %v4197_v60 = vrot.slane %v4115_v24, 4  ;;  %v4119_v44 = vmul.f32 %v4076_v36, %v4031_v45  ;;  %v4010_v36 = vld [vmem:[#allocation7 + $0x48] sm:$0xff] }
 0x406   :  { %v4147_v53 = vrot.slane %v4146_v41, 1  ;;  %v4153_v10 = vrot.slane %v8447_v7, 1  ;;  %v4192_v46 = vadd.f32 %v4191_v43, %v4114_v57  ;;  %v4209_v9 = vrot.slane %v4117_v2, 4 }
 0x407   :  { %v4142_v12 = vadd.f32 %v4141_v5, %v4140_v6  ;;  %v4159_v29 = vrot.slane %v4158_v50, 1  ;;  %v4204_v33 = vadd.f32 %v4203_v0, %v4116_v61  ;;  %v4215_v58 = vrot.slane %v4118_v34, 4  ;;  %v4387_v5 = vld [vmem:[#allocation14 + $0x1d0] sm:$0xff] }
 0x408   :  { %v4171_v17 = vrot.slane %v4170_v59, 1  ;;  %v4177_v14 = vrot.slane %v4176_v22, 1  ;;  %v4183_v63 = vrot.slane %v4182_v27, 1  ;;  %v4227_v38 = vrot.slane %v4120_v48, 4 }
 0x409   :  { %v4166_v25 = vadd.f32 %v4165_v49, %v4164_v30  ;;  %v4187_v52 = vrot.slane %v4186_v16, 2  ;;  %v8450_v35 = vadd.f32 %v4197_v60, %v4115_v24  ;;  %v4221_v28 = vrot.slane %v4119_v44, 4  ;;  %v4625_v30 = vld [vmem:[#allocation16 + $0xa8] sm:$0xff]  ;;  %v4009_v24 = vld [vmem:[#allocation7 + $0x40] sm:$0xff] }
 0x40a   :  { %v8455_v20 = vadd.f32 %v3983_v19, %v8435_v54  ;;  %v8457_v56 = vadd.f32 %v4147_v53, %v4146_v41  ;;  %v4193_v6 = vrot.slane %v4192_v46, 2  ;;  %v4210_v8 = vadd.f32 %v4209_v9, %v4117_v2  ;;  %v4608_v41 = vld [vmem:[#allocation16 + $0x20] sm:$0xff]  ;;  %v9176_v9 = vld [vmem:[#allocation27_spill] sm:$0xff] }
 0x40b   :  { %v8460_v4 = vadd.f32 %v4153_v10, %v8447_v7  ;;  %v8462_v39 = vadd.f32 %v4159_v29, %v4158_v50  ;;  %v4205_v32 = vrot.slane %v4204_v33, 2  ;;  %v4216_v37 = vadd.f32 %v4215_v58, %v4118_v34  ;;  %v4388_v50 = vld [vmem:[#allocation14 + $0x1d8] sm:$0xff]  ;;  %v4912_v53 = vld [vmem:[%s8709_s15] ss:$0 sm:$0xff] }
 0x40c   :  { %v8464_v40 = vadd.f32 %v4171_v17, %v4170_v59  ;;  %v8466_v57 = vadd.f32 %v4177_v14, %v4176_v22  ;;  %v8468_v54 = vadd.f32 %v4183_v63, %v4182_v27  ;;  %v4228_v19 = vadd.f32 %v4227_v38, %v4120_v48  ;;  %v4011_v27 = vld [vmem:[#allocation7 + $0x50] sm:$0xff]  ;;  %v4012_v10 = vld [vmem:[#allocation7 + $0x58] sm:$0xff]  ;;  %v9179_v58 = vld [vmem:[#allocation56_spill] sm:$0xff] }
 0x40d   :  { %9174 = vst [vmem:[#allocation71_spill] sm:$0xff] %v8460_v4  ;;  %v8471_v7 = vsel %vm991_vm3, %v4166_v25, %v4142_v12  ;;  %v8473_v61 = vadd.f32 %v4187_v52, %v4186_v16  ;;  %v4199_v31 = vrot.slane %v8450_v35, 2  ;;  %v8476_v45 = vadd.f32 %v4221_v28, %v4119_v44  ;;  %v4083_v44 = vpop.permute.xlu0 %4082  ;;  %v9177_v12 = vld [vmem:[#allocation31_spill] sm:$0xff]  ;;  %v4628_v4 = vld [vmem:[#allocation16 + $0xc0] sm:$0xff] }
 0x40e   :  { %9175 = vst [vmem:[#allocation65_spill] sm:$0xff] %v8466_v57  ;;  %v8478_v1 = vadd.f32 %v4193_v6, %v4192_v46  ;;  %v4211_v43 = vrot.slane %v4210_v8, 2  ;;  %v5779_v3 = vpack.c.bf16 %v4370_v42, %v4369_v13  ;;  %v5801_v2 = vpack.c.bf16 %v4625_v30, %v4624_v62  ;;  %v4374_v57 = vld [vmem:[#allocation14 + $0x168] sm:$0xff] }
 0x40f   :  { %v8480_v0 = vadd.f32 %v4205_v32, %v4204_v33  ;;  %v4217_v34 = vrot.slane %v4216_v37, 2  ;;  %v5803_v59 = vpack.c.bf16 %v4609_v21, %v4608_v41  ;;  %v4033_v22 = vunpack.c.l.bf16 %v4009_v24  ;;  %v9178_v33 = vld [vmem:[#allocation29_spill] sm:$0xff]  ;;  %v4090_v21 = vpop.permute.xlu1 %4089 }
 0x410   :  { %v4229_v48 = vrot.slane %v4228_v19, 2  ;;  %5780 = vmatpush3.bf16.msra.mxu1 %v5779_v3  ;;  %5802 = vmatprep.subr.bf16.mxu0 %v5801_v2  ;;  %v4034_v49 = vunpack.c.h.bf16 %v4009_v24  ;;  %v4035_v16 = vunpack.c.l.bf16 %v4010_v36  ;;  %v4036_v60 = vunpack.c.h.bf16 %v4010_v36 }
 0x411   :  { %5804 = vmatpush3.bf16.msra.mxu0 %v5803_v59  ;;  %v4121_v46 = vmul.f32 %v4083_v44, %v4033_v22  ;;  %v5023_v29 = vadd.f32 %v9177_v12, %v9176_v9  ;;  %v5058_v17 = vadd.f32 %v9179_v58, %v9178_v33  ;;  %v5781_v14 = vpack.c.bf16 %v4388_v50, %v4387_v5 }
 0x412   :  { %v4122_v63 = vmul.f32 %v4083_v44, %v4034_v49  ;;  %v4123_v38 = vmul.f32 %v4083_v44, %v4035_v16  ;;  %v4124_v25 = vmul.f32 %v4083_v44, %v4036_v60  ;;  %v4037_v52 = vunpack.c.l.bf16 %v4011_v27 }
 0x413   :  { %v4233_v28 = vrot.slane %v4121_v46, 4  ;;  %v1372_v6 = vadd.f32 %v5023_v29, %v4912_v53  ;;  %5782 = vmatprep.subr.bf16.mxu1 %v5781_v14  ;;  %v4038_v13 = vunpack.c.h.bf16 %v4011_v27  ;;  %v4039_v32 = vunpack.c.l.bf16 %v4012_v10  ;;  %v4371_v14 = vld [vmem:[#allocation14 + $0x150] sm:$0xff] }
 0x414   :  { %v4212_v42 = vadd.f32 %v4211_v43, %v4210_v8  ;;  %v4239_v62 = vrot.slane %v4122_v63, 4  ;;  %v4251_v30 = vrot.slane %v4124_v25, 4  ;;  %v4040_v41 = vunpack.c.h.bf16 %v4012_v10 }
 0x415   :  { %v4234_v24 = vadd.f32 %v4233_v28, %v4121_v46  ;;  %v8489_v36 = vadd.f32 %v5058_v17, %v1372_v6  ;;  %v4125_v3 = vmul.f32 %v4090_v21, %v4037_v52  ;;  %v4126_v2 = vmul.f32 %v4090_v21, %v4038_v13  ;;  %v4372_v6 = vld [vmem:[#allocation14 + $0x158] sm:$0xff]  ;;  %v4626_v13 = vld [vmem:[#allocation16 + $0xb0] sm:$0xff] }
 0x416   :  { %v4218_v5 = vadd.f32 %v4217_v34, %v4216_v37  ;;  %v4230_v50 = vadd.f32 %v4229_v48, %v4228_v19  ;;  %v4240_v59 = vadd.f32 %v4239_v62, %v4122_v63  ;;  %v4245_v22 = vrot.slane %v4123_v38, 4 }
 0x417   :  { %v4252_v49 = vadd.f32 %v4251_v30, %v4124_v25  ;;  %v4127_v16 = vmul.f32 %v4090_v21, %v4039_v32  ;;  %v4128_v60 = vmul.f32 %v4090_v21, %v4040_v41  ;;  %v4257_v44 = vrot.slane %v4125_v3, 4  ;;  %v4627_v32 = vld [vmem:[#allocation16 + $0xb8] sm:$0xff]  ;;  %v4013_v41 = vld [vmem:[#allocation7 + $0x60] sm:$0xff] }
 0x418   :  { %v4189_v27 = vrot.slane %v8473_v61, 1  ;;  %v4195_v8 = vrot.slane %v8478_v1, 1  ;;  %v4223_v43 = vrot.slane %v8476_v45, 2  ;;  %v4263_v53 = vrot.slane %v4126_v2, 4  ;;  %v4611_v30 = vld [vmem:[#allocation16 + $0x38] sm:$0xff] }
 0x419   :  { %v4207_v10 = vrot.slane %v8480_v0, 1  ;;  %v4235_v46 = vrot.slane %v4234_v24, 2  ;;  %v4241_v9 = vrot.slane %v4240_v59, 2  ;;  %v4258_v12 = vadd.f32 %v4257_v44, %v4125_v3  ;;  %v8527_v44 = vld [vmem:[#allocation7 + $0x68] sm:$0xff] }
 0x41a   :  { %v4213_v37 = vrot.slane %v4212_v42, 1  ;;  %v4219_v19 = vrot.slane %v4218_v5, 1  ;;  %v4231_v34 = vrot.slane %v4230_v50, 1  ;;  %v4275_v48 = vrot.slane %v4128_v60, 4 }
 0x41b   :  { %v8498_v29 = vadd.f32 %v4199_v31, %v8450_v35  ;;  %v8500_v33 = vadd.f32 %v4245_v22, %v4123_v38  ;;  %v4253_v58 = vrot.slane %v4252_v49, 2  ;;  %v4269_v17 = vrot.slane %v4127_v16, 4 }
 0x41c   :  { %v8503_v63 = vadd.f32 %v4189_v27, %v8473_v61  ;;  %v8506_v25 = vadd.f32 %v4195_v8, %v8478_v1  ;;  %v8509_v52 = vadd.f32 %v4223_v43, %v8476_v45  ;;  %v4264_v28 = vadd.f32 %v4263_v53, %v4126_v2  ;;  %v4610_v61 = vld [vmem:[#allocation16 + $0x30] sm:$0xff]  ;;  %v4389_v27 = vld [vmem:[#allocation14 + $0x1e0] sm:$0xff]  ;;  %v4390_v8 = vld [vmem:[#allocation14 + $0x1e8] sm:$0xff] }
 0x41d   :  { %9180 = vst [vmem:[#allocation72_spill] sm:$0xff] %v8498_v29  ;;  %9181 = vst [vmem:[#allocation69_spill] sm:$0xff] %v8500_v33  ;;  %v8512_v35 = vadd.f32 %v4207_v10, %v8480_v0  ;;  %v8514_v31 = vadd.f32 %v4235_v46, %v4234_v24  ;;  %v8516_v38 = vadd.f32 %v4241_v9, %v4240_v59  ;;  %v4259_v62 = vrot.slane %v4258_v12, 2  ;;  %v8529_v59 = vpop.permute.xlu0 %4096  ;;  %v4015_v10 = vld [vmem:[#allocation7 + $0x70] sm:$0xff]  ;;  %v4633_v29 = vld [vmem:[#allocation16 + $0xe8] sm:$0xff] }
 0x41e   :  { %9182 = vst [vmem:[#allocation63_spill] sm:$0xff] %v8509_v52  ;;  %v8518_v1 = vadd.f32 %v4213_v37, %v4212_v42  ;;  %v8520_v21 = vadd.f32 %v4219_v19, %v4218_v5  ;;  %v8522_v45 = vadd.f32 %v4231_v34, %v4230_v50  ;;  %v4276_v3 = vadd.f32 %v4275_v48, %v4128_v60  ;;  %v4104_v48 = vpop.permute.xlu1 %4103  ;;  %v4615_v52 = vld [vmem:[#allocation16 + $0x58] sm:$0xff] }
 0x41f   :  { %v4254_v22 = vadd.f32 %v4253_v58, %v4252_v49  ;;  %v8525_v0 = vadd.f32 %v4269_v17, %v4127_v16  ;;  %v5783_v24 = vpack.c.bf16 %v4372_v6, %v4371_v14  ;;  %v4265_v43 = vrot.slane %v4264_v28, 2  ;;  %v4016_v16 = vld [vmem:[#allocation7 + $0x78] sm:$0xff] }
 0x420   :  { %v5805_v42 = vpack.c.bf16 %v4627_v32, %v4626_v13  ;;  %v5807_v53 = vpack.c.bf16 %v4611_v30, %v4610_v61  ;;  %v4041_v5 = vunpack.c.l.bf16 %v4013_v41  ;;  %v4237_v50 = vrot.slane %v8514_v31, 1 }
 0x421   :  { %9183 = vst [vmem:[#allocation58_spill] sm:$0xff] %v8525_v0  ;;  %v4243_v60 = vrot.slane %v8516_v38, 1  ;;  %v4260_v46 = vadd.f32 %v4259_v62, %v4258_v12  ;;  %5784 = vmatpush3.bf16.msra.mxu1 %v5783_v24  ;;  %v4042_v49 = vunpack.c.h.bf16 %v4013_v41  ;;  %v4277_v9 = vrot.slane %v4276_v3, 2  ;;  %v4632_v0 = vld [vmem:[#allocation16 + $0xe0] sm:$0xff] }
 0x422   :  { %5806 = vmatprep.subr.bf16.mxu0 %v5805_v42  ;;  %v4044_v37 = vunpack.c.h.bf16 %v8527_v44  ;;  %v4129_v19 = vmul.f32 %v8529_v59, %v4041_v5  ;;  %v5785_v34 = vpack.c.bf16 %v4390_v8, %v4389_v27  ;;  %v4255_v58 = vrot.slane %v4254_v22, 1 }
 0x423   :  { %5808 = vmatpush3.bf16.msra.mxu0 %v5807_v53  ;;  %v4130_v17 = vmul.f32 %v8529_v59, %v4042_v49  ;;  %v4045_v14 = vunpack.c.l.bf16 %v4015_v10  ;;  %v4046_v6 = vunpack.c.h.bf16 %v4015_v10  ;;  %v8536_v13 = vadd.f32 %v4265_v43, %v4264_v28 }
 0x424   :  { %v4132_v12 = vmul.f32 %v8529_v59, %v4044_v37  ;;  %v4281_v32 = vrot.slane %v4129_v19, 4  ;;  %5786 = vmatprep.subr.bf16.mxu1 %v5785_v34  ;;  %v4048_v62 = vunpack.c.h.bf16 %v4016_v16  ;;  %v4261_v61 = vrot.slane %v4260_v46, 1  ;;  %v4373_v34 = vld [vmem:[#allocation14 + $0x160] sm:$0xff] }
 0x425   :  { %v4287_v30 = vrot.slane %v4130_v17, 4  ;;  %v4133_v41 = vmul.f32 %v4104_v48, %v4045_v14  ;;  %v4134_v24 = vmul.f32 %v4104_v48, %v4046_v6  ;;  %v8539_v42 = vadd.f32 %v4277_v9, %v4276_v3  ;;  %v4612_v6 = vld [vmem:[#allocation16 + $0x40] sm:$0xff] }
 0x426   :  { %v4282_v27 = vadd.f32 %v4281_v32, %v4129_v19  ;;  %v4299_v8 = vrot.slane %v4132_v12, 4  ;;  %v4136_v53 = vmul.f32 %v4104_v48, %v4048_v62  ;;  %v4043_v5 = vunpack.c.l.bf16 %v8527_v44  ;;  %v4613_v44 = vld [vmem:[#allocation16 + $0x48] sm:$0xff] }
 0x427   :  { %v4288_v49 = vadd.f32 %v4287_v30, %v4130_v17  ;;  %v4305_v10 = vrot.slane %v4133_v41, 4  ;;  %v4311_v28 = vrot.slane %v4134_v24, 4  ;;  %v4047_v37 = vunpack.c.l.bf16 %v4016_v16  ;;  %v4391_v17 = vld [vmem:[#allocation14 + $0x1f0] sm:$0xff]  ;;  %v4392_v30 = vld [vmem:[#allocation14 + $0x1f8] sm:$0xff] }
 0x428   :  { %v4283_v43 = vrot.slane %v4282_v27, 2  ;;  %v4300_v2 = vadd.f32 %v4299_v8, %v4132_v12  ;;  %v4323_v15 = vrot.slane %v4136_v53, 4  ;;  %v8543_v14 = vadd.f32 %v4237_v50, %v8514_v31  ;;  %v4375_v8 = vld [vmem:[#allocation14 + $0x170] sm:$0xff] }
 0x429   :  { %v4289_v3 = vrot.slane %v4288_v49, 2  ;;  %v4306_v9 = vadd.f32 %v4305_v10, %v4133_v41  ;;  %v8545_v19 = vadd.f32 %v4311_v28, %v4134_v24  ;;  %v8548_v32 = vadd.f32 %v4243_v60, %v8516_v38  ;;  %v4630_v10 = vld [vmem:[#allocation16 + $0xd0] sm:$0xff]  ;;  %v4631_v28 = vld [vmem:[#allocation16 + $0xd8] sm:$0xff] }
 0x42a   :  { %v8550_v12 = vadd.f32 %v4255_v58, %v4254_v22  ;;  %v4301_v62 = vrot.slane %v4300_v2, 2  ;;  %v8553_v31 = vadd.f32 %v4261_v61, %v4260_v46  ;;  %v8557_v41 = vmul.f32 %v8529_v59, %v4043_v5  ;;  %v4614_v38 = vld [vmem:[#allocation16 + $0x50] sm:$0xff]  ;;  %v4652_v46 = vld [vmem:[#allocation16 + $0x180] sm:$0xff]  ;;  %v4653_v61 = vld [vmem:[#allocation16 + $0x188] sm:$0xff] }
 0x42b   :  { %v4307_v24 = vrot.slane %v4306_v9, 2  ;;  %v8559_v60 = vadd.f32 %v4283_v43, %v4282_v27  ;;  %v8561_v22 = vadd.f32 %v4289_v3, %v4288_v49  ;;  %v8563_v58 = vmul.f32 %v4104_v48, %v4047_v37  ;;  %v4637_v37 = vld [vmem:[#allocation16 + $0x108] sm:$0xff]  ;;  %v9186_v3 = vld [vmem:[#allocation26_spill] sm:$0xff] }
 0x42c   :  { %9184 = vst [vmem:[#allocation70_spill] sm:$0xff] %v8550_v12  ;;  %v8565_v16 = vadd.f32 %v4323_v15, %v4136_v53  ;;  %v8567_v33 = vadd.f32 %v4301_v62, %v4300_v2  ;;  %v4313_v59 = vrot.slane %v8545_v19, 2  ;;  %v5787_v5 = vpack.c.bf16 %v4374_v57, %v4373_v34  ;;  %v4636_v12 = vld [vmem:[#allocation16 + $0x100] sm:$0xff]  ;;  %v4617_v53 = vld [vmem:[#allocation16 + $0x68] sm:$0xff]  ;;  %v4655_v57 = vld [vmem:[#allocation16 + $0x198] sm:$0xff] }
 0x42d   :  { %9185 = vst [vmem:[#allocation73_spill] sm:$0xff] %v8563_v58  ;;  %v5809_v50 = vpack.c.bf16 %v4629_v47, %v4628_v4  ;;  %v8570_v27 = vadd.f32 %v4307_v24, %v4306_v9  ;;  %v5811_v49 = vpack.c.bf16 %v4613_v44, %v4612_v6  ;;  %v5789_v43 = vpack.c.bf16 %v4392_v30, %v4391_v17  ;;  %v4616_v15 = vld [vmem:[#allocation16 + $0x60] sm:$0xff]  ;;  %v4654_v4 = vld [vmem:[#allocation16 + $0x190] sm:$0xff]  ;;  %v4635_v30 = vld [vmem:[#allocation16 + $0xf8] sm:$0xff] }
 0x42e   :  { %v5791_v48 = vpack.c.bf16 %v4376_v51, %v4375_v8  ;;  %5788 = vmatpush3.bf16.msra.mxu1 %v5787_v5  ;;  %v1445_v2 = vmul.f32 %v8489_v36, %v9186_v3  ;;  %v5813_v62 = vpack.c.bf16 %v4631_v28, %v4630_v10  ;;  %v5815_v58 = vpack.c.bf16 %v4615_v52, %v4614_v38  ;;  %v4634_v34 = vld [vmem:[#allocation16 + $0xf0] sm:$0xff]  ;;  %v4639_v8 = vld [vmem:[#allocation16 + $0x118] sm:$0xff] }
 0x42f   :  { %5810 = vmatprep.subr.bf16.mxu0 %v5809_v50  ;;  %v3985_v47 = vrot.slane %v8455_v20, 1  ;;  %v4285_v9 = vrot.slane %v8559_v60, 1  ;;  %5790 = vmatprep.subr.bf16.mxu1 %v5789_v43  ;;  %v9187_v51 = vrot.slane %v8432_v55, 1  ;;  %v9188_v44 = vld [vmem:[#allocation74_spill] sm:$0xff]  ;;  %v5825_v36 = vpack.c.bf16 %v4653_v61, %v4652_v46  ;;  %v4619_v38 = vld [vmem:[#allocation16 + $0x78] sm:$0xff] }
 0x430   :  { %5812 = vmatpush3.bf16.msra.mxu0 %v5811_v49  ;;  %v4447_v17 = vsel %vm993_vm4, %v8437_v18, %v9188_v44  ;;  %v4638_v52 = vld [vmem:[#allocation16 + $0x110] sm:$0xff]  ;;  %1446 = vadd.xlane.f32.xlu0 %v1445_v2  ;;  %v5817_v10 = vpack.c.bf16 %v4633_v29, %v4632_v0  ;;  %v4325_v5 = vrot.slane %v8565_v16, 2  ;;  %v5827_v46 = vpack.c.bf16 %v4637_v37, %v4636_v12 }
 0x431   :  { %v3962_v6 = vadd.f32 %v9187_v51, %v8432_v55  ;;  %5814 = vmatprep.subr.bf16.mxu0 %v5813_v62  ;;  %v3986_v50 = vadd.f32 %v3985_v47, %v8455_v20  ;;  %v4448_v24 = vsel %vm995_vm5, %v8439_v26, %v4447_v17  ;;  %v4618_v28 = vld [vmem:[#allocation16 + $0x70] sm:$0xff]  ;;  %v4291_v55 = vrot.slane %v8561_v22, 1  ;;  %v4656_v62 = vld [vmem:[#allocation16 + $0x1a0] sm:$0xff] }
 0x432   :  { %v4449_v18 = vsel %vm997_vm6, %v8441_v23, %v4448_v24  ;;  %v5819_v61 = vpack.c.bf16 %v4617_v53, %v4616_v15  ;;  %5792 = vmatpush3.bf16.msra.mxu1 %v5791_v48  ;;  %v5829_v20 = vpack.c.bf16 %v4655_v57, %v4654_v4  ;;  %v5821_v43 = vpack.c.bf16 %v4635_v30, %v4634_v34  ;;  %v4657_v23 = vld [vmem:[#allocation16 + $0x1a8] sm:$0xff]  ;;  %v4658_v51 = vld [vmem:[#allocation16 + $0x1b0] sm:$0xff] }
 0x433   :  { %v4450_v49 = vsel %vm999_vm7, %v8443_v11, %v4449_v18  ;;  %v5831_v3 = vpack.c.bf16 %v4639_v8, %v4638_v52  ;;  %5826 = vmatprep.subr.bf16.mxu1 %v5825_v36  ;;  %v5823_v29 = vpack.c.bf16 %v4619_v38, %v4618_v28  ;;  %v9189_v0 = vrot.slane %v8536_v13, 1  ;;  %v4641_v4 = vld [vmem:[#allocation16 + $0x128] sm:$0xff]  ;;  %v4660_v28 = vld [vmem:[#allocation16 + $0x1c0] sm:$0xff] }
 0x434   :  { %5816 = vmatpush3.bf16.msra.mxu0 %v5815_v58  ;;  %v4451_v26 = vsel %vm1001_vm8, %v3962_v6, %v4450_v49  ;;  %v4309_v12 = vrot.slane %v8570_v27, 1  ;;  %v4292_v11 = vadd.f32 %v4291_v55, %v8561_v22  ;;  %v4314_v37 = vadd.f32 %v4313_v59, %v8545_v19  ;;  %v9191_v24 = vld [vmem:[#allocation73_spill] sm:$0xff]  ;;  %v9193_v55 = vld [vmem:[#allocation38_spill] sm:$0xff]  ;;  %v9197_v49 = vld [vmem:[#allocation72_spill] sm:$0xff] }
 0x435   :  { %v4268_v2 = vadd.f32 %v9189_v0, %v8536_v13  ;;  %v4452_v48 = vsel %vm1003_vm9, %v3986_v50, %v4451_v26  ;;  %5818 = vmatprep.subr.bf16.mxu0 %v5817_v10  ;;  %v4714_v58 = vsel %vm991_vm3, %v8464_v40, %v8457_v56  ;;  %v4286_v13 = vadd.f32 %v4285_v9, %v8559_v60  ;;  %v4640_v60 = vld [vmem:[#allocation16 + $0x120] sm:$0xff]  ;;  %v4642_v50 = vld [vmem:[#allocation16 + $0x130] sm:$0xff]  ;;  %v4661_v38 = vld [vmem:[#allocation16 + $0x1c8] sm:$0xff] }
 0x436   :  { %4599 = vmatmul.mubr.f32.vlgmr.msra.gmra.mrb[10].mxu1 %v4452_v48  ;;  %v4715_v15 = vsel %vm993_vm4, %v8506_v25, %v4714_v58  ;;  %v4708_v53 = vsel %vm993_vm4, %v8503_v63, %v8471_v7  ;;  %v4303_v47 = vrot.slane %v8567_v33, 1  ;;  %v4315_v22 = vrot.slane %v4314_v37, 1  ;;  %v9192_v10 = vld [vmem:[#allocation70_spill] sm:$0xff] }
 0x437   :  { %5828 = vmatpush3.bf16.msra.mxu1 %v5827_v46  ;;  %v4716_v19 = vsel %vm995_vm5, %v8520_v21, %v4715_v15  ;;  %v5833_v59 = vpack.c.bf16 %v4657_v23, %v4656_v62  ;;  %v4709_v56 = vsel %vm995_vm5, %v8518_v1, %v4708_v53  ;;  %v4293_v40 = vrot.slane %v8557_v41, 4  ;;  %v9195_v46 = vld [vmem:[#allocation54_spill] sm:$0xff]  ;;  %v4645_v15 = vld [vmem:[#allocation16 + $0x148] sm:$0xff] }
 0x438   :  { %5820 = vmatpush3.bf16.msra.mxu0 %v5819_v61  ;;  %5830 = vmatprep.subr.bf16.mxu1 %v5829_v20  ;;  %v4717_v25 = vsel %vm997_vm6, %v8548_v32, %v4716_v19  ;;  %v4310_v7 = vadd.f32 %v4309_v12, %v8570_v27  ;;  %v4710_v63 = vsel %vm997_vm6, %v8543_v14, %v4709_v56  ;;  %v9190_v34 = vrot.slane %v8539_v42, 1  ;;  %v4659_v32 = vld [vmem:[#allocation16 + $0x1b8] sm:$0xff]  ;;  %v9199_v12 = vld [vmem:[#allocation69_spill] sm:$0xff]  ;;  %v4662_v19 = vld [vmem:[#allocation16 + $0x1d0] sm:$0xff] }
 0x439   :  { %5822 = vmatprep.subr.bf16.mxu0 %v5821_v43  ;;  %v4316_v21 = vadd.f32 %v4315_v22, %v4314_v37  ;;  %v4718_v57 = vsel %vm999_vm7, %v4268_v2, %v4717_v25  ;;  %v4711_v1 = vsel %vm999_vm7, %v8553_v31, %v4710_v63  ;;  %v4326_v14 = vadd.f32 %v4325_v5, %v8565_v16  ;;  %v9194_v5 = vld [vmem:[#allocation61_spill] sm:$0xff]  ;;  %v9202_v25 = vld [vmem:[#allocation52_spill] sm:$0xff] }
 0x43a   :  { %v4280_v9 = vadd.f32 %v9190_v34, %v8539_v42  ;;  %v4719_v27 = vsel %vm1001_vm8, %v4292_v11, %v4718_v57  ;;  %v4712_v6 = vsel %vm1001_vm8, %v4286_v13, %v4711_v1  ;;  %v4728_v44 = vsel %vm991_vm3, %v8468_v54, %v8462_v39  ;;  %v4643_v39 = vld [vmem:[#allocation16 + $0x138] sm:$0xff]  ;;  %v4913_v54 = vld [vmem:[%s8711_s17] ss:$0 sm:$0xff] }
 0x43b   :  { %5832 = vmatpush3.bf16.msra.mxu1 %v5831_v3  ;;  %v4720_v17 = vsel %vm1003_vm9, %v4316_v21, %v4719_v27  ;;  %v5835_v31 = vpack.c.bf16 %v4641_v4, %v4640_v60  ;;  %v4304_v36 = vadd.f32 %v4303_v47, %v8567_v33  ;;  %v4729_v42 = vsel %vm993_vm4, %v8512_v35, %v4728_v44  ;;  %v9201_v13 = vld [vmem:[#allocation63_spill] sm:$0xff]  ;;  %v9205_v4 = vld [vmem:[#allocation65_spill] sm:$0xff]  ;;  %v4664_v44 = vld [vmem:[#allocation16 + $0x1e0] sm:$0xff] }
 0x43c   :  { %5824 = vmatpush3.bf16.msra.mxu0 %v5823_v29  ;;  %4803 = vmatprep.mubr.f32.mxu0 %v4720_v17  ;;  %v4713_v30 = vsel %vm1003_vm9, %v4310_v7, %v4712_v6  ;;  %v4327_v52 = vrot.slane %v4326_v14, 1  ;;  %v4730_v16 = vsel %vm995_vm5, %v8522_v45, %v4729_v42  ;;  %v5837_v8 = vpack.c.bf16 %v4659_v32, %v4658_v51  ;;  %v9196_v45 = vld [vmem:[#allocation66_spill] sm:$0xff]  ;;  %v9203_v7 = vld [vmem:[#allocation57_spill] sm:$0xff]  ;;  %v9204_v60 = vld [vmem:[#allocation71_spill] sm:$0xff] }
 0x43d   :  { %v4317_v33 = vrot.slane %v9191_v24, 4  ;;  %5834 = vmatprep.subr.bf16.mxu1 %v5833_v59  ;;  %v4731_v35 = vsel %vm997_vm6, %v9192_v10, %v4730_v16  ;;  %v5093_v18 = vadd.f32 %v9194_v5, %v9193_v55  ;;  %v5128_v61 = vadd.f32 %v9196_v45, %v9195_v46  ;;  %v9198_v29 = vld [vmem:[#allocation58_spill] sm:$0xff]  ;;  %v4663_v59 = vld [vmem:[#allocation16 + $0x1d8] sm:$0xff]  ;;  %v4665_v17 = vld [vmem:[#allocation16 + $0x1e8] sm:$0xff] }
 0x43e   :  { %v4201_v20 = vrot.slane %v9197_v49, 1  ;;  %v4294_v43 = vadd.f32 %v4293_v40, %v8557_v41  ;;  %v4328_v3 = vadd.f32 %v4327_v52, %v4326_v14  ;;  %v4732_v26 = vsel %vm999_vm7, %v4280_v9, %v4731_v35  ;;  %v4644_v41 = vld [vmem:[#allocation16 + $0x140] sm:$0xff]  ;;  %v4646_v51 = vld [vmem:[#allocation16 + $0x150] sm:$0xff]  ;;  %v4647_v32 = vld [vmem:[#allocation16 + $0x158] sm:$0xff] }
 0x43f   :  { %v4271_v0 = vrot.slane %v9198_v29, 2  ;;  %4804 = vmatmul.mubr.f32.vlgmr.msra.gmra.mrb[12].mxu0 %v4713_v30  ;;  %5836 = vmatpush3.bf16.msra.mxu1 %v5835_v31  ;;  %v4733_v2 = vsel %vm1001_vm8, %v4304_v36, %v4732_v26  ;;  %v5839_v62 = vpack.c.bf16 %v4643_v39, %v4642_v50  ;;  %v3102_v23 = vadd.f32 %v5093_v18, %v4913_v54  ;;  %v4649_v50 = vld [vmem:[#allocation16 + $0x168] sm:$0xff]  ;;  %v4666_v54 = vld [vmem:[#allocation16 + $0x1f0] sm:$0xff]  ;;  %v4651_v5 = vld [vmem:[#allocation16 + $0x178] sm:$0xff] }
 0x440   :  { %v9200_v48 = vrot.slane %v9199_v12, 2  ;;  %v4734_v37 = vsel %vm1003_vm9, %v4328_v3, %v4733_v2  ;;  %5838 = vmatprep.subr.bf16.mxu1 %v5837_v8  ;;  %v5841_v58 = vpack.c.bf16 %v4661_v38, %v4660_v28  ;;  %v4225_v53 = vrot.slane %v9201_v13, 1  ;;  %v4648_v8 = vld [vmem:[#allocation16 + $0x160] sm:$0xff]  ;;  %v4650_v55 = vld [vmem:[#allocation16 + $0x170] sm:$0xff] }
 0x441   :  { %v4318_v47 = vadd.f32 %v4317_v33, %v9191_v24  ;;  %4873 = vmatprep.mubr.f32.mxu1 %v4734_v37  ;;  %v3172_v22 = vadd.f32 %v5128_v61, %v3102_v23  ;;  %v4202_v56 = vadd.f32 %v4201_v20, %v9197_v49  ;;  %v4295_v40 = vrot.slane %v4294_v43, 2  ;;  %v4667_v24 = vld [vmem:[#allocation16 + $0x1f8] sm:$0xff] }
 0x442   :  { %v4248_v11 = vadd.f32 %v9200_v48, %v9199_v12  ;;  %v5163_v63 = vadd.f32 %v9203_v7, %v9202_v25  ;;  %v4721_v21 = vsel %vm991_vm3, %v9205_v4, %v9204_v60  ;;  %v4272_v57 = vadd.f32 %v4271_v0, %v9198_v29  ;;  %v4914_v29 = vld [vmem:[%s8713_s19] ss:$0 sm:$0xff] }
 0x443   :  { %5840 = vmatpush3.bf16.msra.mxu1 %v5839_v62  ;;  %v5843_v1 = vpack.c.bf16 %v4645_v15, %v4644_v41  ;;  %v5845_v9 = vpack.c.bf16 %v4663_v59, %v4662_v19  ;;  %v4226_v6 = vadd.f32 %v4225_v53, %v9201_v13  ;;  %v4319_v14 = vrot.slane %v4318_v47, 2  ;;  %v4915_v59 = vld [vmem:[%s8715_s21] ss:$0 sm:$0xff] }
 0x444   :  { %v4249_v34 = vrot.slane %v4248_v11, 1  ;;  %5842 = vmatprep.subr.bf16.mxu1 %v5841_v58  ;;  %v3242_v27 = vadd.f32 %v5163_v63, %v3172_v22  ;;  %v4296_v31 = vadd.f32 %v4295_v40, %v4294_v43  ;;  %v4722_v36 = vsel %vm993_vm4, %v4202_v56, %v4721_v21 }
 0x445   :  { %v4273_v42 = vrot.slane %v4272_v57, 1  ;;  %v5847_v30 = vpack.c.bf16 %v4647_v32, %v4646_v51  ;;  %v5849_v16 = vpack.c.bf16 %v4665_v17, %v4664_v44  ;;  %v4320_v39 = vadd.f32 %v4319_v14, %v4318_v47 }
 0x446   :  { %v4250_v52 = vadd.f32 %v4249_v34, %v4248_v11  ;;  %v4723_v33 = vsel %vm995_vm5, %v4226_v6, %v4722_v36  ;;  %v4297_v10 = vrot.slane %v4296_v31, 1  ;;  %v5851_v28 = vpack.c.bf16 %v4649_v50, %v4648_v8 }
 0x447   :  { %5844 = vmatpush3.bf16.msra.mxu1 %v5843_v1  ;;  %v4274_v35 = vadd.f32 %v4273_v42, %v4272_v57  ;;  %v5853_v38 = vpack.c.bf16 %v4667_v24, %v4666_v54  ;;  %v4321_v46 = vrot.slane %v4320_v39, 1  ;;  %v5855_v61 = vpack.c.bf16 %v4651_v5, %v4650_v55  ;;  %v4916_v57 = vld [vmem:[%s9206_s10] ss:$0 sm:$0xff] }
 0x448   :  { %5846 = vmatprep.subr.bf16.mxu1 %v5845_v9  ;;  %v4724_v18 = vsel %vm997_vm6, %v4250_v52, %v4723_v33  ;;  %v4298_v45 = vadd.f32 %v4297_v10, %v4296_v31  ;;  %v4887_v14 = vstv %s4917_s4  ;;  %v4885_v44 = vstv %s4882_s1 }
 0x449   :  { %v4725_v49 = vsel %vm999_vm7, %v4274_v35, %v4724_v18  ;;  %v4322_v20 = vadd.f32 %v4321_v46, %v4320_v39  ;;  %v4890_v31 = vstv %s4918_s9 }
 0x44a   :  { %v4726_v43 = vsel %vm1001_vm8, %v4298_v45, %v4725_v49 }
 0x44b   :  { %5848 = vmatpush3.bf16.msra.mxu1 %v5847_v30  ;;  %v4727_v3 = vsel %vm1003_vm9, %v4322_v20, %v4726_v43 }
 0x44c   :  { %5850 = vmatprep.subr.bf16.mxu1 %v5849_v16 }
 0x44f   :  { %5852 = vmatpush3.bf16.msra.mxu1 %v5851_v28 }
 0x450   :  { %5854 = vmatprep.subr.bf16.mxu1 %v5853_v38 }
 0x453   :  { %5856 = vmatpush3.bf16.msra.mxu1 %v5855_v61 }
 0x456   :  { %4874 = vmatmul.mubr.f32.vlgmr.msra.gmra.mrb[12].mxu1 %v4727_v3 }
 0x473   :  { %v5196_v26 = vpop.f32.mrb[6].mxu1 }
 0x474   :  { %v5197_v0 = vpop.f32.mrb[7].mxu1 }
 0x475   :  { %v5198_v2 = vadd.f32 %v5197_v0, %v5196_v26 }
 0x476   :  { %v5231_v62 = vpop.f32.mrb[8].mxu0 }
 0x477   :  { %v3511_v23 = vadd.f32 %v5198_v2, %v4914_v29  ;;  %v5232_v12 = vpop.f32.mrb[9].mxu0 }
 0x478   :  { %v5233_v48 = vadd.f32 %v5232_v12, %v5231_v62 }
 0x47a   :  { %v3581_v11 = vadd.f32 %v5233_v48, %v3511_v23 }
 0x4ba   :  { %v5266_v37 = vpop.f32.mrb[8].mxu1 }
 0x4bb   :  { %v5267_v58 = vpop.f32.mrb[9].mxu1 }
 0x4bc   :  { %v5268_v41 = vadd.f32 %v5267_v58, %v5266_v37 }
 0x4bd   :  { %v1447_v13 = vpop.xlane.xlu0 %1446 }
 0x4be   :  { %v3651_v15 = vadd.f32 %v5268_v41, %v3581_v11  ;;  %4894 = vst.msk [vmem:[%s8719_s25] sm:$0xff] %vm4893_vm12, %v1447_v13  ;;  %v4886_v36 = vmul.f32 %v4885_v44, %v1447_v13 }
 0x4c0   :  { %v3654_v53 = vmul.f32 %v3651_v15, %v3242_v27 }
 0x4c2   :  { %3655 = vadd.xlane.f32.xlu1 %v3654_v53  ;;  %v5301_v47 = vpop.f32.mrb[10].mxu0 }
 0x4c3   :  { %v5302_v22 = vpop.f32.mrb[11].mxu0 }
 0x4c4   :  { %v5303_v19 = vadd.f32 %v5302_v22, %v5301_v47 }
 0x4c6   :  { %v4531_v25 = vadd.f32 %v5303_v19, %v4915_v59 }
 0x509   :  { %v5336_v56 = vpop.f32.mrb[10].mxu1 }
 0x50a   :  { %v5337_v40 = vpop.f32.mrb[11].mxu1 }
 0x50b   :  { %v5338_v7 = vadd.f32 %v5337_v40, %v5336_v56 }
 0x50d   :  { %v4601_v63 = vadd.f32 %v5338_v7, %v4531_v25 }
 0x512   :  { %v5371_v60 = vpop.f32.mrb[12].mxu0 }
 0x513   :  { %v5372_v4 = vpop.f32.mrb[13].mxu0 }
 0x514   :  { %v5373_v21 = vadd.f32 %v5372_v4, %v5371_v60 }
 0x516   :  { %v4806_v9 = vadd.f32 %v5373_v21, %v4916_v57 }
 0x529   :  { %v5406_v1 = vpop.f32.mrb[12].mxu1 }
 0x52a   :  { %v5407_v34 = vpop.f32.mrb[13].mxu1 }
 0x52b   :  { %v5408_v51 = vadd.f32 %v5407_v34, %v5406_v1 }
 0x52d   :  { %v4876_v32 = vadd.f32 %v5408_v51, %v4806_v9 }
 0x52f   :  { %v4879_v27 = vmul.f32 %v4876_v32, %v4601_v63 }
 0x531   :  { %4880 = vadd.xlane.f32.xlu0 %v4879_v27 }
 0x54f   :  { %v3656_v6 = vpop.xlane.xlu1 %3655 }
 0x550   :  { %4896 = vst.msk [vmem:[%s8719_s25] sm:$0xff] %vm4895_vm13, %v3656_v6  ;;  %v4888_v17 = vmul.f32 %v4887_v14, %v3656_v6 }
 0x552   :  { %v4889_v30 = vadd.f32 %v4888_v17, %v4886_v36 }
 0x5be   :  { %v4881_v42 = vpop.xlane.xlu0 %4880 }
 0x5bf   :  { %v4891_v52 = vmul.f32 %v4890_v31, %v4881_v42  ;;  %4898 = vst.msk [vmem:[%s8719_s25] sm:$0xff] %vm4897_vm14, %v4881_v42 }
 0x5c1   :  { %v4892_v16 = vadd.f32 %v4891_v52, %v4889_v30 }
 0x5c3   :  { %4900 = vst.msk [vmem:[%s8719_s25] sm:$0xff] %vm4899_vm15, %v4892_v16 }
 0x5c4   :  { %4905 = vsyncpa [#allocation3], 1 }
 0x5c5   :  { %4906 = vsyncpa [#allocation6], 1 }
 0x5c6   :  { %4907 = vsyncpa [#allocation9], 1 }
 0x5c7   :  { %4908 = vsyncpa [#allocation12], 1 }
 0x5c8   :  { %4909 = vsyncpa [#allocation15], 1 }
 0x5c9   :  { %4910 = vsyncpa [#allocation4], 1 }

</bundles_post_ra>
